<compile_context>
chip_gen: v5e
topology: v5e:2x2
jax: 0.10.0
libtpu: 0.0.40
codegen_flags: <defaults>
</compile_context>

<pallas_src>
import functools

import jax
import jax.numpy as jnp
from jax.experimental import pallas as pl
from jax.experimental.pallas import tpu as pltpu

CONF_A = [64, 'M', 128, 'M', 256, 256, 'M', 512, 512, 'M', 512, 512, 'M']

_VMEM_LIMIT = 48 * 1024 * 1024   # <= v7x physical 64 MiB, plenty on v5e/v6e
_EPS = 1e-5


# ---------------------------------------------------------------------------
# Conv3x3 (stride 1, pad 1, no bias) + fused per-channel sum / sum-of-squares.
# Input is the PRE-PADDED sample (halo produced by the previous fused stage or
# a cheap XLA pad).  Grid = (N, H // TH); the whole padded sample stays
# resident in VMEM (input index_map ignores h) so it is DMA'd once per sample.
# The three dx taps of each dy row are lane-concatenated into one K = 3*Cin
# matmul (3 dots + 2 adds per step instead of 9 dots + 8 adds).
# ---------------------------------------------------------------------------
def _conv3x3_kernel(xp_ref, w_ref, y_ref, st_ref, *, TH, W, Cin, Cout):
    h0 = pl.program_id(1) * TH
    acc = None
    for dy in range(3):
        taps = [xp_ref[0, pl.ds(h0 + dy, TH), pl.ds(dx, W), :]
                for dx in range(3)]
        slab = jnp.concatenate(taps, axis=-1).reshape(TH * W, 3 * Cin)
        d = jnp.dot(slab, w_ref[dy], preferred_element_type=jnp.float32)
        acc = d if acc is None else acc + d
    y_ref[0] = acc.reshape(TH, W, Cout).astype(y_ref.dtype)
    s1 = jnp.sum(acc, axis=0, keepdims=True)            # (1, Cout)
    s2 = jnp.sum(acc * acc, axis=0, keepdims=True)      # (1, Cout)
    st_ref[0, 0] = jnp.concatenate([s1, s2], axis=0)    # (2, Cout)


def conv3x3_bn_stats(xp, w):
    """xp: (N, H+2, W+2, Cin) bf16 pre-padded, w: (3,3,Cin,Cout) bf16."""
    N, Hp, Wp, Cin = xp.shape
    H, W = Hp - 2, Wp - 2
    Cout = w.shape[-1]
    TH = min(H, 64 if Cin <= 128 else 32)   # keeps the worst layer < ~25 MiB
    while H % TH:
        TH //= 2
    HB = H // TH
    wg = w.reshape(3, 3 * Cin, Cout)        # per-dy grouped weights
    kernel = functools.partial(_conv3x3_kernel, TH=TH, W=W, Cin=Cin, Cout=Cout)
    return pl.pallas_call(
        kernel,
        out_shape=(jax.ShapeDtypeStruct((N, H, W, Cout), jnp.bfloat16),
                   jax.ShapeDtypeStruct((N, HB, 2, Cout), jnp.float32)),
        grid=(N, HB),
        in_specs=[pl.BlockSpec((1, Hp, Wp, Cin), lambda n, h: (n, 0, 0, 0)),
                  pl.BlockSpec((3, 3 * Cin, Cout), lambda n, h: (0, 0, 0))],
        out_specs=(pl.BlockSpec((1, TH, W, Cout), lambda n, h: (n, h, 0, 0)),
                   pl.BlockSpec((1, 1, 2, Cout), lambda n, h: (n, h, 0, 0))),
        compiler_params=pltpu.CompilerParams(
            dimension_semantics=("parallel", "arbitrary"),
            vmem_limit_bytes=_VMEM_LIMIT),
    )(xp, wg)


# ---------------------------------------------------------------------------
# First conv (Cin=3): im2col the 3x3 taps in XLA (the raw input is tiny) so the
# kernel is one lane-dense K=27 matmul per row block.
# ---------------------------------------------------------------------------
def _pconv_kernel(x_ref, w_ref, y_ref, st_ref):
    TH, W, K = x_ref.shape[1], x_ref.shape[2], x_ref.shape[3]
    Cout = y_ref.shape[-1]
    acc = jnp.dot(x_ref[0].reshape(TH * W, K), w_ref[...],
                  preferred_element_type=jnp.float32)
    y_ref[0] = acc.reshape(TH, W, Cout).astype(y_ref.dtype)
    s1 = jnp.sum(acc, axis=0, keepdims=True)
    s2 = jnp.sum(acc * acc, axis=0, keepdims=True)
    st_ref[0, 0] = jnp.concatenate([s1, s2], axis=0)


def conv3x3_first(x, w):
    N, H, W, Cin = x.shape
    Cout = w.shape[-1]
    xp = jnp.pad(x, ((0, 0), (1, 1), (1, 1), (0, 0)))
    patches = jnp.concatenate(
        [xp[:, dy:dy + H, dx:dx + W, :] for dy in range(3) for dx in range(3)],
        axis=-1)                                         # (N, H, W, 9*Cin)
    K = 9 * Cin
    wk = w.reshape(K, Cout)
    TH = min(H, 64)
    while H % TH:
        TH //= 2
    HB = H // TH
    return pl.pallas_call(
        _pconv_kernel,
        out_shape=(jax.ShapeDtypeStruct((N, H, W, Cout), jnp.bfloat16),
                   jax.ShapeDtypeStruct((N, HB, 2, Cout), jnp.float32)),
        grid=(N, HB),
        in_specs=[pl.BlockSpec((1, TH, W, K), lambda n, h: (n, h, 0, 0)),
                  pl.BlockSpec((K, Cout), lambda n, h: (0, 0))],
        out_specs=(pl.BlockSpec((1, TH, W, Cout), lambda n, h: (n, h, 0, 0)),
                   pl.BlockSpec((1, 1, 2, Cout), lambda n, h: (n, h, 0, 0))),
        compiler_params=pltpu.CompilerParams(
            dimension_semantics=("parallel", "parallel"),
            vmem_limit_bytes=_VMEM_LIMIT),
    )(patches, wk)


# ---------------------------------------------------------------------------
# BatchNorm finalisation (per-channel scalars, train-mode batch statistics).
# ---------------------------------------------------------------------------
def bn_affine_from_stats(stats, gamma, beta, count, eps=_EPS):
    s1 = jnp.sum(stats[:, :, 0, :], axis=(0, 1))
    s2 = jnp.sum(stats[:, :, 1, :], axis=(0, 1))
    mean = s1 / count
    var = jnp.maximum(s2 / count - mean * mean, 0.0)     # biased, like PyTorch
    scale = gamma / jnp.sqrt(var + eps)
    shift = beta - mean * scale
    return scale, shift


# ---------------------------------------------------------------------------
# Fused BN-affine + ReLU + 2x2 max-pool (for convs followed by 'M').
# ---------------------------------------------------------------------------
def _bn_relu_pool_kernel(y_ref, s_ref, b_ref, o_ref):
    x = y_ref[0].astype(jnp.float32)                     # (2T, W, C)
    z = jnp.maximum(x * s_ref[...] + b_ref[...], 0.0)
    TT, W, C = z.shape
    T, Wo = TT // 2, W // 2
    # height pool: split leading dim into row pairs (cheap, no relayout)
    zr = z.reshape(T, 2, W, C)
    zh = jnp.maximum(zr[:, 0], zr[:, 1])                 # (T, W, C)
    # width pool: fold adjacent column pairs into adjacent lane groups
    zw = zh.reshape(T, Wo, 2 * C)
    out = jnp.maximum(zw[:, :, :C], zw[:, :, C:])        # (T, Wo, C)
    o_ref[0] = out.astype(o_ref.dtype)


def bn_relu_pool(y, scale, shift):
    N, H, W, C = y.shape
    Ho, Wo = H // 2, W // 2
    THo = min(Ho, 32)
    while Ho % THo:
        THo //= 2
    return pl.pallas_call(
        _bn_relu_pool_kernel,
        out_shape=jax.ShapeDtypeStruct((N, Ho, Wo, C), jnp.bfloat16),
        grid=(N, Ho // THo),
        in_specs=[pl.BlockSpec((1, 2 * THo, W, C), lambda n, h: (n, h, 0, 0)),
                  pl.BlockSpec((1, C), lambda n, h: (0, 0)),
                  pl.BlockSpec((1, C), lambda n, h: (0, 0))],
        out_specs=pl.BlockSpec((1, THo, Wo, C), lambda n, h: (n, h, 0, 0)),
        compiler_params=pltpu.CompilerParams(
            dimension_semantics=("parallel", "parallel"),
            vmem_limit_bytes=_VMEM_LIMIT),
    )(y, scale.reshape(1, C).astype(jnp.float32),
      shift.reshape(1, C).astype(jnp.float32))


# ---------------------------------------------------------------------------
# Fused BN-affine + ReLU + zero halo (for convs NOT followed by 'M').
# Emits the next conv's zero-padded input directly -> no jnp.pad round trip.
# ---------------------------------------------------------------------------
def _bn_relu_pad_kernel(y_ref, s_ref, b_ref, o_ref):
    H, W = y_ref.shape[1], y_ref.shape[2]
    z = jnp.maximum(
        y_ref[0].astype(jnp.float32) * s_ref[...] + b_ref[...], 0.0)
    o_ref[0] = jnp.zeros(o_ref.shape[1:], o_ref.dtype)
    o_ref[0, pl.ds(1, H), pl.ds(1, W), :] = z.astype(o_ref.dtype)


def bn_relu_pad(y, scale, shift):
    N, H, W, C = y.shape
    return pl.pallas_call(
        _bn_relu_pad_kernel,
        out_shape=jax.ShapeDtypeStruct((N, H + 2, W + 2, C), jnp.bfloat16),
        grid=(N,),
        in_specs=[pl.BlockSpec((1, H, W, C), lambda n: (n, 0, 0, 0)),
                  pl.BlockSpec((1, C), lambda n: (0, 0)),
                  pl.BlockSpec((1, C), lambda n: (0, 0))],
        out_specs=pl.BlockSpec((1, H + 2, W + 2, C), lambda n: (n, 0, 0, 0)),
        compiler_params=pltpu.CompilerParams(
            dimension_semantics=("parallel",),
            vmem_limit_bytes=_VMEM_LIMIT),
    )(y, scale.reshape(1, C).astype(jnp.float32),
      shift.reshape(1, C).astype(jnp.float32))


# ---------------------------------------------------------------------------
# Fallback path: plain fused BN-affine + ReLU (elementwise only, always lowers)
# followed by a pure-XLA 2x2 max-pool.  Used only if the fused pool kernel
# fails its one-time probe.
# ---------------------------------------------------------------------------
def _bn_relu_kernel(y_ref, s_ref, b_ref, o_ref):
    o_ref[...] = jnp.maximum(
        y_ref[...].astype(jnp.float32) * s_ref[...] + b_ref[...],
        0.0).astype(o_ref.dtype)


def bn_relu(y, scale, shift):
    N, H, W, C = y.shape
    rows = N * H * W
    BR = min(8192, rows)
    while rows % BR:
        BR //= 2
    out = pl.pallas_call(
        _bn_relu_kernel,
        out_shape=jax.ShapeDtypeStruct((rows, C), jnp.bfloat16),
        grid=(rows // BR,),
        in_specs=[pl.BlockSpec((BR, C), lambda i: (i, 0)),
                  pl.BlockSpec((1, C), lambda i: (0, 0)),
                  pl.BlockSpec((1, C), lambda i: (0, 0))],
        out_specs=pl.BlockSpec((BR, C), lambda i: (i, 0)),
        compiler_params=pltpu.CompilerParams(
            dimension_semantics=("parallel",),
            vmem_limit_bytes=_VMEM_LIMIT),
    )(y.reshape(rows, C),
      scale.reshape(1, C).astype(jnp.float32),
      shift.reshape(1, C).astype(jnp.float32))
    return out.reshape(N, H, W, C)


def _pool2x2_xla(z):
    N, H, W, C = z.shape
    return jnp.max(z.reshape(N, H // 2, 2, W // 2, 2, C), axis=(2, 4))


_FUSED_POOL_OK = None


def _probe_fused_pool():
    """One-time tiny-shape compile/run + numerics check of the fused pool
    kernel; on any failure the forward uses the safe bn_relu + XLA pool."""
    global _FUSED_POOL_OK
    if _FUSED_POOL_OK is not None:
        return _FUSED_POOL_OK
    ok = True
    try:
        for c in (64, 128, 512):
            ky, ks, kb = jax.random.split(jax.random.PRNGKey(c), 3)
            yf = jax.random.normal(ky, (1, 8, 16, c), jnp.float32)
            sc = 1.0 + 0.1 * jax.random.normal(ks, (c,), jnp.float32)
            sh = 0.1 * jax.random.normal(kb, (c,), jnp.float32)
            yb = yf.astype(jnp.bfloat16)
            got = bn_relu_pool(yb, sc, sh).astype(jnp.float32)
            ref = _pool2x2_xla(
                jnp.maximum(yb.astype(jnp.float32) * sc + sh, 0.0))
            if not bool(jnp.allclose(got, ref, atol=3e-2, rtol=3e-2)):
                ok = False
                break
    except Exception:
        ok = False
    _FUSED_POOL_OK = ok
    return ok


# ---------------------------------------------------------------------------
# Linear(512*8*8 -> 200): K-tiled bf16 matmul, f32 VMEM accumulator.
# ---------------------------------------------------------------------------
def _linear_kernel(x_ref, w_ref, b_ref, o_ref, acc_ref):
    k = pl.program_id(0)

    @pl.when(k == 0)
    def _():
        acc_ref[...] = jnp.zeros_like(acc_ref)

    acc_ref[...] += jnp.dot(x_ref[...], w_ref[...],
                            preferred_element_type=jnp.float32)

    @pl.when(k == pl.num_programs(0) - 1)
    def _():
        o_ref[...] = acc_ref[...] + b_ref[...]


def linear(x, w, b, tk=8192):
    N, K = x.shape
    _, M = w.shape
    tk = min(tk, K)
    while K % tk:
        tk //= 2
    return pl.pallas_call(
        _linear_kernel,
        out_shape=jax.ShapeDtypeStruct((N, M), jnp.float32),
        grid=(K // tk,),
        in_specs=[pl.BlockSpec((N, tk), lambda k: (0, k)),
                  pl.BlockSpec((tk, M), lambda k: (k, 0)),
                  pl.BlockSpec((1, M), lambda k: (0, 0))],
        out_specs=pl.BlockSpec((N, M), lambda k: (0, 0)),
        scratch_shapes=[pltpu.VMEM((N, M), jnp.float32)],
        compiler_params=pltpu.CompilerParams(
            dimension_semantics=("arbitrary",),
            vmem_limit_bytes=_VMEM_LIMIT),
    )(x, w, b.reshape(1, M).astype(jnp.float32))


# ---------------------------------------------------------------------------
# Parameters (deterministic, synthetic) and full forward.
# ---------------------------------------------------------------------------
def init_params(key):
    params = {"convs": [], "bns": []}
    cin = 3
    for v in CONF_A:
        if v == 'M':
            continue
        key, k1, k2, k3 = jax.random.split(key, 4)
        w = jax.random.normal(k1, (3, 3, cin, v), jnp.float32) / jnp.sqrt(9.0 * cin)
        gamma = 1.0 + 0.1 * jax.random.normal(k2, (v,), jnp.float32)
        beta = 0.1 * jax.random.normal(k3, (v,), jnp.float32)
        # Conv bias omitted: exactly cancelled by the train-mode BatchNorm
        # mean subtraction that immediately follows.
        params["convs"].append(w.astype(jnp.bfloat16))
        params["bns"].append((gamma, beta))
        cin = v
    key, k1, k2 = jax.random.split(key, 3)
    wl = 0.01 * jax.random.normal(k1, (512 * 8 * 8, 200), jnp.float32)
    bl = 0.01 * jax.random.normal(k2, (200,), jnp.float32)
    params["fc"] = (wl.astype(jnp.bfloat16), bl)
    return params


def vgg11_forward(params, x_nchw):
    fused_pool = _probe_fused_pool()
    x = jnp.transpose(x_nchw, (0, 2, 3, 1)).astype(jnp.bfloat16)   # NCHW->NHWC
    ci = 0
    prepadded = False   # True when x already carries the 1-px zero halo
    for li, v in enumerate(CONF_A):
        if v == 'M':
            continue              # 2x2 max-pool is fused into the BN/ReLU stage
        w = params["convs"][ci]
        gamma, beta = params["bns"][ci]
        if ci == 0:
            y, stats = conv3x3_first(x, w)
        else:
            xp = x if prepadded else jnp.pad(
                x, ((0, 0), (1, 1), (1, 1), (0, 0)))
            y, stats = conv3x3_bn_stats(xp, w)
        N, H, W, C = y.shape
        scale, shift = bn_affine_from_stats(stats, gamma, beta, N * H * W)
        pooled = li + 1 < len(CONF_A) and CONF_A[li + 1] == 'M'
        if pooled:
            if fused_pool:
                x = bn_relu_pool(y, scale, shift)
            else:
                x = _pool2x2_xla(bn_relu(y, scale, shift))
            prepadded = False
        else:
            x = bn_relu_pad(y, scale, shift)   # emits the next conv's halo
            prepadded = True
        ci += 1
    # nn.AvgPool2d(kernel_size=1, stride=1) is the identity.
    N = x.shape[0]
    feat = jnp.transpose(x, (0, 3, 1, 2)).reshape(N, -1)   # PyTorch NCHW flatten
    wl, bl = params["fc"]
    return linear(feat, wl, bl)


# ---------------------------------------------------------------------------
# Pure-JAX references for sanity checks.
# ---------------------------------------------------------------------------
def _conv3x3_ref(x, w):
    N, H, W, _ = x.shape
    xp = jnp.pad(x, ((0, 0), (1, 1), (1, 1), (0, 0)))
    out = jnp.zeros((N, H, W, w.shape[-1]), jnp.float32)
    for dy in range(3):
        for dx in range(3):
            out += jnp.einsum('nhwc,co->nhwo',
                              xp[:, dy:dy + H, dx:dx + W, :], w[dy, dx])
    return out


if __name__ == "__main__":
    key = jax.random.PRNGKey(0)
    kp, kx, k1, k2, k3, k4, k5, k6 = jax.random.split(key, 8)

    def f32q(a):  # bf16 round-trip so references use the same quantized inputs
        return a.astype(jnp.bfloat16).astype(jnp.float32)

    # Decide fused-pool vs. fallback before building the big graph.
    _probe_fused_pool()

    # --- grouped-tap conv kernel + fused BN statistics (Cin = 128) ---
    x1 = jax.random.normal(k1, (1, 16, 16, 128), jnp.float32)
    w1 = jax.random.normal(k2, (3, 3, 128, 128), jnp.float32) / jnp.sqrt(9.0 * 128)
    x1p = jnp.pad(x1.astype(jnp.bfloat16), ((0, 0), (1, 1), (1, 1), (0, 0)))
    y1, st1 = conv3x3_bn_stats(x1p, w1.astype(jnp.bfloat16))
    ref1 = _conv3x3_ref(f32q(x1), f32q(w1))
    assert jnp.allclose(y1.astype(jnp.float32), ref1, atol=7e-2, rtol=7e-2)
    cnt = 1 * 16 * 16
    mean1 = jnp.sum(st1[:, :, 0, :], axis=(0, 1)) / cnt
    var1 = jnp.sum(st1[:, :, 1, :], axis=(0, 1)) / cnt - mean1 ** 2
    assert jnp.allclose(mean1, jnp.mean(ref1, axis=(0, 1, 2)), atol=3e-2)
    assert jnp.allclose(var1, jnp.var(ref1, axis=(0, 1, 2)), atol=7e-2, rtol=7e-2)

    # --- first-layer conv (Cin = 3, XLA im2col, single K=27 dot) ---
    x3 = jax.random.normal(k3, (1, 16, 16, 3), jnp.float32)
    w3 = jax.random.normal(k4, (3, 3, 3, 64), jnp.float32) / jnp.sqrt(27.0)
    y3, _ = conv3x3_first(x3.astype(jnp.bfloat16), w3.astype(jnp.bfloat16))
    assert jnp.allclose(y3.astype(jnp.float32), _conv3x3_ref(f32q(x3), f32q(w3)),
                        atol=7e-2, rtol=7e-2)

    # --- fused BN affine + ReLU + zero-halo pad ---
    yb = jax.random.normal(k5, (1, 8, 8, 128), jnp.float32)
    sc = 1.0 + 0.3 * jax.random.normal(k6, (128,), jnp.float32)
    sh = 0.2 * jax.random.normal(k1, (128,), jnp.float32)
    gotp = bn_relu_pad(yb.astype(jnp.bfloat16), sc, sh).astype(jnp.float32)
    refp = jnp.pad(jnp.maximum(f32q(yb) * sc + sh, 0.0),
                   ((0, 0), (1, 1), (1, 1), (0, 0)))
    assert jnp.allclose(gotp, refp, atol=3e-2, rtol=3e-2)

    # --- full VGG11 forward (Linear(512*8*8, 200) forces 256x256 input) ---
    params = init_params(kp)
    x = jax.random.normal(kx, (2, 3, 256, 256), jnp.float32)
    fwd = jax.jit(vgg11_forward)
    out = jax.block_until_ready(fwd(params, x))
    assert out.shape == (2, 200)
    assert bool(jnp.all(jnp.isfinite(out)))
    print("KERNEL_OK")
</pallas_src>

<mosaic_0001>
module attributes {stable_mosaic.version = 11 : i64} {
  func.func @_bn_relu_pool_kernel(%arg0: i32, %arg1: i32, %arg2: memref<1x8x16x64xbf16, #tpu.memory_space<vmem>>, %arg3: memref<1x64xf32, #tpu.memory_space<vmem>>, %arg4: memref<1x64xf32, #tpu.memory_space<vmem>>, %arg5: memref<1x4x8x64xbf16, #tpu.memory_space<vmem>>) attributes {dimension_semantics = [#tpu.dimension_semantics<parallel>, #tpu.dimension_semantics<parallel>], iteration_bounds = array<i64: 1, 1>, scalar_prefetch = 0 : i64, scratch_operands = 0 : i64, tpu.core_type = #tpu.core_type<tc>, window_params = [{transform_indices = @transform_0, window_bounds = array<i64: 1, 8, 16, 64>}, {pipeline_mode = #tpu.pipeline_mode<synchronous>, transform_indices = @transform_1, window_bounds = array<i64: 1, 64>}, {pipeline_mode = #tpu.pipeline_mode<synchronous>, transform_indices = @transform_2, window_bounds = array<i64: 1, 64>}, {transform_indices = @transform_3, window_bounds = array<i64: 1, 4, 8, 64>}]} {
    %c0 = arith.constant 0 : index
    %c0_0 = arith.constant 0 : index
    %c0_1 = arith.constant 0 : index
    %c0_2 = arith.constant 0 : index
    %0 = vector.load %arg2[%c0, %c0_0, %c0_1, %c0_2] : memref<1x8x16x64xbf16, #tpu.memory_space<vmem>>, vector<1x8x16x64xbf16>
    %1 = vector.shape_cast %0 : vector<1x8x16x64xbf16> to vector<8x16x64xbf16>
    %2 = arith.extf %1 : vector<8x16x64xbf16> to vector<8x16x64xf32>
    %c0_3 = arith.constant 0 : index
    %c0_4 = arith.constant 0 : index
    %3 = vector.load %arg3[%c0_3, %c0_4] : memref<1x64xf32, #tpu.memory_space<vmem>>, vector<1x64xf32>
    %4 = vector.shape_cast %3 : vector<1x64xf32> to vector<1x1x64xf32>
    %5 = vector.broadcast %4 : vector<1x1x64xf32> to vector<8x16x64xf32>
    %6 = arith.mulf %2, %5 : vector<8x16x64xf32>
    %c0_5 = arith.constant 0 : index
    %c0_6 = arith.constant 0 : index
    %7 = vector.load %arg4[%c0_5, %c0_6] : memref<1x64xf32, #tpu.memory_space<vmem>>, vector<1x64xf32>
    %8 = vector.shape_cast %7 : vector<1x64xf32> to vector<1x1x64xf32>
    %9 = vector.broadcast %8 : vector<1x1x64xf32> to vector<8x16x64xf32>
    %10 = arith.addf %6, %9 : vector<8x16x64xf32>
    %cst = arith.constant 0.000000e+00 : f32
    %11 = vector.broadcast %cst : f32 to vector<8x16x64xf32>
    %12 = arith.maximumf %10, %11 : vector<8x16x64xf32>
    %13 = vector.shape_cast %12 : vector<8x16x64xf32> to vector<4x2x16x64xf32>
    %14 = vector.extract_strided_slice %13 {offsets = [0, 0, 0, 0], sizes = [4, 1, 16, 64], strides = [1, 1, 1, 1]} : vector<4x2x16x64xf32> to vector<4x1x16x64xf32>
    %15 = vector.shape_cast %14 : vector<4x1x16x64xf32> to vector<4x16x64xf32>
    %16 = vector.extract_strided_slice %13 {offsets = [0, 1, 0, 0], sizes = [4, 1, 16, 64], strides = [1, 1, 1, 1]} : vector<4x2x16x64xf32> to vector<4x1x16x64xf32>
    %17 = vector.shape_cast %16 : vector<4x1x16x64xf32> to vector<4x16x64xf32>
    %18 = arith.maximumf %15, %17 : vector<4x16x64xf32>
    %19 = vector.shape_cast %18 : vector<4x16x64xf32> to vector<4x8x128xf32>
    %20 = vector.extract_strided_slice %19 {offsets = [0, 0, 0], sizes = [4, 8, 64], strides = [1, 1, 1]} : vector<4x8x128xf32> to vector<4x8x64xf32>
    %21 = vector.extract_strided_slice %19 {offsets = [0, 0, 64], sizes = [4, 8, 64], strides = [1, 1, 1]} : vector<4x8x128xf32> to vector<4x8x64xf32>
    %22 = arith.maximumf %20, %21 : vector<4x8x64xf32>
    %23 = arith.truncf %22 : vector<4x8x64xf32> to vector<4x8x64xbf16>
    %c0_7 = arith.constant 0 : index
    %c0_8 = arith.constant 0 : index
    %c0_9 = arith.constant 0 : index
    %c0_10 = arith.constant 0 : index
    %24 = vector.load %arg5[%c0_7, %c0_8, %c0_9, %c0_10] : memref<1x4x8x64xbf16, #tpu.memory_space<vmem>>, vector<1x4x8x64xbf16>
    %25 = vector.shape_cast %24 : vector<1x4x8x64xbf16> to vector<4x8x64xbf16>
    %26 = vector.shape_cast %23 : vector<4x8x64xbf16> to vector<1x4x8x64xbf16>
    tpu.vector_store %arg5[%c0_7, %c0_8, %c0_9, %c0_10], %26 {strides = array<i32>} : memref<1x4x8x64xbf16, #tpu.memory_space<vmem>>, vector<1x4x8x64xbf16>,
    return
  }
  func.func @transform_0(%arg0: i32, %arg1: i32) -> (i32, i32, i32, i32) {
    %c0_i32 = arith.constant 0 : i32
    %c0_i32_0 = arith.constant 0 : i32
    %c0_i32_1 = arith.constant 0 : i32
    return %arg0, %arg1, %c0_i32, %c0_i32_0 : i32, i32, i32, i32
  }
  func.func @transform_1(%arg0: i32, %arg1: i32) -> (i32, i32) {
    %c0_i32 = arith.constant 0 : i32
    %c0_i32_0 = arith.constant 0 : i32
    %c0_i32_1 = arith.constant 0 : i32
    return %c0_i32, %c0_i32_0 : i32, i32
  }
  func.func @transform_2(%arg0: i32, %arg1: i32) -> (i32, i32) {
    %c0_i32 = arith.constant 0 : i32
    %c0_i32_0 = arith.constant 0 : i32
    %c0_i32_1 = arith.constant 0 : i32
    return %c0_i32, %c0_i32_0 : i32, i32
  }
  func.func @transform_3(%arg0: i32, %arg1: i32) -> (i32, i32, i32, i32) {
    %c0_i32 = arith.constant 0 : i32
    %c0_i32_0 = arith.constant 0 : i32
    %c0_i32_1 = arith.constant 0 : i32
    return %arg0, %arg1, %c0_i32, %c0_i32_0 : i32, i32, i32, i32
  }
}

module attributes {stable_mosaic.version = 11 : i64} {
  func.func @_conv3x3_kernel(%arg0: i32, %arg1: i32, %arg2: memref<1x18x18x128xbf16, #tpu.memory_space<vmem>>, %arg3: memref<3x384x128xbf16, #tpu.memory_space<vmem>>, %arg4: memref<1x16x16x128xbf16, #tpu.memory_space<vmem>>, %arg5: memref<1x1x2x128xf32, #tpu.memory_space<vmem>>) attributes {dimension_semantics = [#tpu.dimension_semantics<parallel>, #tpu.dimension_semantics<arbitrary>], iteration_bounds = array<i64: 1, 1>, scalar_prefetch = 0 : i64, scratch_operands = 0 : i64, tpu.core_type = #tpu.core_type<tc>, window_params = [{transform_indices = @transform_0, window_bounds = array<i64: 1, 18, 18, 128>}, {pipeline_mode = #tpu.pipeline_mode<synchronous>, transform_indices = @transform_1, window_bounds = array<i64: 3, 384, 128>}, {transform_indices = @transform_2, window_bounds = array<i64: 1, 16, 16, 128>}, {transform_indices = @transform_3, window_bounds = array<i64: 1, 1, 2, 128>}]} {
    %c16_i32 = arith.constant 16 : i32
    %0 = arith.muli %arg1, %c16_i32 : i32
    %c0_i32 = arith.constant 0 : i32
    %1 = arith.addi %0, %c0_i32 : i32
    %c0 = arith.constant 0 : index
    %2 = arith.index_cast %1 : i32 to index
    %c0_0 = arith.constant 0 : index
    %c0_1 = arith.constant 0 : index
    %3 = vector.load %arg2[%c0, %2, %c0_0, %c0_1] : memref<1x18x18x128xbf16, #tpu.memory_space<vmem>>, vector<1x16x16x128xbf16>
    %4 = vector.shape_cast %3 : vector<1x16x16x128xbf16> to vector<16x16x128xbf16>
    %c0_i32_2 = arith.constant 0 : i32
    %5 = arith.addi %0, %c0_i32_2 : i32
    %c0_3 = arith.constant 0 : index
    %6 = arith.index_cast %5 : i32 to index
    %c1 = arith.constant 1 : index
    %c0_4 = arith.constant 0 : index
    %7 = vector.load %arg2[%c0_3, %6, %c1, %c0_4] : memref<1x18x18x128xbf16, #tpu.memory_space<vmem>>, vector<1x16x16x128xbf16>
    %8 = vector.shape_cast %7 : vector<1x16x16x128xbf16> to vector<16x16x128xbf16>
    %c0_i32_5 = arith.constant 0 : i32
    %9 = arith.addi %0, %c0_i32_5 : i32
    %c0_6 = arith.constant 0 : index
    %10 = arith.index_cast %9 : i32 to index
    %c2 = arith.constant 2 : index
    %c0_7 = arith.constant 0 : index
    %11 = vector.load %arg2[%c0_6, %10, %c2, %c0_7] : memref<1x18x18x128xbf16, #tpu.memory_space<vmem>>, vector<1x16x16x128xbf16>
    %12 = vector.shape_cast %11 : vector<1x16x16x128xbf16> to vector<16x16x128xbf16>
    %13 = tpu.concatenate %4, %8, %12 in 2 : vector<16x16x128xbf16>, vector<16x16x128xbf16>, vector<16x16x128xbf16> -> vector<16x16x384xbf16>
    %14 = vector.shape_cast %13 : vector<16x16x384xbf16> to vector<256x384xbf16>
    %c0_8 = arith.constant 0 : index
    %c0_9 = arith.constant 0 : index
    %c0_10 = arith.constant 0 : index
    %15 = vector.load %arg3[%c0_8, %c0_9, %c0_10] : memref<3x384x128xbf16, #tpu.memory_space<vmem>>, vector<1x384x128xbf16>
    %16 = vector.shape_cast %15 : vector<1x384x128xbf16> to vector<384x128xbf16>
    %cst = arith.constant dense<0.000000e+00> : vector<256x128xf32>
    %17 = tpu.matmul %14, %16, %cst {dimension_numbers = #tpu.dot_dimension_numbers<[1], [0], [0], [1], [0, 0, 1, 1], [], []>} : vector<256x384xbf16>, vector<384x128xbf16>, vector<256x128xf32> -> vector<256x128xf32>
    %c1_i32 = arith.constant 1 : i32
    %18 = arith.addi %0, %c1_i32 : i32
    %c0_11 = arith.constant 0 : index
    %19 = arith.index_cast %18 : i32 to index
    %c0_12 = arith.constant 0 : index
    %c0_13 = arith.constant 0 : index
    %20 = vector.load %arg2[%c0_11, %19, %c0_12, %c0_13] : memref<1x18x18x128xbf16, #tpu.memory_space<vmem>>, vector<1x16x16x128xbf16>
    %21 = vector.shape_cast %20 : vector<1x16x16x128xbf16> to vector<16x16x128xbf16>
    %c1_i32_14 = arith.constant 1 : i32
    %22 = arith.addi %0, %c1_i32_14 : i32
    %c0_15 = arith.constant 0 : index
    %23 = arith.index_cast %22 : i32 to index
    %c1_16 = arith.constant 1 : index
    %c0_17 = arith.constant 0 : index
    %24 = vector.load %arg2[%c0_15, %23, %c1_16, %c0_17] : memref<1x18x18x128xbf16, #tpu.memory_space<vmem>>, vector<1x16x16x128xbf16>
    %25 = vector.shape_cast %24 : vector<1x16x16x128xbf16> to vector<16x16x128xbf16>
    %c1_i32_18 = arith.constant 1 : i32
    %26 = arith.addi %0, %c1_i32_18 : i32
    %c0_19 = arith.constant 0 : index
    %27 = arith.index_cast %26 : i32 to index
    %c2_20 = arith.constant 2 : index
    %c0_21 = arith.constant 0 : index
    %28 = vector.load %arg2[%c0_19, %27, %c2_20, %c0_21] : memref<1x18x18x128xbf16, #tpu.memory_space<vmem>>, vector<1x16x16x128xbf16>
    %29 = vector.shape_cast %28 : vector<1x16x16x128xbf16> to vector<16x16x128xbf16>
    %30 = tpu.concatenate %21, %25, %29 in 2 : vector<16x16x128xbf16>, vector<16x16x128xbf16>, vector<16x16x128xbf16> -> vector<16x16x384xbf16>
    %31 = vector.shape_cast %30 : vector<16x16x384xbf16> to vector<256x384xbf16>
    %c1_22 = arith.constant 1 : index
    %c0_23 = arith.constant 0 : index
    %c0_24 = arith.constant 0 : index
    %32 = vector.load %arg3[%c1_22, %c0_23, %c0_24] : memref<3x384x128xbf16, #tpu.memory_space<vmem>>, vector<1x384x128xbf16>
    %33 = vector.shape_cast %32 : vector<1x384x128xbf16> to vector<384x128xbf16>
    %cst_25 = arith.constant dense<0.000000e+00> : vector<256x128xf32>
    %34 = tpu.matmul %31, %33, %cst_25 {dimension_numbers = #tpu.dot_dimension_numbers<[1], [0], [0], [1], [0, 0, 1, 1], [], []>} : vector<256x384xbf16>, vector<384x128xbf16>, vector<256x128xf32> -> vector<256x128xf32>
    %35 = arith.addf %17, %34 : vector<256x128xf32>
    %c2_i32 = arith.constant 2 : i32
    %36 = arith.addi %0, %c2_i32 : i32
    %c0_26 = arith.constant 0 : index
    %37 = arith.index_cast %36 : i32 to index
    %c0_27 = arith.constant 0 : index
    %c0_28 = arith.constant 0 : index
    %38 = vector.load %arg2[%c0_26, %37, %c0_27, %c0_28] : memref<1x18x18x128xbf16, #tpu.memory_space<vmem>>, vector<1x16x16x128xbf16>
    %39 = vector.shape_cast %38 : vector<1x16x16x128xbf16> to vector<16x16x128xbf16>
    %c2_i32_29 = arith.constant 2 : i32
    %40 = arith.addi %0, %c2_i32_29 : i32
    %c0_30 = arith.constant 0 : index
    %41 = arith.index_cast %40 : i32 to index
    %c1_31 = arith.constant 1 : index
    %c0_32 = arith.constant 0 : index
    %42 = vector.load %arg2[%c0_30, %41, %c1_31, %c0_32] : memref<1x18x18x128xbf16, #tpu.memory_space<vmem>>, vector<1x16x16x128xbf16>
    %43 = vector.shape_cast %42 : vector<1x16x16x128xbf16> to vector<16x16x128xbf16>
    %c2_i32_33 = arith.constant 2 : i32
    %44 = arith.addi %0, %c2_i32_33 : i32
    %c0_34 = arith.constant 0 : index
    %45 = arith.index_cast %44 : i32 to index
    %c2_35 = arith.constant 2 : index
    %c0_36 = arith.constant 0 : index
    %46 = vector.load %arg2[%c0_34, %45, %c2_35, %c0_36] : memref<1x18x18x128xbf16, #tpu.memory_space<vmem>>, vector<1x16x16x128xbf16>
    %47 = vector.shape_cast %46 : vector<1x16x16x128xbf16> to vector<16x16x128xbf16>
    %48 = tpu.concatenate %39, %43, %47 in 2 : vector<16x16x128xbf16>, vector<16x16x128xbf16>, vector<16x16x128xbf16> -> vector<16x16x384xbf16>
    %49 = vector.shape_cast %48 : vector<16x16x384xbf16> to vector<256x384xbf16>
    %c2_37 = arith.constant 2 : index
    %c0_38 = arith.constant 0 : index
    %c0_39 = arith.constant 0 : index
    %50 = vector.load %arg3[%c2_37, %c0_38, %c0_39] : memref<3x384x128xbf16, #tpu.memory_space<vmem>>, vector<1x384x128xbf16>
    %51 = vector.shape_cast %50 : vector<1x384x128xbf16> to vector<384x128xbf16>
    %cst_40 = arith.constant dense<0.000000e+00> : vector<256x128xf32>
    %52 = tpu.matmul %49, %51, %cst_40 {dimension_numbers = #tpu.dot_dimension_numbers<[1], [0], [0], [1], [0, 0, 1, 1], [], []>} : vector<256x384xbf16>, vector<384x128xbf16>, vector<256x128xf32> -> vector<256x128xf32>
    %53 = arith.addf %35, %52 : vector<256x128xf32>
    %54 = vector.shape_cast %53 : vector<256x128xf32> to vector<16x16x128xf32>
    %55 = arith.truncf %54 : vector<16x16x128xf32> to vector<16x16x128xbf16>
    %c0_41 = arith.constant 0 : index
    %c0_42 = arith.constant 0 : index
    %c0_43 = arith.constant 0 : index
    %c0_44 = arith.constant 0 : index
    %56 = vector.load %arg4[%c0_41, %c0_42, %c0_43, %c0_44] : memref<1x16x16x128xbf16, #tpu.memory_space<vmem>>, vector<1x16x16x128xbf16>
    %57 = vector.shape_cast %56 : vector<1x16x16x128xbf16> to vector<16x16x128xbf16>
    %58 = vector.shape_cast %55 : vector<16x16x128xbf16> to vector<1x16x16x128xbf16>
    tpu.vector_store %arg4[%c0_41, %c0_42, %c0_43, %c0_44], %58 {strides = array<i32>} : memref<1x16x16x128xbf16, #tpu.memory_space<vmem>>, vector<1x16x16x128xbf16>,
    %cst_45 = arith.constant dense<0.000000e+00> : vector<128xf32>
    %59 = vector.multi_reduction <add>, %53, %cst_45 [0] : vector<256x128xf32> to vector<128xf32>
    %60 = vector.shape_cast %59 : vector<128xf32> to vector<1x128xf32>
    %61 = arith.mulf %53, %53 : vector<256x128xf32>
    %cst_46 = arith.constant dense<0.000000e+00> : vector<128xf32>
    %62 = vector.multi_reduction <add>, %61, %cst_46 [0] : vector<256x128xf32> to vector<128xf32>
    %63 = vector.shape_cast %62 : vector<128xf32> to vector<1x128xf32>
    %64 = tpu.concatenate %60, %63 in 0 : vector<1x128xf32>, vector<1x128xf32> -> vector<2x128xf32>
    %c0_47 = arith.constant 0 : index
    %c0_48 = arith.constant 0 : index
    %c0_49 = arith.constant 0 : index
    %c0_50 = arith.constant 0 : index
    %65 = vector.load %arg5[%c0_47, %c0_48, %c0_49, %c0_50] : memref<1x1x2x128xf32, #tpu.memory_space<vmem>>, vector<1x1x2x128xf32>
    %66 = vector.shape_cast %65 : vector<1x1x2x128xf32> to vector<2x128xf32>
    %67 = vector.shape_cast %64 : vector<2x128xf32> to vector<1x1x2x128xf32>
    tpu.vector_store %arg5[%c0_47, %c0_48, %c0_49, %c0_50], %67 {strides = array<i32>} : memref<1x1x2x128xf32, #tpu.memory_space<vmem>>, vector<1x1x2x128xf32>,
    return
  }
  func.func @transform_0(%arg0: i32, %arg1: i32) -> (i32, i32, i32, i32) {
    %c0_i32 = arith.constant 0 : i32
    %c0_i32_0 = arith.constant 0 : i32
    %c0_i32_1 = arith.constant 0 : i32
    %c0_i32_2 = arith.constant 0 : i32
    return %arg0, %c0_i32, %c0_i32_0, %c0_i32_1 : i32, i32, i32, i32
  }
  func.func @transform_1(%arg0: i32, %arg1: i32) -> (i32, i32, i32) {
    %c0_i32 = arith.constant 0 : i32
    %c0_i32_0 = arith.constant 0 : i32
    %c0_i32_1 = arith.constant 0 : i32
    %c0_i32_2 = arith.constant 0 : i32
    return %c0_i32, %c0_i32_0, %c0_i32_1 : i32, i32, i32
  }
  func.func @transform_2(%arg0: i32, %arg1: i32) -> (i32, i32, i32, i32) {
    %c0_i32 = arith.constant 0 : i32
    %c0_i32_0 = arith.constant 0 : i32
    %c0_i32_1 = arith.constant 0 : i32
    return %arg0, %arg1, %c0_i32, %c0_i32_0 : i32, i32, i32, i32
  }
  func.func @transform_3(%arg0: i32, %arg1: i32) -> (i32, i32, i32, i32) {
    %c0_i32 = arith.constant 0 : i32
    %c0_i32_0 = arith.constant 0 : i32
    %c0_i32_1 = arith.constant 0 : i32
    return %arg0, %arg1, %c0_i32, %c0_i32_0 : i32, i32, i32, i32
  }
}

</mosaic_0001>

<bundles_post_ra>
// kernel: tpu_custom_call.1
= control target key start
LH: loop header
LB: loop body
LE: loop exit
PB: predicated region body
PF: predicated region fallthrough
CT: control target
= control target key end

     0   :  { %9 = vsyncpa [#allocation3], 0  ;;  %s4711_s0 = inlined_call_operand.hbm [shape: bf16[1,18,18,128], index: 0, kind: input, shape index: {}]   ;;  %s4712_s1 = inlined_call_operand.hbm [shape: bf16[3,384,128], index: 1, kind: input, shape index: {}]   ;;  %s4713_s2 = inlined_call_operand.hbm [shape: bf16[1,16,16,128], index: 2, kind: output, shape index: {0}]   ;;  %s4714_s3 = inlined_call_operand.hbm [shape: f32[1,1,2,128], index: 3, kind: output, shape index: {1}]  }
   0x1   :  { %10 = vsyncpa [#allocation6], 0 }
   0x2   :  { %11 = vsyncpa [#allocation4], 0 }
   0x3   :  { %12 = vsyncpa [#allocation9], 0  ;;  %s17_s14 = sshll.u32 %s4711_s0, 4  ;;  %s4120_s15 = smov [#allocation2]   ;;  %s18_s14 = int_to_ptr.hbm [resolvable:$true] %s17_s14 }
   0x4   :  { %s19_s16 = sshll.u32 %s4120_s15, 4  ;;  %s30_s19 = sshll.u32 %s4712_s1, 4  ;;  %s20_s16 = int_to_ptr.vmem [resolvable:$true] %s19_s16  ;;  %s31_s19 = int_to_ptr.hbm [resolvable:$true] %s30_s19 }
   0x5   :  { %s4121_s20 = smov 64   ;;  %s4122_s21 = smov 4  }
   0x6   :  { %25 = dma.hbm_to_vmem [thread:$0]  %s18_s14, 3456, %s20_s16, [#allocation3], %s4121_s20, %s4121_s20, %s4122_s21  }
   0x7   :  { %s4123_s22 = smov [#allocation5]  }
   0x8   :  { %s32_s23 = sshll.u32 %s4123_s22, 4  ;;  %s33_s23 = int_to_ptr.vmem [resolvable:$true] %s32_s23 }
   0x9   :  { %38 = dma.hbm_to_vmem [thread:$0]  %s31_s19, 9216, %s33_s23, [#allocation6], %s4121_s20, %s4121_s20, %s4122_s21  }
   0xa   :  { %4112 = dma.done.wait [#allocation3], 3456  }
   0xb   :  { %4113 = vsyncadd [#allocation3], 4294963840 }
   0xc   :  { %4114 = dma.done.wait [#allocation6], 9216  }
   0xd   :  { %4115 = vsyncadd [#allocation6], 4294958080  ;;  %v3586_v0 = vld [vmem:[#allocation5 + $0xf8] sm:$0xff]  ;;  %v3585_v1 = vld [vmem:[#allocation5 + $0xf0] sm:$0xff]  ;;  %vm259_vm0 = vsmask.f32 7424 }
   0xe   :  { %1354 = vmatpush.bf16.msra.mxu0 %v3586_v0  ;;  %3912 = vmatpush.bf16.msra.mxu1 %v3586_v0  ;;  %v3584_v2 = vld [vmem:[#allocation5 + $0xe8] sm:$0xff]  ;;  %v3583_v3 = vld [vmem:[#allocation5 + $0xe0] sm:$0xff]  ;;  %v3582_v4 = vld [vmem:[#allocation5 + $0xd8] sm:$0xff]  ;;  %vm516_vm1 = vcmask 1046528   ;;  %s4124_s0 = smov [#allocation7]   ;;  %s3235_s26 = sshll.u32 %s4713_s2, 4  ;;  %s3236_s26 = int_to_ptr.hbm [resolvable:$true] %s3235_s26 }
   0xf   :  { %3913 = vmatpush.bf16.msra.mxu2 %v3586_v0  ;;  %3914 = vmatpush.bf16.msra.mxu3 %v3586_v0  ;;  %v3581_v5 = vld [vmem:[#allocation5 + $0xd0] sm:$0xff]  ;;  %v3580_v6 = vld [vmem:[#allocation5 + $0xc8] sm:$0xff]  ;;  %v4160_v8 = vld [vmem:[#allocation2 + $0xc] sm:$0xf0]  ;;  %s3233_s1 = sshll.u32 %s4124_s0, 4  ;;  %s4125_s2 = smov [#allocation8]   ;;  %s3234_s1 = int_to_ptr.vmem [resolvable:$true] %s3233_s1 }
  0x10   :  { %v4158_v7 = vld [vmem:[#allocation2 + $0xc] sm:$0xff]   ;;  %v4162_v9 = vld [vmem:[#allocation2 + $0x3c] sm:$0xff]   ;;  %v4187_v46 = vld [vmem:[#allocation2 + $0x24] sm:$0xff]   ;;  %s3247_s27 = sshll.u32 %s4125_s2, 4  ;;  %s3249_s30 = sshll.u32 %s4714_s3, 4  ;;  %vm3226_vm2 = vcmask 1040384   ;;  %s3248_s27 = int_to_ptr.vmem [resolvable:$true] %s3247_s27  ;;  %s3250_s30 = int_to_ptr.hbm [resolvable:$true] %s3249_s30 }
  0x11   :  { %v4164_v10 = vld [vmem:[#allocation2 + $0x3c] sm:$0xf0]  ;;  %v4166_v11 = vld [vmem:[#allocation2 + $0x6c] sm:$0xff]   ;;  %v3579_v15 = vld [vmem:[#allocation5 + $0xc0] sm:$0xff] }
  0x12   :  { %1355 = vmatpush.bf16.msra.mxu0 %v3585_v1  ;;  %3915 = vmatpush.bf16.msra.mxu1 %v3585_v1  ;;  %v4168_v12 = vld [vmem:[#allocation2 + $0x6c] sm:$0xf0]  ;;  %v4170_v13 = vld [vmem:[#allocation2 + $0x9c] sm:$0xff]   ;;  %v3601_v20 = vld [vmem:[#allocation5 + $0x170] sm:$0xff] }
  0x13   :  { %3916 = vmatpush.bf16.msra.mxu2 %v3585_v1  ;;  %3917 = vmatpush.bf16.msra.mxu3 %v3585_v1  ;;  %v4172_v14 = vld [vmem:[#allocation2 + $0x9c] sm:$0xf0]  ;;  %v3602_v16 = vld [vmem:[#allocation5 + $0x178] sm:$0xff]  ;;  %v3561_v21 = vld [vmem:[#allocation5 + $0x30] sm:$0xff] }
  0x14   :  { %v3562_v17 = vld [vmem:[#allocation5 + $0x38] sm:$0xff]  ;;  %v3593_v22 = vld [vmem:[#allocation5 + $0x130] sm:$0xff]  ;;  %v3600_v24 = vld [vmem:[#allocation5 + $0x168] sm:$0xff] }
  0x15   :  { %v3594_v18 = vld [vmem:[#allocation5 + $0x138] sm:$0xff]  ;;  %v3569_v23 = vld [vmem:[#allocation5 + $0x70] sm:$0xff]  ;;  %v3560_v25 = vld [vmem:[#allocation5 + $0x28] sm:$0xff] }
  0x16   :  { %1356 = vmatpush.bf16.msra.mxu0 %v3584_v2  ;;  %3918 = vmatpush.bf16.msra.mxu1 %v3584_v2  ;;  %v3570_v19 = vld [vmem:[#allocation5 + $0x78] sm:$0xff]  ;;  %v3592_v26 = vld [vmem:[#allocation5 + $0x128] sm:$0xff]  ;;  %v3599_v28 = vld [vmem:[#allocation5 + $0x160] sm:$0xff] }
  0x17   :  { %3919 = vmatpush.bf16.msra.mxu2 %v3584_v2  ;;  %3920 = vmatpush.bf16.msra.mxu3 %v3584_v2  ;;  %v3568_v27 = vld [vmem:[#allocation5 + $0x68] sm:$0xff]  ;;  %v3559_v29 = vld [vmem:[#allocation5 + $0x20] sm:$0xff]  ;;  %v3598_v32 = vld [vmem:[#allocation5 + $0x158] sm:$0xff] }
  0x18   :  { %v3591_v30 = vld [vmem:[#allocation5 + $0x120] sm:$0xff]  ;;  %v3558_v33 = vld [vmem:[#allocation5 + $0x18] sm:$0xff]  ;;  %v4180_v35 = vld [vmem:[#allocation2 + $0x48] sm:$0xff]  }
  0x19   :  { %v3567_v31 = vld [vmem:[#allocation5 + $0x60] sm:$0xff]  ;;  %v3840_v37 = vld [vmem:[#allocation2 + $0xa8] sm:$0xff]   ;;  %v3590_v38 = vld [vmem:[#allocation5 + $0x118] sm:$0xff] }
  0x1a   :  { %1357 = vmatpush.bf16.msra.mxu0 %v3583_v3  ;;  %3921 = vmatpush.bf16.msra.mxu1 %v3583_v3  ;;  %v4178_v34 = vld [vmem:[#allocation2 + $0x18] sm:$0xff]   ;;  %v3566_v39 = vld [vmem:[#allocation5 + $0x58] sm:$0xff]  ;;  %v3597_v40 = vld [vmem:[#allocation5 + $0x150] sm:$0xff] }
  0x1b   :  { %3922 = vmatpush.bf16.msra.mxu2 %v3583_v3  ;;  %3923 = vmatpush.bf16.msra.mxu3 %v3583_v3  ;;  %v4182_v36 = vld [vmem:[#allocation2 + $0x78] sm:$0xff]   ;;  %v3557_v41 = vld [vmem:[#allocation5 + $0x10] sm:$0xff]  ;;  %v3596_v44 = vld [vmem:[#allocation5 + $0x148] sm:$0xff] }
  0x1c   :  { %v3589_v42 = vld [vmem:[#allocation5 + $0x110] sm:$0xff]  ;;  %v3556_v45 = vld [vmem:[#allocation5 + $0x8] sm:$0xff]  ;;  %v4191_v48 = vld [vmem:[#allocation2 + $0x54] sm:$0xff]  }
  0x1d   :  { %v3565_v43 = vld [vmem:[#allocation5 + $0x50] sm:$0xff]  ;;  %v4193_v49 = vld [vmem:[#allocation2 + $0x54] sm:$0xf0]  ;;  %v3588_v54 = vld [vmem:[#allocation5 + $0x108] sm:$0xff] }
  0x1e   :  { %1358 = vmatpush.bf16.msra.mxu0 %v3582_v4  ;;  %3924 = vmatpush.bf16.msra.mxu1 %v3582_v4  ;;  %v4189_v47 = vld [vmem:[#allocation2 + $0x24] sm:$0xf0]  ;;  %v4199_v52 = vld [vmem:[#allocation2 + $0xb4] sm:$0xff]   ;;  %v3564_v55 = vld [vmem:[#allocation5 + $0x48] sm:$0xff] }
  0x1f   :  { %3925 = vmatpush.bf16.msra.mxu2 %v3582_v4  ;;  %3926 = vmatpush.bf16.msra.mxu3 %v3582_v4  ;;  %v4195_v50 = vld [vmem:[#allocation2 + $0x84] sm:$0xff]   ;;  %v4201_v53 = vld [vmem:[#allocation2 + $0xb4] sm:$0xf0]  ;;  %v3610_v60 = vld [vmem:[#allocation5 + $0x1b8] sm:$0xff] }
  0x20   :  { %v4197_v51 = vld [vmem:[#allocation2 + $0x84] sm:$0xf0]  ;;  %v3595_v56 = vld [vmem:[#allocation5 + $0x140] sm:$0xff]  ;;  %v3618_v61 = vld [vmem:[#allocation5 + $0x1f8] sm:$0xff] }
  0x21   :  { %v3555_v57 = vld [vmem:[#allocation5] sm:$0xff]  ;;  %v3578_v62 = vld [vmem:[#allocation5 + $0xb8] sm:$0xff]  ;;  %v83_v1 = vld [vmem:[#allocation2 + $0x8] sm:$0x1] }
  0x22   :  { %1359 = vmatpush.bf16.msra.mxu0 %v3581_v5  ;;  %3927 = vmatpush.bf16.msra.mxu1 %v3581_v5  ;;  %v3587_v58 = vld [vmem:[#allocation5 + $0x100] sm:$0xff]  ;;  %v3626_v63 = vld [vmem:[#allocation5 + $0x238] sm:$0xff]  ;;  %v4209_v4 = vld [vmem:[#allocation2 + $0x60] sm:$0xff]  }
  0x23   :  { %3928 = vmatpush.bf16.msra.mxu2 %v3581_v5  ;;  %3929 = vmatpush.bf16.msra.mxu3 %v3581_v5  ;;  %v3563_v59 = vld [vmem:[#allocation5 + $0x40] sm:$0xff]  ;;  %v665_v0 = vld [vmem:[#allocation2 + $0x14] sm:$0x1]  ;;  %v227_v5 = vunpack.c.l.b16 %v83_v1 }
  0x24   :  { %v809_v2 = vunpack.c.l.b16 %v665_v0  ;;  %v4207_v3 = vld [vmem:[#allocation2 + $0x30] sm:$0xff]  }
  0x26   :  { %1360 = vmatpush.bf16.msra.mxu0 %v3580_v6  ;;  %3930 = vmatpush.bf16.msra.mxu1 %v3580_v6 }
  0x27   :  { %3931 = vmatpush.bf16.msra.mxu2 %v3580_v6  ;;  %3932 = vmatpush.bf16.msra.mxu3 %v3580_v6  ;;  %v4211_v6 = vld [vmem:[#allocation2 + $0x90] sm:$0xff]  }
  0x2a   :  { %1361 = vmatpush.bf16.msra.mxu0 %v3579_v15  ;;  %3933 = vmatpush.bf16.msra.mxu1 %v3579_v15 }
  0x2b   :  { %3934 = vmatpush.bf16.msra.mxu2 %v3579_v15  ;;  %3935 = vmatpush.bf16.msra.mxu3 %v3579_v15  ;;  %v3841_v15 = vld [vmem:[#allocation2 + $0xc0] sm:$0xff]  }
  0x2d   :  { %1362 = vmatmul.bf16.vlgmr.msra.gmra.mxu0 %v4158_v7  ;;  %1382 = vmatmul.bf16.vlgmr.msra.gmra.mxu1 %v4162_v9 }
  0x2e   :  { %1402 = vmatmul.bf16.vlgmr.msra.gmra.mxu2 %v4166_v11  ;;  %1422 = vmatmul.bf16.vlgmr.msra.gmra.mxu3 %v4170_v13 }
  0x2f   :  { %1532 = vmatpush.bf16.msrb.mxu2 %v3602_v16  ;;  %1765 = vmatpush.bf16.msrb.mxu3 %v3562_v17  ;;  %v3628_v16 = vld [vmem:[#allocation2] sm:$0xff]   ;;  %v3945_v17 = vld [vmem:[#allocation2 + $0xc] sm:$0xe] }
  0x30   :  { %1443 = vmatpush.bf16.msrb.mxu1 %v3594_v18  ;;  %1854 = vmatpush.bf16.msrb.mxu0 %v3570_v19  ;;  %v844_v18 = vshll.u32 %v4158_v7, 16  ;;  %v825_v19 = vpack.c.b16 %v809_v2, %v809_v2 }
  0x33   :  { %1533 = vmatpush.bf16.msrb.mxu2 %v3601_v20  ;;  %1766 = vmatpush.bf16.msrb.mxu3 %v3561_v21  ;;  %v263_v20 = vshll.u32 %v3628_v16, 16  ;;  %v4217_v21 = vpack.c.b16 %v227_v5, %v227_v5 }
  0x34   :  { %1444 = vmatpush.bf16.msrb.mxu1 %v3593_v22  ;;  %1855 = vmatpush.bf16.msrb.mxu0 %v3569_v23  ;;  %v842_v22 = vshrl.u32 %v4158_v7, 16  ;;  %v846_v23 = vrot.slane %v844_v18, 1  ;;  %v84_v7 = vld [vmem:[#allocation2 + $0x14] sm:$0x1] }
  0x37   :  { %1534 = vmatpush.bf16.msrb.mxu2 %v3600_v24  ;;  %1767 = vmatpush.bf16.msrb.mxu3 %v3560_v25  ;;  %v849_v24 = vshll.u32 %v825_v19, 16  ;;  %v261_v25 = vshrl.u32 %v3628_v16, 16 }
  0x38   :  { %1445 = vmatpush.bf16.msrb.mxu1 %v3592_v26  ;;  %1856 = vmatpush.bf16.msrb.mxu0 %v3568_v27  ;;  %v265_v26 = vrot.slane %v263_v20, 1  ;;  %v268_v27 = vshll.u32 %v4217_v21, 16 }
  0x3b   :  { %1535 = vmatpush.bf16.msrb.mxu2 %v3599_v28  ;;  %1768 = vmatpush.bf16.msrb.mxu3 %v3559_v29  ;;  %v3946_v28 = vor.u32 %v3945_v17, %v4160_v8  ;;  %v53_v29 = vld [vmem:[#allocation2 + $0xc] sm:$0xff]  }
  0x3c   :  { %1446 = vmatpush.bf16.msrb.mxu1 %v3591_v30  ;;  %1857 = vmatpush.bf16.msrb.mxu0 %v3567_v31  ;;  %v4222_v30 = vld [vmem:[#allocation2 + $0xc] sm:$0xf0]  ;;  %v847_v31 = vor.u32 %v846_v23, %v842_v22  ;;  %v273_v2 = vshrl.u32 %v53_v29, 16  ;;  %v667_v22 = vld [vmem:[#allocation2 + $0x2c] sm:$0x1] }
  0x3d   :  { %1367 = vmatmul.bf16.gmra.mxu0 %v4178_v34  ;;  %1387 = vmatmul.bf16.gmra.mxu1 %v4180_v35 }
  0x3e   :  { %1407 = vmatmul.bf16.gmra.mxu2 %v4182_v36  ;;  %1427 = vmatmul.bf16.gmra.mxu3 %v3840_v37  ;;  %v270_v37 = vrot.slane %v268_v27, 1 }
  0x3f   :  { %1536 = vmatpush.bf16.msrb.mxu2 %v3598_v32  ;;  %1769 = vmatpush.bf16.msrb.mxu3 %v3558_v33  ;;  %v851_v32 = vrot.slane %v849_v24, 1  ;;  %v266_v33 = vor.u32 %v265_v26, %v261_v25  ;;  %v85_v25 = vld [vmem:[#allocation2 + $0x20] sm:$0x1]  ;;  %v811_v26 = vunpack.c.l.b16 %v667_v22 }
  0x40   :  { %1447 = vmatpush.bf16.msrb.mxu1 %v3590_v38  ;;  %1858 = vmatpush.bf16.msrb.mxu0 %v3566_v39  ;;  %v1097_v38 = vrot.slane %v3946_v28, 1  ;;  %v1098_v39 = vrot.slane %v825_v19, 1 }
  0x42   :  { %v1099_v8 = vsel %vm516_vm1, %v1097_v38, %v1098_v39  ;;  %v868_v38 = vshll.u32 %v4187_v46, 16 }
  0x43   :  { %1537 = vmatpush.bf16.msrb.mxu2 %v3597_v40  ;;  %1770 = vmatpush.bf16.msrb.mxu3 %v3557_v41  ;;  %v666_v40 = vld [vmem:[#allocation2 + $0x20] sm:$0x1]  ;;  %v852_v41 = vsel %vm259_vm0, %v847_v31, %v851_v32  ;;  %v229_v31 = vunpack.c.l.b16 %v85_v25 }
  0x44   :  { %1448 = vmatpush.bf16.msrb.mxu1 %v3589_v42  ;;  %1859 = vmatpush.bf16.msrb.mxu0 %v3565_v43  ;;  %v271_v42 = vsel %vm259_vm0, %v266_v33, %v270_v37  ;;  %v810_v43 = vunpack.c.l.b16 %v666_v40  ;;  %v3948_v33 = vld [vmem:[#allocation2 + $0x24] sm:$0xe]  ;;  %v827_v37 = vpack.c.b16 %v811_v26, %v811_v26  ;;  %v866_v40 = vshrl.u32 %v4187_v46, 16 }
  0x45   :  { %v4236_v39 = vpack.c.b16 %v229_v31, %v229_v31  ;;  %v3576_v25 = vld [vmem:[#allocation5 + $0xa8] sm:$0xff] }
  0x47   :  { %1538 = vmatpush.bf16.msrb.mxu2 %v3596_v44  ;;  %1771 = vmatpush.bf16.msrb.mxu3 %v3556_v45  ;;  %v228_v44 = vunpack.c.l.b16 %v84_v7  ;;  %v856_v45 = vshll.u32 %v4178_v34, 16  ;;  %v870_v7 = vrot.slane %v868_v38, 1 }
  0x48   :  { %1449 = vmatpush.bf16.msrb.mxu1 %v3588_v54  ;;  %1860 = vmatpush.bf16.msrb.mxu0 %v3564_v55  ;;  %v826_v54 = vpack.c.b16 %v810_v43, %v810_v43  ;;  %v3949_v43 = vor.u32 %v3948_v33, %v4189_v47  ;;  %v880_v47 = vshll.u32 %v4207_v3, 16  ;;  %v669_v33 = vld [vmem:[#allocation2 + $0x44] sm:$0x1] }
  0x49   :  { %v4228_v55 = vpack.c.b16 %v228_v44, %v228_v44  ;;  %v858_v0 = vrot.slane %v856_v45, 1  ;;  %v57_v44 = vld [vmem:[#allocation2 + $0x24] sm:$0xff]   ;;  %v871_v45 = vor.u32 %v870_v7, %v866_v40  ;;  %v87_v40 = vld [vmem:[#allocation2 + $0x38] sm:$0x1]  ;;  %v813_v7 = vunpack.c.l.b16 %v669_v33 }
  0x4a   :  { %v861_v1 = vshll.u32 %v826_v54, 16  ;;  %v1101_v24 = vrot.slane %v826_v54, 1  ;;  %v297_v22 = vshrl.u32 %v57_v44, 16 }
  0x4b   :  { %1539 = vmatpush.bf16.msrb.mxu2 %v3595_v56  ;;  %1772 = vmatpush.bf16.msrb.mxu3 %v3555_v57  ;;  %v275_v56 = vshll.u32 %v53_v29, 16  ;;  %v3609_v57 = vld [vmem:[#allocation5 + $0x1b0] sm:$0xff] }
  0x4c   :  { %1450 = vmatpush.bf16.msrb.mxu1 %v3587_v58  ;;  %1861 = vmatpush.bf16.msrb.mxu0 %v3563_v59  ;;  %v3617_v58 = vld [vmem:[#allocation5 + $0x1f0] sm:$0xff]  ;;  %v863_v18 = vrot.slane %v861_v1, 1 }
  0x4d   :  { %1372 = vmatmul.bf16.gmra.mxu0 %v4187_v46  ;;  %1392 = vmatmul.bf16.gmra.mxu1 %v4191_v48  ;;  %v3577_v59 = vld [vmem:[#allocation5 + $0xb0] sm:$0xff]  ;;  %v277_v5 = vrot.slane %v275_v56, 1 }
  0x4e   :  { %1412 = vmatmul.bf16.gmra.mxu2 %v4195_v50  ;;  %1432 = vmatmul.bf16.gmra.mxu3 %v4199_v52 }
  0x4f   :  { %2757 = vmatpush.bf16.msra.mxu2 %v3610_v60  ;;  %2846 = vmatpush.bf16.msra.mxu3 %v3618_v61  ;;  %v3625_v60 = vld [vmem:[#allocation5 + $0x230] sm:$0xff]  ;;  %v3842_v61 = vld [vmem:[#allocation2 + $0x18] sm:$0xf0]  ;;  %v278_v19 = vor.u32 %v277_v5, %v273_v2  ;;  %v299_v2 = vshll.u32 %v57_v44, 16  ;;  %v3608_v5 = vld [vmem:[#allocation5 + $0x1a8] sm:$0xff] }
  0x50   :  { %1943 = vmatpush.bf16.msra.mxu1 %v3578_v62  ;;  %2935 = vmatpush.bf16.msra.mxu0 %v3626_v63  ;;  %v3843_v62 = vld [vmem:[#allocation2 + $0x18] sm:$0xe]  ;;  %v854_v63 = vshrl.u32 %v4178_v34, 16 }
  0x52   :  { %v859_v17 = vor.u32 %v858_v0, %v854_v63 }
  0x53   :  { %2758 = vmatpush.bf16.msra.mxu2 %v3609_v57  ;;  %2847 = vmatpush.bf16.msra.mxu3 %v3617_v58  ;;  %v1103_v57 = vrot.slane %v3949_v43, 1  ;;  %v1104_v58 = vrot.slane %v827_v37, 1  ;;  %v231_v43 = vunpack.c.l.b16 %v87_v40 }
  0x54   :  { %1944 = vmatpush.bf16.msra.mxu1 %v3577_v59  ;;  %2936 = vmatpush.bf16.msra.mxu0 %v3625_v60  ;;  %v864_v27 = vsel %vm259_vm0, %v859_v17, %v863_v18  ;;  %v668_v59 = vld [vmem:[#allocation2 + $0x38] sm:$0x1]  ;;  %v3846_v18 = vld [vmem:[#allocation2 + $0x30] sm:$0xe] }
  0x55   :  { %v1105_v63 = vsel %vm516_vm1, %v1103_v57, %v1104_v58  ;;  %v892_v57 = vshll.u32 %v4162_v9, 16  ;;  %v4256_v58 = vpack.c.b16 %v231_v43, %v231_v43 }
  0x57   :  { %2759 = vmatpush.bf16.msra.mxu2 %v3608_v5  ;;  %4724 = vst [vmem:[#allocation15_spill] sm:$0xff] %v4256_v58 }
  0x58   :  { %1945 = vmatpush.bf16.msra.mxu1 %v3576_v25 }
  0x5d   :  { %1377 = vmatmul.bf16.gmra.mxu0 %v4207_v3  ;;  %1397 = vmatmul.bf16.gmra.mxu1 %v4209_v4 }
  0x5e   :  { %1417 = vmatmul.bf16.gmra.mxu2 %v4211_v6  ;;  %1437 = vmatmul.bf16.gmra.mxu3 %v3841_v15  ;;  %v280_v15 = vshll.u32 %v4228_v55, 16 }
  0x60   :  { %v282_v20 = vrot.slane %v280_v15, 1  ;;  %v3616_v15 = vld [vmem:[#allocation5 + $0x1e8] sm:$0xff] }
  0x61   :  { %2848 = vmatpush.bf16.msra.mxu3 %v3616_v15 }
  0x62   :  { %v283_v28 = vsel %vm259_vm0, %v278_v19, %v282_v20  ;;  %v882_v19 = vrot.slane %v880_v47, 1 }
  0x6d   :  { %1451 = vmatmul.bf16.vlgmr.msrb.gmra.mxu1 %v852_v41  ;;  %1862 = vmatmul.bf16.vlgmr.msrb.gmra.mxu0 %v271_v42  ;;  %v873_v41 = vshll.u32 %v827_v37, 16  ;;  %v292_v42 = vshll.u32 %v4236_v39, 16 }
  0x6e   :  { %1540 = vmatmul.bf16.vlgmr.msrb.gmra.mxu2 %v1099_v8  ;;  %1773 = vmatmul.bf16.vlgmr.msrb.gmra.mxu3 %v3628_v16  ;;  %v3844_v16 = vor.u32 %v3843_v62, %v3842_v61  ;;  %v4241_v8 = vld [vmem:[#allocation2 + $0x24] sm:$0xf0]  ;;  %v812_v61 = vunpack.c.l.b16 %v668_v59  ;;  %v890_v59 = vshrl.u32 %v4162_v9, 16 }
  0x6f   :  { %v875_v54 = vrot.slane %v873_v41, 1  ;;  %v294_v56 = vrot.slane %v292_v42, 1 }
  0x70   :  { %v1100_v23 = vrot.slane %v3844_v16, 1  ;;  %v828_v0 = vpack.c.b16 %v812_v61, %v812_v61  ;;  %v3845_v16 = vld [vmem:[#allocation2 + $0x30] sm:$0xf0] }
  0x71   :  { %v876_v60 = vsel %vm259_vm0, %v871_v45, %v875_v54  ;;  %v295_v46 = vsel %vm259_vm0, %v859_v17, %v294_v56  ;;  %v878_v17 = vshrl.u32 %v4207_v3, 16  ;;  %v3847_v26 = vor.u32 %v3846_v18, %v3845_v16  ;;  %v3951_v54 = vld [vmem:[#allocation2 + $0x3c] sm:$0xe]  ;;  %v88_v16 = vld [vmem:[#allocation2 + $0x44] sm:$0x1] }
  0x72   :  { %v1102_v32 = vsel %vm516_vm1, %v1100_v23, %v1101_v24  ;;  %v885_v20 = vshll.u32 %v828_v0, 16  ;;  %v301_v23 = vrot.slane %v299_v2, 1  ;;  %v1107_v38 = vrot.slane %v828_v0, 1 }
  0x73   :  { %v1106_v37 = vrot.slane %v3847_v26, 1  ;;  %v829_v56 = vpack.c.b16 %v813_v7, %v813_v7  ;;  %v3952_v61 = vor.u32 %v3951_v54, %v4164_v10  ;;  %v3607_v26 = vld [vmem:[#allocation5 + $0x1a0] sm:$0xff] }
  0x74   :  { %v302_v31 = vor.u32 %v301_v23, %v297_v22  ;;  %v904_v23 = vshll.u32 %v4180_v35, 16  ;;  %2760 = vmatpush.bf16.msra.mxu2 %v3607_v26  ;;  %v3623_v54 = vld [vmem:[#allocation5 + $0x220] sm:$0xff] }
  0x75   :  { %v1108_v45 = vsel %vm516_vm1, %v1106_v37, %v1107_v38  ;;  %v1109_v5 = vrot.slane %v3952_v61, 1  ;;  %v1110_v15 = vrot.slane %v829_v56, 1 }
  0x76   :  { %v906_v33 = vrot.slane %v904_v23, 1 }
  0x77   :  { %v1111_v22 = vsel %vm516_vm1, %v1109_v5, %v1110_v15 }
  0x7d   :  { %1456 = vmatmul.bf16.gmra.mxu1 %v864_v27  ;;  %1867 = vmatmul.bf16.gmra.mxu0 %v283_v28  ;;  %v883_v27 = vor.u32 %v882_v19, %v878_v17  ;;  %v887_v28 = vrot.slane %v885_v20, 1  ;;  %v232_v20 = vunpack.c.l.b16 %v88_v16 }
  0x7e   :  { %1545 = vmatmul.bf16.gmra.mxu2 %v1102_v32  ;;  %1778 = vmatmul.bf16.gmra.mxu3 %v53_v29  ;;  %v86_v29 = vld [vmem:[#allocation2 + $0x2c] sm:$0x1] }
  0x7f   :  { %v230_v62 = vunpack.c.l.b16 %v86_v29  ;;  %v888_v41 = vsel %vm259_vm0, %v883_v27, %v887_v28  ;;  %v894_v29 = vrot.slane %v892_v57, 1  ;;  %v4274_v25 = vpack.c.b16 %v232_v20, %v232_v20  ;;  %v3615_v28 = vld [vmem:[#allocation5 + $0x1e0] sm:$0xff] }
  0x80   :  { %2849 = vmatpush.bf16.msra.mxu3 %v3615_v28 }
  0x81   :  { %v4248_v1 = vpack.c.b16 %v230_v62, %v230_v62  ;;  %v4261_v62 = vld [vmem:[#allocation2 + $0x3c] sm:$0xff]   ;;  %v895_v47 = vor.u32 %v894_v29, %v890_v59  ;;  %4726 = vst [vmem:[#allocation17_spill] sm:$0xff] %v4274_v25  ;;  %v328_v43 = vshll.u32 %v4274_v25, 16 }
  0x83   :  { %4723 = vst [vmem:[#allocation14_spill] sm:$0xff] %v4248_v1  ;;  %v304_v24 = vshll.u32 %v4248_v1, 16 }
  0x85   :  { %v306_v32 = vrot.slane %v304_v24, 1 }
  0x87   :  { %v307_v42 = vsel %vm259_vm0, %v302_v31, %v306_v32  ;;  %v3848_v31 = vld [vmem:[#allocation2 + $0x48] sm:$0xf0]  ;;  %v902_v32 = vshrl.u32 %v4180_v35, 16 }
  0x89   :  { %v907_v57 = vor.u32 %v906_v33, %v902_v32 }
  0x8d   :  { %1461 = vmatmul.bf16.gmra.mxu1 %v876_v60  ;;  %1872 = vmatmul.bf16.gmra.mxu0 %v295_v46  ;;  %v897_v60 = vshll.u32 %v829_v56, 16  ;;  %v316_v46 = vshll.u32 %v4256_v58, 16  ;;  %v675_v58 = vld [vmem:[#allocation2 + $0x8c] sm:$0x1] }
  0x8e   :  { %1550 = vmatmul.bf16.gmra.mxu2 %v1105_v63  ;;  %1783 = vmatmul.bf16.gmra.mxu3 %v4178_v34  ;;  %v3624_v34 = vld [vmem:[#allocation5 + $0x228] sm:$0xff]  ;;  %v819_v1 = vunpack.c.l.b16 %v675_v58 }
  0x8f   :  { %2937 = vmatpush.bf16.msra.mxu0 %v3624_v34  ;;  %v4263_v63 = vld [vmem:[#allocation2 + $0x3c] sm:$0xf0]  ;;  %v899_v0 = vrot.slane %v897_v60, 1  ;;  %v318_v2 = vrot.slane %v316_v46, 1  ;;  %v323_v34 = vshll.u32 %v4261_v62, 16  ;;  %v330_v60 = vrot.slane %v328_v43, 1 }
  0x90   :  { %4725 = vst [vmem:[#allocation16_spill] sm:$0xff] %v4263_v63  ;;  %v671_v46 = vld [vmem:[#allocation2 + $0x5c] sm:$0x1]  ;;  %v4314_v43 = vld [vmem:[#allocation2 + $0x54] sm:$0xff]   ;;  %v835_v58 = vpack.c.b16 %v819_v1, %v819_v1 }
  0x91   :  { %v900_v18 = vsel %vm259_vm0, %v895_v47, %v899_v0  ;;  %v319_v19 = vsel %vm259_vm0, %v883_v27, %v318_v2  ;;  %v3849_v27 = vld [vmem:[#allocation2 + $0x48] sm:$0xe]  ;;  %v89_v0 = vld [vmem:[#allocation2 + $0x50] sm:$0x1]  ;;  %v815_v15 = vunpack.c.l.b16 %v671_v46 }
  0x92   :  { %v3850_v56 = vor.u32 %v3849_v27, %v3848_v31  ;;  %v914_v31 = vshrl.u32 %v4191_v48, 16 }
  0x93   :  { %2938 = vmatpush.bf16.msra.mxu0 %v3623_v54  ;;  %v831_v23 = vpack.c.b16 %v815_v15, %v815_v15 }
  0x94   :  { %v1112_v61 = vrot.slane %v3850_v56, 1 }
  0x95   :  { %v921_v32 = vshll.u32 %v831_v23, 16 }
  0x97   :  { %v923_v54 = vrot.slane %v921_v32, 1  ;;  %v3851_v32 = vld [vmem:[#allocation2 + $0x60] sm:$0xf0] }
  0x9d   :  { %1466 = vmatmul.bf16.gmra.mxu1 %v888_v41  ;;  %1877 = vmatmul.bf16.gmra.mxu0 %v307_v42  ;;  %v321_v41 = vshrl.u32 %v4261_v62, 16  ;;  %v325_v42 = vrot.slane %v323_v34, 1 }
  0x9e   :  { %1555 = vmatmul.bf16.gmra.mxu2 %v1108_v45  ;;  %1788 = vmatmul.bf16.gmra.mxu3 %v57_v44  ;;  %v670_v44 = vld [vmem:[#allocation2 + $0x50] sm:$0x1]  ;;  %v3575_v45 = vld [vmem:[#allocation5 + $0xa0] sm:$0xff] }
  0x9f   :  { %v814_v10 = vunpack.c.l.b16 %v670_v44  ;;  %1946 = vmatpush.bf16.msra.mxu1 %v3575_v45  ;;  %v326_v29 = vor.u32 %v325_v42, %v321_v41 }
  0xa1   :  { %v830_v24 = vpack.c.b16 %v814_v10, %v814_v10  ;;  %v233_v10 = vunpack.c.l.b16 %v89_v0 }
  0xa3   :  { %v909_v7 = vshll.u32 %v830_v24, 16  ;;  %v1113_v47 = vrot.slane %v830_v24, 1  ;;  %v916_v24 = vshll.u32 %v4191_v48, 16  ;;  %v4301_v34 = vpack.c.b16 %v233_v10, %v233_v10  ;;  %v672_v48 = vld [vmem:[#allocation2 + $0x68] sm:$0x1] }
  0xa5   :  { %v911_v59 = vrot.slane %v909_v7, 1  ;;  %v1114_v20 = vsel %vm516_vm1, %v1112_v61, %v1113_v47  ;;  %4729 = vst [vmem:[#allocation20_spill] sm:$0xff] %v4301_v34  ;;  %v918_v27 = vrot.slane %v916_v24, 1  ;;  %v340_v41 = vshll.u32 %v4301_v34, 16 }
  0xa6   :  { %v347_v24 = vshll.u32 %v4314_v43, 16 }
  0xa7   :  { %v919_v45 = vor.u32 %v918_v27, %v914_v31  ;;  %v342_v56 = vrot.slane %v340_v41, 1  ;;  %v3606_v31 = vld [vmem:[#allocation5 + $0x198] sm:$0xff]  ;;  %v926_v41 = vshrl.u32 %v4209_v4, 16 }
  0xa8   :  { %v3614_v27 = vld [vmem:[#allocation5 + $0x1d8] sm:$0xff]  ;;  %2761 = vmatpush.bf16.msra.mxu2 %v3606_v31 }
  0xa9   :  { %v924_v47 = vsel %vm259_vm0, %v919_v45, %v923_v54  ;;  %v343_v15 = vsel %vm259_vm0, %v907_v57, %v342_v56  ;;  %2850 = vmatpush.bf16.msra.mxu3 %v3614_v27 }
  0xaa   :  { %v4266_v9 = vpop.f32.mrf.mxu0  ;;  %v4268_v17 = vpop.f32.mrf.mxu1 }
  0xad   :  { %1471 = vmatmul.bf16.gmra.mxu1 %v900_v18  ;;  %1882 = vmatmul.bf16.gmra.mxu0 %v319_v19  ;;  %v912_v18 = vsel %vm259_vm0, %v907_v57, %v911_v59  ;;  %v331_v19 = vsel %vm259_vm0, %v326_v29, %v330_v60  ;;  %v1116_v29 = vrot.slane %v831_v23, 1  ;;  %v90_v60 = vld [vmem:[#allocation2 + $0x5c] sm:$0x1]  ;;  %v3852_v57 = vld [vmem:[#allocation2 + $0x60] sm:$0xe] }
  0xae   :  { %1560 = vmatmul.bf16.gmra.mxu2 %v1111_v22  ;;  %1793 = vmatmul.bf16.gmra.mxu3 %v4207_v3  ;;  %v3954_v22 = vld [vmem:[#allocation2 + $0x54] sm:$0xe] }
  0xaf   :  { %v3955_v42 = vor.u32 %v3954_v22, %v4193_v49 }
  0xb1   :  { %v4278_v37 = vpop.f32.mrf.mxu2  ;;  %v4280_v38 = vpop.f32.mrf.mxu3  ;;  %v1115_v59 = vrot.slane %v3955_v42, 1 }
  0xb2   :  { %4727 = vst [vmem:[#allocation18_spill] sm:$0xff] %v4280_v38  ;;  %v4282_v40 = vpop.f32.mrf.mxu0  ;;  %v4284_v3 = vpop.f32.mrf.mxu1 }
  0xb3   :  { %v1117_v10 = vsel %vm516_vm1, %v1115_v59, %v1116_v29  ;;  %v345_v29 = vshrl.u32 %v4314_v43, 16 }
  0xb9   :  { %v4288_v2 = vpop.f32.mrf.mxu2  ;;  %v4290_v5 = vpop.f32.mrf.mxu3 }
  0xba   :  { %4728 = vst [vmem:[#allocation19_spill] sm:$0xff] %v4290_v5  ;;  %v4292_v44 = vpop.f32.mrf.mxu0  ;;  %v4294_v16 = vpop.f32.mrf.mxu1 }
  0xbd   :  { %1476 = vmatmul.bf16.gmra.mxu1 %v912_v18  ;;  %1887 = vmatmul.bf16.gmra.mxu0 %v331_v19  ;;  %v816_v18 = vunpack.c.l.b16 %v672_v48  ;;  %v234_v19 = vunpack.c.l.b16 %v90_v60  ;;  %v349_v48 = vrot.slane %v347_v24, 1 }
  0xbe   :  { %1565 = vmatmul.bf16.gmra.mxu2 %v1114_v20  ;;  %1798 = vmatmul.bf16.gmra.mxu3 %v4261_v62  ;;  %v4316_v62 = vld [vmem:[#allocation2 + $0x54] sm:$0xf0]  ;;  %v928_v20 = vshll.u32 %v4209_v4, 16 }
  0xbf   :  { %4731 = vst [vmem:[#allocation22_spill] sm:$0xff] %v4316_v62  ;;  %v832_v22 = vpack.c.b16 %v816_v18, %v816_v18  ;;  %v4331_v23 = vpack.c.b16 %v234_v19, %v234_v19  ;;  %v3622_v18 = vld [vmem:[#allocation5 + $0x218] sm:$0xff] }
  0xc0   :  { %v930_v42 = vrot.slane %v928_v20, 1  ;;  %v350_v20 = vor.u32 %v349_v48, %v345_v29  ;;  %2939 = vmatpush.bf16.msra.mxu0 %v3622_v18  ;;  %v3957_v29 = vld [vmem:[#allocation2 + $0x6c] sm:$0xe] }
  0xc1   :  { %v4303_v26 = vpop.f32.mrf.mxu2  ;;  %v4305_v28 = vpop.f32.mrf.mxu3  ;;  %4733 = vst [vmem:[#allocation24_spill] sm:$0xff] %v4331_v23  ;;  %v933_v59 = vshll.u32 %v832_v22, 16  ;;  %v352_v60 = vshll.u32 %v4331_v23, 16  ;;  %v1119_v62 = vrot.slane %v832_v22, 1  ;;  %v940_v22 = vshll.u32 %v4166_v11, 16 }
  0xc2   :  { %4730 = vst [vmem:[#allocation21_spill] sm:$0xff] %v4305_v28  ;;  %v4308_v33 = vpop.f32.mrf.mxu0  ;;  %v4310_v7 = vpop.f32.mrf.mxu1  ;;  %v931_v19 = vor.u32 %v930_v42, %v926_v41 }
  0xc3   :  { %v354_v31 = vrot.slane %v352_v60, 1 }
  0xc9   :  { %v4318_v46 = vpop.f32.mrf.mxu2  ;;  %v4320_v61 = vpop.f32.mrf.mxu3 }
  0xca   :  { %4732 = vst [vmem:[#allocation23_spill] sm:$0xff] %v4320_v61  ;;  %v4323_v0 = vpop.f32.mrf.mxu0  ;;  %v4325_v49 = vpop.f32.mrf.mxu1  ;;  %v91_v61 = vld [vmem:[#allocation2 + $0x68] sm:$0x1] }
  0xcb   :  { %v235_v42 = vunpack.c.l.b16 %v91_v61  ;;  %v942_v61 = vrot.slane %v940_v22, 1  ;;  %v92_v22 = vld [vmem:[#allocation2 + $0x74] sm:$0x1] }
  0xcc   :  { %v236_v63 = vunpack.c.l.b16 %v92_v22 }
  0xcd   :  { %1481 = vmatmul.bf16.gmra.mxu1 %v924_v47  ;;  %1892 = vmatmul.bf16.gmra.mxu0 %v343_v15  ;;  %v3853_v47 = vor.u32 %v3852_v57, %v3851_v32  ;;  %v3574_v15 = vld [vmem:[#allocation5 + $0x98] sm:$0xff]  ;;  %v355_v57 = vsel %vm259_vm0, %v350_v20, %v354_v31  ;;  %v4358_v60 = vpack.c.b16 %v235_v42, %v235_v42  ;;  %v674_v42 = vld [vmem:[#allocation2 + $0x80] sm:$0x1] }
  0xce   :  { %1570 = vmatmul.bf16.gmra.mxu2 %v1117_v10  ;;  %1803 = vmatmul.bf16.gmra.mxu3 %v4180_v35  ;;  %v935_v10 = vrot.slane %v933_v59, 1  ;;  %v3958_v31 = vor.u32 %v3957_v29, %v4168_v12  ;;  %v818_v5 = vunpack.c.l.b16 %v674_v42 }
  0xcf   :  { %1947 = vmatpush.bf16.msra.mxu1 %v3574_v15  ;;  %v1118_v27 = vrot.slane %v3853_v47, 1  ;;  %4737 = vst [vmem:[#allocation28_spill] sm:$0xff] %v4358_v60  ;;  %v364_v20 = vshll.u32 %v4358_v60, 16 }
  0xd0   :  { %v936_v32 = vsel %vm259_vm0, %v931_v19, %v935_v10 }
  0xd1   :  { %v4335_v45 = vpop.f32.mrf.mxu2  ;;  %v4337_v54 = vpop.f32.mrf.mxu3  ;;  %v1120_v59 = vsel %vm516_vm1, %v1118_v27, %v1119_v62  ;;  %v4373_v27 = vld [vmem:[#allocation2 + $0x6c] sm:$0xf0] }
  0xd2   :  { %4734 = vst [vmem:[#allocation25_spill] sm:$0xff] %v4337_v54  ;;  %v4339_v56 = vpop.f32.mrf.mxu0  ;;  %v4341_v35 = vpop.f32.mrf.mxu1  ;;  %v673_v54 = vld [vmem:[#allocation2 + $0x74] sm:$0x1] }
  0xd3   :  { %v817_v41 = vunpack.c.l.b16 %v673_v54  ;;  %v938_v54 = vshrl.u32 %v4166_v11, 16  ;;  %4740 = vst [vmem:[#allocation31_spill] sm:$0xff] %v4373_v27 }
  0xd5   :  { %v833_v48 = vpack.c.b16 %v817_v41, %v817_v41  ;;  %v366_v41 = vrot.slane %v364_v20, 1 }
  0xd7   :  { %v945_v10 = vshll.u32 %v833_v48, 16  ;;  %v1122_v11 = vrot.slane %v833_v48, 1  ;;  %v367_v29 = vsel %vm259_vm0, %v931_v19, %v366_v41  ;;  %v834_v48 = vpack.c.b16 %v818_v5, %v818_v5  ;;  %v3854_v19 = vld [vmem:[#allocation2 + $0x78] sm:$0xf0]  ;;  %v3855_v41 = vld [vmem:[#allocation2 + $0x78] sm:$0xe] }
  0xd8   :  { %v3856_v27 = vor.u32 %v3855_v41, %v3854_v19 }
  0xd9   :  { %v4345_v34 = vpop.f32.mrf.mxu2  ;;  %v4347_v28 = vpop.f32.mrf.mxu3 }
  0xda   :  { %4735 = vst [vmem:[#allocation26_spill] sm:$0xff] %v4345_v34  ;;  %v4349_v24 = vpop.f32.mrf.mxu0  ;;  %v4351_v23 = vpop.f32.mrf.mxu1 }
  0xdb   :  { %4736 = vst [vmem:[#allocation27_spill] sm:$0xff] %v4347_v28 }
  0xdd   :  { %1486 = vmatmul.bf16.gmra.mxu1 %v936_v32  ;;  %1897 = vmatmul.bf16.gmra.mxu0 %v355_v57  ;;  %v943_v32 = vor.u32 %v942_v61, %v938_v54  ;;  %v947_v57 = vrot.slane %v945_v10, 1  ;;  %v952_v10 = vshll.u32 %v4182_v36, 16 }
  0xde   :  { %1575 = vmatmul.bf16.gmra.mxu2 %v1120_v59  ;;  %1808 = vmatmul.bf16.gmra.mxu3 %v4314_v43  ;;  %v4371_v43 = vld [vmem:[#allocation2 + $0x6c] sm:$0xff]   ;;  %v1121_v59 = vrot.slane %v3958_v31, 1  ;;  %v4386_v31 = vpack.c.b16 %v236_v63, %v236_v63 }
  0xdf   :  { %v948_v12 = vsel %vm259_vm0, %v943_v32, %v947_v57  ;;  %v371_v20 = vshll.u32 %v4371_v43, 16  ;;  %v3605_v32 = vld [vmem:[#allocation5 + $0x190] sm:$0xff] }
  0xe0   :  { %v1123_v61 = vsel %vm516_vm1, %v1121_v59, %v1122_v11  ;;  %4743 = vst [vmem:[#allocation34_spill] sm:$0xff] %v4386_v31  ;;  %v3613_v57 = vld [vmem:[#allocation5 + $0x1d0] sm:$0xff]  ;;  %2762 = vmatpush.bf16.msra.mxu2 %v3605_v32  ;;  %v957_v11 = vshll.u32 %v834_v48, 16  ;;  %v376_v63 = vshll.u32 %v4386_v31, 16 }
  0xe1   :  { %v4360_v47 = vpop.f32.mrf.mxu2  ;;  %v4362_v15 = vpop.f32.mrf.mxu3  ;;  %2851 = vmatpush.bf16.msra.mxu3 %v3613_v57  ;;  %v3573_v32 = vld [vmem:[#allocation5 + $0x90] sm:$0xff] }
  0xe2   :  { %4738 = vst [vmem:[#allocation29_spill] sm:$0xff] %v4360_v47  ;;  %v4365_v18 = vpop.f32.mrf.mxu0  ;;  %v4367_v62 = vpop.f32.mrf.mxu1  ;;  %v3621_v57 = vld [vmem:[#allocation5 + $0x210] sm:$0xff]  ;;  %1948 = vmatpush.bf16.msra.mxu1 %v3573_v32  ;;  %v1125_v47 = vrot.slane %v834_v48, 1  ;;  %v964_v48 = vshll.u32 %v4195_v50, 16 }
  0xe3   :  { %4739 = vst [vmem:[#allocation30_spill] sm:$0xff] %v4362_v15  ;;  %2940 = vmatpush.bf16.msra.mxu0 %v3621_v57 }
  0xe9   :  { %v4375_v15 = vpop.f32.mrf.mxu2  ;;  %v4377_v28 = vpop.f32.mrf.mxu3 }
  0xea   :  { %4741 = vst [vmem:[#allocation32_spill] sm:$0xff] %v4375_v15  ;;  %v1452_v25 = vpop.f32.mrf.mxu1  ;;  %v1863_v60 = vpop.f32.mrf.mxu0  ;;  %v378_v15 = vrot.slane %v376_v63, 1 }
  0xeb   :  { %4742 = vst [vmem:[#allocation33_spill] sm:$0xff] %v4377_v28  ;;  %v1453_v54 = vadd.f32 %v1452_v25, %v4266_v9  ;;  %v950_v9 = vshrl.u32 %v4182_v36, 16  ;;  %v954_v25 = vrot.slane %v952_v10, 1  ;;  %v959_v36 = vrot.slane %v957_v11, 1 }
  0xed   :  { %1491 = vmatmul.bf16.gmra.mxu1 %v948_v12  ;;  %1902 = vmatmul.bf16.gmra.mxu0 %v367_v29  ;;  %v373_v29 = vrot.slane %v371_v20, 1  ;;  %v955_v38 = vor.u32 %v954_v25, %v950_v9  ;;  %v93_v20 = vld [vmem:[#allocation2 + $0x80] sm:$0x1]  ;;  %v3807_v25 = vld [vmem:[#allocation2 + $0x78] sm:$0xff]  }
  0xee   :  { %1580 = vmatmul.bf16.gmra.mxu2 %v1123_v61  ;;  %1813 = vmatmul.bf16.gmra.mxu3 %v4209_v4  ;;  %v369_v4 = vshrl.u32 %v4371_v43, 16  ;;  %v237_v11 = vunpack.c.l.b16 %v93_v20 }
  0xf0   :  { %v374_v10 = vor.u32 %v373_v29, %v369_v4  ;;  %v381_v29 = vshrl.u32 %v3807_v25, 16 }
  0xf1   :  { %v1541_v42 = vpop.f32.mrf.mxu2  ;;  %v1774_v59 = vpop.f32.mrf.mxu3 }
  0xf2   :  { %v1542_v5 = vadd.f32 %v1541_v42, %v1453_v54  ;;  %v1454_v22 = vpop.f32.mrf.mxu1  ;;  %v1865_v12 = vpop.f32.mrf.mxu0  ;;  %v1124_v42 = vrot.slane %v3856_v27, 1  ;;  %v379_v9 = vsel %vm259_vm0, %v374_v10, %v378_v15  ;;  %v3960_v27 = vld [vmem:[#allocation2 + $0x84] sm:$0xe] }
  0xf3   :  { %v1455_v61 = vadd.f32 %v1454_v22, %v4282_v40  ;;  %v962_v22 = vshrl.u32 %v4195_v50, 16  ;;  %v4408_v10 = vld [vmem:[#allocation2 + $0x84] sm:$0xff]  }
  0xf4   :  { %v1775_v28 = vadd.f32 %v1774_v59, %v1542_v5  ;;  %v960_v59 = vsel %vm259_vm0, %v955_v38, %v959_v36  ;;  %v4400_v38 = vpack.c.b16 %v237_v11, %v237_v11 }
  0xf6   :  { %v4392_v54 = vadd.f32 %v1863_v60, %v1775_v28  ;;  %v1126_v28 = vsel %vm516_vm1, %v1124_v42, %v1125_v47  ;;  %v966_v47 = vrot.slane %v964_v48, 1  ;;  %v388_v1 = vshll.u32 %v4400_v38, 16 }
  0xf8   :  { %v967_v42 = vor.u32 %v966_v47, %v962_v22 }
  0xf9   :  { %v1543_v34 = vpop.f32.mrf.mxu2  ;;  %v1776_v31 = vpop.f32.mrf.mxu3 }
  0xfa   :  { %v1544_v40 = vadd.f32 %v1543_v34, %v1455_v61  ;;  %v1457_v19 = vpop.f32.mrf.mxu1  ;;  %v1868_v41 = vpop.f32.mrf.mxu0  ;;  %v383_v34 = vshll.u32 %v3807_v25, 16 }
  0xfb   :  { %v1458_v5 = vadd.f32 %v1457_v19, %v4292_v44  ;;  %v390_v19 = vrot.slane %v388_v1, 1  ;;  %v3612_v1 = vld [vmem:[#allocation5 + $0x1c8] sm:$0xff] }
  0xfc   :  { %v1777_v60 = vadd.f32 %v1776_v31, %v1544_v40  ;;  %v969_v31 = vshll.u32 %v835_v58, 16  ;;  %v385_v63 = vrot.slane %v383_v34, 1  ;;  %2852 = vmatpush.bf16.msra.mxu3 %v3612_v1 }
  0xfd   :  { %1496 = vmatmul.bf16.gmra.mxu1 %v960_v59  ;;  %1907 = vmatmul.bf16.gmra.mxu0 %v379_v9  ;;  %v676_v59 = vld [vmem:[#allocation2 + $0x98] sm:$0x1] }
  0xfe   :  { %1585 = vmatmul.bf16.gmra.mxu2 %v1126_v28  ;;  %1818 = vmatmul.bf16.gmra.mxu3 %v4371_v43  ;;  %v4402_v15 = vadd.f32 %v1865_v12, %v1777_v60  ;;  %v3961_v43 = vor.u32 %v3960_v27, %v4197_v51  ;;  %v4410_v12 = vld [vmem:[#allocation2 + $0x84] sm:$0xf0]  ;;  %v971_v20 = vrot.slane %v969_v31, 1  ;;  %v386_v40 = vor.u32 %v385_v63, %v381_v29  ;;  %v94_v28 = vld [vmem:[#allocation2 + $0x8c] sm:$0x1] }
  0xff   :  { %v820_v51 = vunpack.c.l.b16 %v676_v59  ;;  %v238_v22 = vunpack.c.l.b16 %v94_v28  ;;  %v976_v29 = vshll.u32 %v4211_v6, 16  ;;  %v395_v63 = vshll.u32 %v4408_v10, 16 }
 0x100   :  { %v1127_v11 = vrot.slane %v3961_v43, 1  ;;  %v3857_v43 = vld [vmem:[#allocation2 + $0x90] sm:$0xf0] }
 0x101   :  { %v1546_v44 = vpop.f32.mrf.mxu2  ;;  %v1779_v4 = vpop.f32.mrf.mxu3  ;;  %v397_v28 = vrot.slane %v395_v63, 1  ;;  %v95_v63 = vld [vmem:[#allocation2 + $0x98] sm:$0x1] }
 0x102   :  { %v1547_v61 = vadd.f32 %v1546_v44, %v1458_v5  ;;  %v1459_v32 = vpop.f32.mrf.mxu1  ;;  %v1870_v57 = vpop.f32.mrf.mxu0  ;;  %v1128_v5 = vrot.slane %v835_v58, 1  ;;  %v836_v58 = vpack.c.b16 %v820_v51, %v820_v51  ;;  %v3572_v51 = vld [vmem:[#allocation5 + $0x88] sm:$0xff] }
 0x103   :  { %v1460_v36 = vadd.f32 %v1459_v32, %v4308_v33  ;;  %v972_v33 = vsel %vm259_vm0, %v967_v42, %v971_v20  ;;  %v3604_v32 = vld [vmem:[#allocation5 + $0x188] sm:$0xff]  ;;  %v978_v42 = vrot.slane %v976_v29, 1  ;;  %1949 = vmatpush.bf16.msra.mxu1 %v3572_v51 }
 0x104   :  { %v1780_v50 = vadd.f32 %v1779_v4, %v1547_v61  ;;  %v391_v4 = vsel %vm259_vm0, %v386_v40, %v390_v19  ;;  %v1129_v31 = vsel %vm516_vm1, %v1127_v11, %v1128_v5  ;;  %v4420_v61 = vpack.c.b16 %v238_v22, %v238_v22  ;;  %2763 = vmatpush.bf16.msra.mxu2 %v3604_v32 }
 0x105   :  { %v981_v19 = vshll.u32 %v836_v58, 16  ;;  %v393_v5 = vshrl.u32 %v4408_v10, 16  ;;  %v1131_v29 = vrot.slane %v836_v58, 1  ;;  %v988_v58 = vshll.u32 %v4170_v13, 16 }
 0x106   :  { %v4412_v9 = vadd.f32 %v1868_v41, %v1780_v50  ;;  %v974_v50 = vshrl.u32 %v4211_v6, 16 }
 0x107   :  { %v983_v6 = vrot.slane %v981_v19, 1  ;;  %v239_v19 = vunpack.c.l.b16 %v95_v63 }
 0x109   :  { %v1548_v60 = vpop.f32.mrf.mxu2  ;;  %v1781_v48 = vpop.f32.mrf.mxu3 }
 0x10a   :  { %v1549_v27 = vadd.f32 %v1548_v60, %v1460_v36  ;;  %v1462_v34 = vpop.f32.mrf.mxu1  ;;  %v1873_v44 = vpop.f32.mrf.mxu0  ;;  %v400_v60 = vshll.u32 %v4420_v61, 16 }
 0x10b   :  { %v1463_v47 = vadd.f32 %v1462_v34, %v4323_v0  ;;  %v3858_v0 = vld [vmem:[#allocation2 + $0x90] sm:$0xe]  ;;  %v979_v34 = vor.u32 %v978_v42, %v974_v50 }
 0x10c   :  { %v1782_v41 = vadd.f32 %v1781_v48, %v1549_v27  ;;  %v3859_v48 = vor.u32 %v3858_v0, %v3857_v43  ;;  %v3620_v27 = vld [vmem:[#allocation5 + $0x208] sm:$0xff]  ;;  %v402_v22 = vrot.slane %v400_v60, 1  ;;  %v3808_v42 = vld [vmem:[#allocation2 + $0x90] sm:$0xff]  }
 0x10d   :  { %1501 = vmatmul.bf16.gmra.mxu1 %v972_v33  ;;  %1912 = vmatmul.bf16.gmra.mxu0 %v391_v4  ;;  %v398_v4 = vor.u32 %v397_v28, %v393_v5  ;;  %v3963_v5 = vld [vmem:[#allocation2 + $0x9c] sm:$0xe]  ;;  %v407_v60 = vshll.u32 %v3808_v42, 16 }
 0x10e   :  { %1590 = vmatmul.bf16.gmra.mxu2 %v1129_v31  ;;  %1823 = vmatmul.bf16.gmra.mxu3 %v3807_v25  ;;  %v4422_v36 = vadd.f32 %v1870_v57, %v1782_v41  ;;  %v677_v31 = vld [vmem:[#allocation2 + $0xa4] sm:$0x1]  ;;  %v1130_v41 = vrot.slane %v3859_v48, 1 }
 0x10f   :  { %2941 = vmatpush.bf16.msra.mxu0 %v3620_v27  ;;  %v403_v50 = vsel %vm259_vm0, %v398_v4, %v402_v22  ;;  %v990_v27 = vrot.slane %v988_v58, 1  ;;  %v409_v4 = vrot.slane %v407_v60, 1 }
 0x111   :  { %v1551_v20 = vpop.f32.mrf.mxu2  ;;  %v1784_v40 = vpop.f32.mrf.mxu3 }
 0x112   :  { %v1552_v59 = vadd.f32 %v1551_v20, %v1463_v47  ;;  %v1464_v25 = vpop.f32.mrf.mxu1  ;;  %v1875_v11 = vpop.f32.mrf.mxu0  ;;  %v821_v20 = vunpack.c.l.b16 %v677_v31 }
 0x113   :  { %v1465_v57 = vadd.f32 %v1464_v25, %v4339_v56 }
 0x114   :  { %v1785_v33 = vadd.f32 %v1784_v40, %v1552_v59  ;;  %v984_v40 = vsel %vm259_vm0, %v979_v34, %v983_v6  ;;  %v837_v28 = vpack.c.b16 %v821_v20, %v821_v20  ;;  %v405_v6 = vshrl.u32 %v3808_v42, 16 }
 0x116   :  { %v4428_v47 = vadd.f32 %v1873_v44, %v1785_v33  ;;  %v1132_v44 = vsel %vm516_vm1, %v1130_v41, %v1131_v29  ;;  %v986_v33 = vshrl.u32 %v4170_v13, 16  ;;  %v993_v34 = vshll.u32 %v837_v28, 16 }
 0x118   :  { %v995_v20 = vrot.slane %v993_v34, 1 }
 0x119   :  { %v1553_v32 = vpop.f32.mrf.mxu2  ;;  %v1786_v1 = vpop.f32.mrf.mxu3 }
 0x11a   :  { %v1554_v56 = vadd.f32 %v1553_v32, %v1465_v57  ;;  %v1467_v43 = vpop.f32.mrf.mxu1  ;;  %v1878_v0 = vpop.f32.mrf.mxu0  ;;  %v4436_v57 = vpack.c.b16 %v239_v19, %v239_v19  ;;  %v4444_v32 = vld [vmem:[#allocation2 + $0x9c] sm:$0xff]  }
 0x11b   :  { %v1468_v59 = vadd.f32 %v1467_v43, %v4349_v24 }
 0x11c   :  { %v1787_v25 = vadd.f32 %v1786_v1, %v1554_v56  ;;  %v412_v29 = vshll.u32 %v4436_v57, 16  ;;  %v991_v1 = vor.u32 %v990_v27, %v986_v33  ;;  %v410_v56 = vor.u32 %v409_v4, %v405_v6  ;;  %v3942_v6 = vld [vmem:[#allocation2 + $0xa8] sm:$0xff]  }
 0x11d   :  { %1506 = vmatmul.bf16.gmra.mxu1 %v984_v40  ;;  %1917 = vmatmul.bf16.gmra.mxu0 %v403_v50  ;;  %v678_v40 = vld [vmem:[#allocation2 + $0xb0] sm:$0x1]  ;;  %v419_v4 = vshll.u32 %v4444_v32, 16 }
 0x11e   :  { %1595 = vmatmul.bf16.gmra.mxu2 %v1132_v44  ;;  %1828 = vmatmul.bf16.gmra.mxu3 %v4408_v10  ;;  %v4438_v48 = vadd.f32 %v1875_v11, %v1787_v25  ;;  %v3964_v10 = vor.u32 %v3963_v5, %v4172_v14  ;;  %v4446_v11 = vld [vmem:[#allocation2 + $0x9c] sm:$0xf0]  ;;  %v414_v43 = vrot.slane %v412_v29, 1  ;;  %v96_v44 = vld [vmem:[#allocation2 + $0xa4] sm:$0x1]  ;;  %v822_v14 = vunpack.c.l.b16 %v678_v40  ;;  %v3611_v29 = vld [vmem:[#allocation5 + $0x1c0] sm:$0xff] }
 0x11f   :  { %v240_v33 = vunpack.c.l.b16 %v96_v44  ;;  %2853 = vmatpush.bf16.msra.mxu3 %v3611_v29  ;;  %v97_v29 = vld [vmem:[#allocation2 + $0xb0] sm:$0x1] }
 0x120   :  { %v1133_v19 = vrot.slane %v3964_v10, 1 }
 0x121   :  { %v1556_v24 = vpop.f32.mrf.mxu2  ;;  %v1789_v51 = vpop.f32.mrf.mxu3 }
 0x122   :  { %v1557_v22 = vadd.f32 %v1556_v24, %v1468_v59  ;;  %v1469_v31 = vpop.f32.mrf.mxu1  ;;  %v1880_v41 = vpop.f32.mrf.mxu0  ;;  %v1134_v59 = vrot.slane %v837_v28, 1  ;;  %v838_v28 = vpack.c.b16 %v822_v14, %v822_v14 }
 0x123   :  { %v1470_v63 = vadd.f32 %v1469_v31, %v4365_v18  ;;  %v996_v18 = vsel %vm259_vm0, %v991_v1, %v995_v20  ;;  %v3603_v31 = vld [vmem:[#allocation5 + $0x180] sm:$0xff]  ;;  %v3861_v1 = vld [vmem:[#allocation2 + $0xa8] sm:$0xe]  ;;  %v998_v20 = vshrl.u32 %v3942_v6, 16 }
 0x124   :  { %v1790_v13 = vadd.f32 %v1789_v51, %v1557_v22  ;;  %v415_v51 = vsel %vm259_vm0, %v410_v56, %v414_v43  ;;  %v1135_v27 = vsel %vm516_vm1, %v1133_v19, %v1134_v59  ;;  %v4454_v22 = vpack.c.b16 %v240_v33, %v240_v33  ;;  %2764 = vmatpush.bf16.msra.mxu2 %v3603_v31 }
 0x125   :  { %v1005_v19 = vshll.u32 %v838_v28, 16  ;;  %v1137_v31 = vrot.slane %v838_v28, 1  ;;  %v1012_v28 = vshll.u32 %v4199_v52, 16 }
 0x126   :  { %v4448_v50 = vadd.f32 %v1878_v0, %v1790_v13  ;;  %v1000_v0 = vshll.u32 %v3942_v6, 16  ;;  %v3860_v13 = vld [vmem:[#allocation2 + $0xa8] sm:$0xf0] }
 0x128   :  { %v1002_v56 = vrot.slane %v1000_v0, 1 }
 0x129   :  { %v1558_v25 = vpop.f32.mrf.mxu2  ;;  %v1791_v58 = vpop.f32.mrf.mxu3 }
 0x12a   :  { %v1559_v5 = vadd.f32 %v1558_v25, %v1470_v63  ;;  %v1472_v60 = vpop.f32.mrf.mxu1  ;;  %v1883_v24 = vpop.f32.mrf.mxu0  ;;  %v417_v25 = vshrl.u32 %v4444_v32, 16 }
 0x12b   :  { %v1473_v10 = vadd.f32 %v1472_v60, %v4268_v17  ;;  %v3571_v17 = vld [vmem:[#allocation5 + $0x80] sm:$0xff]  ;;  %v1003_v60 = vor.u32 %v1002_v56, %v998_v20 }
 0x12c   :  { %v1792_v34 = vadd.f32 %v1791_v58, %v1559_v5  ;;  %v421_v58 = vrot.slane %v419_v4, 1  ;;  %v3619_v5 = vld [vmem:[#allocation5 + $0x200] sm:$0xff]  ;;  %1950 = vmatpush.bf16.msra.mxu1 %v3571_v17 }
 0x12d   :  { %1511 = vmatmul.bf16.gmra.mxu1 %v996_v18  ;;  %1922 = vmatmul.bf16.gmra.mxu0 %v415_v51  ;;  %v3862_v18 = vor.u32 %v3861_v1, %v3860_v13  ;;  %v1007_v51 = vrot.slane %v1005_v19, 1  ;;  %v3809_v19 = vld [vmem:[#allocation2 + $0xa8] sm:$0xff]  }
 0x12e   :  { %1600 = vmatmul.bf16.gmra.mxu2 %v1135_v27  ;;  %1833 = vmatmul.bf16.gmra.mxu3 %v3808_v42  ;;  %v4456_v63 = vadd.f32 %v1880_v41, %v1792_v34  ;;  %v424_v41 = vshll.u32 %v4454_v22, 16  ;;  %v422_v33 = vor.u32 %v421_v58, %v417_v25  ;;  %v679_v34 = vld [vmem:[#allocation2 + $0xbc] sm:$0x1]  ;;  %v241_v25 = vunpack.c.l.b16 %v97_v29 }
 0x12f   :  { %2942 = vmatpush.bf16.msra.mxu0 %v3619_v5  ;;  %v1136_v0 = vrot.slane %v3862_v18, 1  ;;  %v823_v13 = vunpack.c.l.b16 %v679_v34  ;;  %v1008_v20 = vsel %vm259_vm0, %v1003_v60, %v1007_v51  ;;  %v1010_v5 = vshrl.u32 %v4199_v52, 16 }
 0x130   :  { %v426_v27 = vrot.slane %v424_v41, 1  ;;  %v3966_v41 = vld [vmem:[#allocation2 + $0xb4] sm:$0xe]  ;;  %v4469_v18 = vpack.c.b16 %v241_v25, %v241_v25  ;;  %v429_v34 = vshrl.u32 %v3809_v19, 16 }
 0x131   :  { %v1561_v43 = vpop.f32.mrf.mxu2  ;;  %v1794_v40 = vpop.f32.mrf.mxu3 }
 0x132   :  { %v1562_v42 = vadd.f32 %v1561_v43, %v1473_v10  ;;  %v1474_v59 = vpop.f32.mrf.mxu1  ;;  %v1885_v44 = vpop.f32.mrf.mxu0  ;;  %v427_v56 = vsel %vm259_vm0, %v422_v33, %v426_v27  ;;  %v1014_v33 = vrot.slane %v1012_v28, 1 }
 0x133   :  { %v1475_v4 = vadd.f32 %v1474_v59, %v4284_v3  ;;  %v839_v3 = vpack.c.b16 %v823_v13, %v823_v13  ;;  %v431_v59 = vshll.u32 %v3809_v19, 16 }
 0x134   :  { %v1795_v14 = vadd.f32 %v1794_v40, %v1562_v42  ;;  %v1015_v13 = vor.u32 %v1014_v33, %v1010_v5 }
 0x135   :  { %v1017_v27 = vshll.u32 %v839_v3, 16 }
 0x136   :  { %v4461_v6 = vadd.f32 %v1883_v24, %v1795_v14  ;;  %v1138_v24 = vsel %vm516_vm1, %v1136_v0, %v1137_v31  ;;  %v433_v0 = vrot.slane %v431_v59, 1 }
 0x137   :  { %v1019_v52 = vrot.slane %v1017_v27, 1 }
 0x139   :  { %v1563_v10 = vpop.f32.mrf.mxu2  ;;  %v1796_v43 = vpop.f32.mrf.mxu3 }
 0x13a   :  { %v1564_v1 = vadd.f32 %v1563_v10, %v1475_v4  ;;  %v1477_v40 = vpop.f32.mrf.mxu1  ;;  %v1888_v42 = vpop.f32.mrf.mxu0  ;;  %v436_v10 = vshll.u32 %v4469_v18, 16 }
 0x13b   :  { %v1478_v17 = vadd.f32 %v1477_v40, %v4294_v16 }
 0x13c   :  { %v1797_v58 = vadd.f32 %v1796_v43, %v1564_v1  ;;  %v4477_v43 = vld [vmem:[#allocation2 + $0xb4] sm:$0xff]   ;;  %v434_v1 = vor.u32 %v433_v0, %v429_v34  ;;  %v438_v40 = vrot.slane %v436_v10, 1  ;;  %v3943_v34 = vld [vmem:[#allocation2 + $0xc0] sm:$0xff]  }
 0x13d   :  { %1516 = vmatmul.bf16.gmra.mxu1 %v1008_v20  ;;  %1927 = vmatmul.bf16.gmra.mxu0 %v427_v56  ;;  %v680_v20 = vld [vmem:[#allocation2 + $0xc8] sm:$0x1]  ;;  %v1024_v0 = vshll.u32 %v3943_v34, 16 }
 0x13e   :  { %1605 = vmatmul.bf16.gmra.mxu2 %v1138_v24  ;;  %1838 = vmatmul.bf16.gmra.mxu3 %v4444_v32  ;;  %v4471_v14 = vadd.f32 %v1885_v44, %v1797_v58  ;;  %v3967_v32 = vor.u32 %v3966_v41, %v4201_v53  ;;  %v4479_v44 = vld [vmem:[#allocation2 + $0xb4] sm:$0xf0]  ;;  %v1140_v24 = vrot.slane %v839_v3, 1  ;;  %v98_v58 = vld [vmem:[#allocation2 + $0xbc] sm:$0x1]  ;;  %v1020_v53 = vsel %vm259_vm0, %v1015_v13, %v1019_v52 }
 0x13f   :  { %4744 = vst [vmem:[#allocation35_spill] sm:$0xff] %v4479_v44  ;;  %v824_v41 = vunpack.c.l.b16 %v680_v20  ;;  %v439_v5 = vsel %vm259_vm0, %v434_v1, %v438_v40  ;;  %v242_v33 = vunpack.c.l.b16 %v98_v58  ;;  %v1022_v13 = vshrl.u32 %v3943_v34, 16 }
 0x140   :  { %v1139_v25 = vrot.slane %v3967_v32, 1  ;;  %v3863_v32 = vld [vmem:[#allocation2 + $0xc0] sm:$0xf0]  ;;  %v1026_v52 = vrot.slane %v1024_v0, 1 }
 0x141   :  { %v1566_v60 = vpop.f32.mrf.mxu2  ;;  %v1799_v51 = vpop.f32.mrf.mxu3  ;;  %v840_v3 = vpack.c.b16 %v824_v41, %v824_v41 }
 0x142   :  { %v1567_v31 = vadd.f32 %v1566_v60, %v1478_v17  ;;  %v1479_v29 = vpop.f32.mrf.mxu1  ;;  %v1890_v4 = vpop.f32.mrf.mxu0  ;;  %v1141_v27 = vsel %vm516_vm1, %v1139_v25, %v1140_v24 }
 0x143   :  { %v1480_v28 = vadd.f32 %v1479_v29, %v4310_v7  ;;  %v443_v7 = vshll.u32 %v4477_v43, 16  ;;  %v1029_v20 = vshll.u32 %v840_v3, 16 }
 0x144   :  { %v1800_v16 = vadd.f32 %v1799_v51, %v1567_v31  ;;  %v4488_v31 = vpack.c.b16 %v242_v33, %v242_v33  ;;  %v1143_v33 = vrot.slane %v840_v3, 1  ;;  %v3811_v3 = vld [vmem:[#allocation2] sm:$0xe] }
 0x145   :  { %v1031_v41 = vrot.slane %v1029_v20, 1 }
 0x146   :  { %v4481_v56 = vadd.f32 %v1888_v42, %v1800_v16  ;;  %4745 = vst [vmem:[#allocation36_spill] sm:$0xff] %v4488_v31  ;;  %v3864_v16 = vld [vmem:[#allocation2 + $0xc0] sm:$0xe] }
 0x149   :  { %v1568_v59 = vpop.f32.mrf.mxu2  ;;  %v1801_v17 = vpop.f32.mrf.mxu3 }
 0x14a   :  { %v1569_v60 = vadd.f32 %v1568_v59, %v1480_v28  ;;  %v1482_v44 = vpop.f32.mrf.mxu1  ;;  %v1893_v51 = vpop.f32.mrf.mxu0  ;;  %v445_v28 = vrot.slane %v443_v7, 1  ;;  %v448_v59 = vshll.u32 %v4488_v31, 16 }
 0x14b   :  { %v1483_v10 = vadd.f32 %v1482_v44, %v4325_v49 }
 0x14c   :  { %v1802_v42 = vadd.f32 %v1801_v17, %v1569_v60  ;;  %v3865_v17 = vor.u32 %v3864_v16, %v3863_v32  ;;  %v450_v44 = vrot.slane %v448_v59, 1 }
 0x14d   :  { %1521 = vmatmul.bf16.gmra.mxu1 %v1020_v53  ;;  %1932 = vmatmul.bf16.gmra.mxu0 %v439_v5  ;;  %v1027_v53 = vor.u32 %v1026_v52, %v1022_v13 }
 0x14e   :  { %1610 = vmatmul.bf16.gmra.mxu2 %v1141_v27  ;;  %1843 = vmatmul.bf16.gmra.mxu3 %v3809_v19  ;;  %v4490_v29 = vadd.f32 %v1890_v4, %v1802_v42  ;;  %v441_v19 = vshrl.u32 %v4477_v43, 16  ;;  %v1142_v5 = vrot.slane %v3865_v17, 1  ;;  %v2068_v42 = vld [vmem:[#allocation2 + $0x20] sm:$0x1] }
 0x14f   :  { %v1032_v31 = vsel %vm259_vm0, %v1027_v53, %v1031_v41  ;;  %v2212_v13 = vunpack.c.l.b16 %v2068_v42 }
 0x150   :  { %v446_v49 = vor.u32 %v445_v28, %v441_v19  ;;  %v1144_v16 = vsel %vm516_vm1, %v1142_v5, %v1143_v33  ;;  %v3874_v19 = vld [vmem:[#allocation2 + $0x18] sm:$0xe] }
 0x151   :  { %v1571_v1 = vpop.f32.mrf.mxu2  ;;  %v1804_v40 = vpop.f32.mrf.mxu3 }
 0x152   :  { %v1572_v25 = vadd.f32 %v1571_v1, %v1483_v10  ;;  %v1484_v24 = vpop.f32.mrf.mxu1  ;;  %v1895_v58 = vpop.f32.mrf.mxu0  ;;  %v451_v32 = vsel %vm259_vm0, %v446_v49, %v450_v44 }
 0x153   :  { %v1485_v27 = vadd.f32 %v1484_v24, %v4341_v35  ;;  %v3810_v35 = vld [vmem:[#allocation2] sm:$0xf0]  ;;  %v3873_v24 = vld [vmem:[#allocation2 + $0x18] sm:$0xf0] }
 0x154   :  { %v1805_v4 = vadd.f32 %v1804_v40, %v1572_v25  ;;  %v2228_v25 = vpack.c.b16 %v2212_v13, %v2212_v13  ;;  %v3875_v49 = vor.u32 %v3874_v19, %v3873_v24  ;;  %v2069_v13 = vld [vmem:[#allocation2 + $0x2c] sm:$0x1] }
 0x156   :  { %v4495_v60 = vadd.f32 %v1893_v51, %v1805_v4  ;;  %v3692_v51 = vld [vmem:[#allocation2 + $0x18] sm:$0xff]   ;;  %v3812_v4 = vor.u32 %v3811_v3, %v3810_v35 }
 0x157   :  { %v2247_v20 = vshll.u32 %v3692_v51, 16  ;;  %v2245_v44 = vshrl.u32 %v3692_v51, 16 }
 0x158   :  { %v517_v42 = vrot.slane %v3812_v4, 1 }
 0x159   :  { %v1573_v34 = vpop.f32.mrf.mxu2  ;;  %v1806_v0 = vpop.f32.mrf.mxu3  ;;  %v2249_v5 = vrot.slane %v2247_v20, 1 }
 0x15a   :  { %v1574_v10 = vadd.f32 %v1573_v34, %v1485_v27  ;;  %v1487_v1 = vpop.f32.mrf.mxu1  ;;  %v1898_v7 = vpop.f32.mrf.mxu0  ;;  %v4505_v27 = vld [vmem:[#allocation2 + $0x24] sm:$0xff]   ;;  %v518_v34 = vrot.slane %v4217_v21, 1 }
 0x15b   :  { %v1488_v28 = vadd.f32 %v1487_v1, %v4351_v23  ;;  %v2250_v1 = vor.u32 %v2249_v5, %v2245_v44  ;;  %v2259_v4 = vshll.u32 %v4505_v27, 16 }
 0x15c   :  { %v1807_v52 = vadd.f32 %v1806_v0, %v1574_v10  ;;  %v2500_v0 = vrot.slane %v3875_v49, 1  ;;  %v2501_v10 = vrot.slane %v2228_v25, 1  ;;  %v519_v19 = vsel %vm516_vm1, %v517_v42, %v518_v34 }
 0x15d   :  { %1526 = vmatmul.bf16.gmra.mxu1 %v1032_v31  ;;  %1937 = vmatmul.bf16.gmra.mxu0 %v451_v32 }
 0x15e   :  { %1615 = vmatmul.bf16.gmra.mxu2 %v1144_v16  ;;  %1848 = vmatmul.bf16.gmra.mxu3 %v4477_v43  ;;  %v4502_v40 = vadd.f32 %v1895_v58, %v1807_v52  ;;  %v2252_v43 = vshll.u32 %v2228_v25, 16  ;;  %v3971_v58 = vld [vmem:[#allocation2 + $0x24] sm:$0xf0]  ;;  %v2213_v25 = vunpack.c.l.b16 %v2069_v13 }
 0x160   :  { %v2254_v32 = vrot.slane %v2252_v43, 1 }
 0x161   :  { %v1576_v59 = vpop.f32.mrf.mxu2  ;;  %v1809_v17 = vpop.f32.mrf.mxu3 }
 0x162   :  { %v1577_v53 = vadd.f32 %v1576_v59, %v1488_v28  ;;  %v1489_v41 = vpop.f32.mrf.mxu1  ;;  %v1900_v31 = vpop.f32.mrf.mxu0  ;;  %v2502_v28 = vsel %vm516_vm1, %v2500_v0, %v2501_v10  ;;  %v3969_v59 = vld [vmem:[#allocation2 + $0xc] sm:$0xe]  ;;  %v2255_v21 = vsel %vm259_vm0, %v2250_v1, %v2254_v32  ;;  %v2257_v0 = vshrl.u32 %v4505_v27, 16 }
 0x163   :  { %v1490_v16 = vadd.f32 %v1489_v41, %v4367_v62  ;;  %v3970_v5 = vor.u32 %v3969_v59, %v4222_v30  ;;  %v2261_v10 = vrot.slane %v2259_v4, 1  ;;  %v521_v32 = vrot.slane %v4228_v55, 1  ;;  %v3814_v4 = vld [vmem:[#allocation2 + $0x18] sm:$0xe] }
 0x164   :  { %v1810_v33 = vadd.f32 %v1809_v17, %v1577_v53  ;;  %v2229_v53 = vpack.c.b16 %v2213_v25, %v2213_v25 }
 0x166   :  { %v4508_v23 = vadd.f32 %v1898_v7, %v1810_v33  ;;  %v3972_v7 = vld [vmem:[#allocation2 + $0x24] sm:$0xe]  ;;  %v2504_v13 = vrot.slane %v2229_v53, 1 }
 0x167   :  { %v3973_v34 = vor.u32 %v3972_v7, %v3971_v58 }
 0x169   :  { %v1578_v52 = vpop.f32.mrf.mxu2  ;;  %v1811_v35 = vpop.f32.mrf.mxu3 }
 0x16a   :  { %v1579_v3 = vadd.f32 %v1578_v52, %v1490_v16  ;;  %v1492_v20 = vpop.f32.mrf.mxu1  ;;  %v1903_v24 = vpop.f32.mrf.mxu0  ;;  %v2503_v16 = vrot.slane %v3973_v34, 1 }
 0x16b   :  { %v1493_v41 = vadd.f32 %v1492_v20, %v4278_v37  ;;  %v2262_v37 = vor.u32 %v2261_v10, %v2257_v0 }
 0x16c   :  { %v1812_v17 = vadd.f32 %v1811_v35, %v1579_v3  ;;  %v2070_v3 = vld [vmem:[#allocation2 + $0x38] sm:$0x1]  ;;  %v2505_v25 = vsel %vm516_vm1, %v2503_v16, %v2504_v13 }
 0x16d   :  { %1951 = vmatmul.bf16.vlgmr.msra.gmra.mxu1 %v519_v19  ;;  %2943 = vmatmul.bf16.vlgmr.msra.gmra.mxu0 %v2502_v28  ;;  %v2214_v7 = vunpack.c.l.b16 %v2070_v3 }
 0x16e   :  { %2765 = vmatmul.bf16.vlgmr.msra.gmra.mxu2 %v3692_v51  ;;  %2854 = vmatmul.bf16.vlgmr.msra.gmra.mxu3 %v2255_v21  ;;  %v4514_v62 = vadd.f32 %v1900_v31, %v1812_v17  ;;  %v2264_v51 = vshll.u32 %v2229_v53, 16  ;;  %v520_v31 = vrot.slane %v3970_v5, 1  ;;  %v3877_v5 = vld [vmem:[#allocation2 + $0x30] sm:$0xe] }
 0x170   :  { %v2266_v35 = vrot.slane %v2264_v51, 1  ;;  %v522_v21 = vsel %vm516_vm1, %v520_v31, %v521_v32 }
 0x171   :  { %v1581_v49 = vpop.f32.mrf.mxu2  ;;  %v1814_v44 = vpop.f32.mrf.mxu3 }
 0x172   :  { %v1582_v43 = vadd.f32 %v1581_v49, %v1493_v41  ;;  %v1494_v33 = vpop.f32.mrf.mxu1  ;;  %v1905_v42 = vpop.f32.mrf.mxu0  ;;  %v2267_v55 = vsel %vm259_vm0, %v2262_v37, %v2266_v35  ;;  %v2230_v49 = vpack.c.b16 %v2214_v7, %v2214_v7  ;;  %v4531_v37 = vld [vmem:[#allocation2 + $0x3c] sm:$0xff]  }
 0x173   :  { %v1495_v30 = vadd.f32 %v1494_v33, %v4288_v2  ;;  %v3813_v2 = vld [vmem:[#allocation2 + $0x18] sm:$0xf0] }
 0x174   :  { %v1815_v1 = vadd.f32 %v1814_v44, %v1582_v43  ;;  %v3876_v44 = vld [vmem:[#allocation2 + $0x30] sm:$0xf0]  ;;  %v3815_v0 = vor.u32 %v3814_v4, %v3813_v2  ;;  %v2276_v16 = vshll.u32 %v2230_v49, 16 }
 0x175   :  { %v3878_v31 = vor.u32 %v3877_v5, %v3876_v44  ;;  %v3975_v44 = vld [vmem:[#allocation2 + $0x24] sm:$0xe] }
 0x176   :  { %v4521_v52 = vadd.f32 %v1903_v24, %v1815_v1  ;;  %v3866_v24 = vld [vmem:[#allocation2 + $0x30] sm:$0xff]   ;;  %v523_v35 = vrot.slane %v3815_v0, 1 }
 0x177   :  { %v2271_v41 = vshll.u32 %v3866_v24, 16  ;;  %v2269_v32 = vshrl.u32 %v3866_v24, 16  ;;  %v2506_v3 = vrot.slane %v3878_v31, 1 }
 0x179   :  { %v1583_v20 = vpop.f32.mrf.mxu2  ;;  %v1816_v19 = vpop.f32.mrf.mxu3 }
 0x17a   :  { %v1584_v58 = vadd.f32 %v1583_v20, %v1495_v30  ;;  %v1497_v28 = vpop.f32.mrf.mxu1  ;;  %v1908_v59 = vpop.f32.mrf.mxu0  ;;  %v524_v30 = vrot.slane %v4236_v39, 1  ;;  %v2507_v20 = vrot.slane %v2230_v49, 1 }
 0x17b   :  { %v1498_v43 = vadd.f32 %v1497_v28, %v4303_v26 }
 0x17c   :  { %v1817_v17 = vadd.f32 %v1816_v19, %v1584_v58  ;;  %v2278_v58 = vrot.slane %v2276_v16, 1  ;;  %v525_v4 = vsel %vm516_vm1, %v523_v35, %v524_v30 }
 0x17d   :  { %1956 = vmatmul.bf16.gmra.mxu1 %v522_v21  ;;  %2948 = vmatmul.bf16.gmra.mxu0 %v2505_v25  ;;  %v2071_v21 = vld [vmem:[#allocation2 + $0x44] sm:$0x1] }
 0x17e   :  { %2770 = vmatmul.bf16.gmra.mxu2 %v4505_v27  ;;  %2859 = vmatmul.bf16.gmra.mxu3 %v2267_v55  ;;  %v4528_v53 = vadd.f32 %v1905_v42, %v1817_v17  ;;  %v2273_v27 = vrot.slane %v2271_v41, 1  ;;  %v3977_v42 = vld [vmem:[#allocation2 + $0x3c] sm:$0xf0]  ;;  %v2508_v41 = vsel %vm516_vm1, %v2506_v3, %v2507_v20  ;;  %v2215_v49 = vunpack.c.l.b16 %v2071_v21 }
 0x17f   :  { %v4746_v3 = vld [vmem:[#allocation14_spill] sm:$0xff] }
 0x180   :  { %v2274_v19 = vor.u32 %v2273_v27, %v2269_v32  ;;  %v527_v20 = vrot.slane %v4746_v3, 1 }
 0x181   :  { %v1586_v33 = vpop.f32.mrf.mxu2  ;;  %v1819_v34 = vpop.f32.mrf.mxu3 }
 0x182   :  { %v1587_v10 = vadd.f32 %v1586_v33, %v1498_v43  ;;  %v1499_v51 = vpop.f32.mrf.mxu1  ;;  %v1910_v1 = vpop.f32.mrf.mxu0  ;;  %v2279_v39 = vsel %vm259_vm0, %v2274_v19, %v2278_v58  ;;  %v2283_v43 = vshll.u32 %v4531_v37, 16  ;;  %v2231_v33 = vpack.c.b16 %v2215_v49, %v2215_v49 }
 0x183   :  { %v1500_v28 = vadd.f32 %v1499_v51, %v4318_v46  ;;  %v3976_v51 = vor.u32 %v3975_v44, %v4241_v8 }
 0x184   :  { %v1820_v13 = vadd.f32 %v1819_v34, %v1587_v10  ;;  %v2285_v35 = vrot.slane %v2283_v43, 1  ;;  %v2510_v58 = vrot.slane %v2231_v33, 1  ;;  %v3816_v43 = vld [vmem:[#allocation2 + $0x30] sm:$0xf0] }
 0x186   :  { %v4534_v26 = vadd.f32 %v1908_v59, %v1820_v13  ;;  %v3978_v59 = vld [vmem:[#allocation2 + $0x3c] sm:$0xe]  ;;  %v2281_v13 = vshrl.u32 %v4531_v37, 16 }
 0x187   :  { %v3979_v16 = vor.u32 %v3978_v59, %v3977_v42 }
 0x189   :  { %v1588_v25 = vpop.f32.mrf.mxu2  ;;  %v1821_v55 = vpop.f32.mrf.mxu3  ;;  %v2509_v19 = vrot.slane %v3979_v16, 1 }
 0x18a   :  { %v1589_v7 = vadd.f32 %v1588_v25, %v1500_v28  ;;  %v1502_v17 = vpop.f32.mrf.mxu1  ;;  %v1913_v2 = vpop.f32.mrf.mxu0  ;;  %v4747_v25 = vld [vmem:[#allocation26_spill] sm:$0xff] }
 0x18b   :  { %v1503_v34 = vadd.f32 %v1502_v17, %v4335_v45  ;;  %v2286_v45 = vor.u32 %v2285_v35, %v2281_v13 }
 0x18c   :  { %v1822_v5 = vadd.f32 %v1821_v55, %v1589_v7  ;;  %v2072_v55 = vld [vmem:[#allocation2 + $0x50] sm:$0x1] }
 0x18d   :  { %1961 = vmatmul.bf16.gmra.mxu1 %v525_v4  ;;  %2953 = vmatmul.bf16.gmra.mxu0 %v2508_v41  ;;  %v2216_v59 = vunpack.c.l.b16 %v2072_v55 }
 0x18e   :  { %2775 = vmatmul.bf16.gmra.mxu2 %v3866_v24  ;;  %2864 = vmatmul.bf16.gmra.mxu3 %v2279_v39  ;;  %v4540_v46 = vadd.f32 %v1910_v1, %v1822_v5  ;;  %v2288_v24 = vshll.u32 %v2231_v33, 16  ;;  %v526_v1 = vrot.slane %v3976_v51, 1  ;;  %v2511_v39 = vsel %vm516_vm1, %v2509_v19, %v2510_v58  ;;  %v3817_v33 = vld [vmem:[#allocation2 + $0x30] sm:$0xe]  ;;  %v3879_v51 = vld [vmem:[#allocation2 + $0x48] sm:$0xf0] }
 0x190   :  { %v2290_v21 = vrot.slane %v2288_v24, 1  ;;  %v528_v44 = vsel %vm516_vm1, %v526_v1, %v527_v20  ;;  %v3818_v24 = vor.u32 %v3817_v33, %v3816_v43 }
 0x191   :  { %v1591_v0 = vpop.f32.mrf.mxu2  ;;  %v1824_v10 = vpop.f32.mrf.mxu3 }
 0x192   :  { %v1592_v31 = vadd.f32 %v1591_v0, %v1503_v34  ;;  %v1504_v32 = vpop.f32.mrf.mxu1  ;;  %v1915_v27 = vpop.f32.mrf.mxu0  ;;  %v2291_v49 = vsel %vm259_vm0, %v2286_v45, %v2290_v21  ;;  %v4557_v21 = vld [vmem:[#allocation2 + $0x54] sm:$0xff]  }
 0x193   :  { %v1505_v8 = vadd.f32 %v1504_v32, %v4747_v25  ;;  %v4748_v32 = vld [vmem:[#allocation29_spill] sm:$0xff]  ;;  %v529_v25 = vrot.slane %v3818_v24, 1 }
 0x194   :  { %v1825_v30 = vadd.f32 %v1824_v10, %v1592_v31  ;;  %v2232_v10 = vpack.c.b16 %v2216_v59, %v2216_v59  ;;  %v3880_v31 = vld [vmem:[#allocation2 + $0x48] sm:$0xe]  ;;  %v2073_v59 = vld [vmem:[#allocation2 + $0x5c] sm:$0x1] }
 0x195   :  { %v3881_v20 = vor.u32 %v3880_v31, %v3879_v51 }
 0x196   :  { %v4547_v28 = vadd.f32 %v1913_v2, %v1825_v30  ;;  %v3867_v2 = vld [vmem:[#allocation2 + $0x48] sm:$0xff]   ;;  %v2300_v58 = vshll.u32 %v2232_v10, 16 }
 0x197   :  { %v2295_v0 = vshll.u32 %v3867_v2, 16  ;;  %v2293_v19 = vshrl.u32 %v3867_v2, 16 }
 0x199   :  { %v1593_v7 = vpop.f32.mrf.mxu2  ;;  %v1826_v17 = vpop.f32.mrf.mxu3 }
 0x19a   :  { %v1594_v42 = vadd.f32 %v1593_v7, %v1505_v8  ;;  %v1507_v4 = vpop.f32.mrf.mxu1  ;;  %v1918_v41 = vpop.f32.mrf.mxu0  ;;  %v4749_v8 = vld [vmem:[#allocation15_spill] sm:$0xff]  ;;  %v2512_v7 = vrot.slane %v3881_v20, 1  ;;  %v4751_v20 = vld [vmem:[#allocation18_spill] sm:$0xff] }
 0x19b   :  { %v1508_v16 = vadd.f32 %v1507_v4, %v4748_v32  ;;  %v530_v55 = vrot.slane %v4749_v8, 1 }
 0x19c   :  { %v1827_v5 = vadd.f32 %v1826_v17, %v1594_v42  ;;  %v2513_v17 = vrot.slane %v2232_v10, 1  ;;  %v2217_v10 = vunpack.c.l.b16 %v2073_v59 }
 0x19d   :  { %1966 = vmatmul.bf16.gmra.mxu1 %v528_v44  ;;  %2958 = vmatmul.bf16.gmra.mxu0 %v2511_v39  ;;  %v2302_v44 = vrot.slane %v2300_v58, 1  ;;  %v4750_v39 = vld [vmem:[#allocation32_spill] sm:$0xff]  ;;  %v531_v31 = vsel %vm516_vm1, %v529_v25, %v530_v55 }
 0x19e   :  { %2780 = vmatmul.bf16.gmra.mxu2 %v4531_v37  ;;  %2869 = vmatmul.bf16.gmra.mxu3 %v2291_v49  ;;  %v4554_v34 = vadd.f32 %v1915_v27, %v1827_v5  ;;  %v2297_v37 = vrot.slane %v2295_v0, 1  ;;  %v3983_v27 = vld [vmem:[#allocation2 + $0x54] sm:$0xf0]  ;;  %v2514_v32 = vsel %vm516_vm1, %v2512_v7, %v2513_v17 }
 0x1a0   :  { %v2298_v4 = vor.u32 %v2297_v37, %v2293_v19 }
 0x1a1   :  { %v1596_v13 = vpop.f32.mrf.mxu2  ;;  %v1829_v35 = vpop.f32.mrf.mxu3 }
 0x1a2   :  { %v1597_v30 = vadd.f32 %v1596_v13, %v1508_v16  ;;  %v1509_v1 = vpop.f32.mrf.mxu1  ;;  %v1920_v3 = vpop.f32.mrf.mxu0  ;;  %v3981_v16 = vld [vmem:[#allocation2 + $0x3c] sm:$0xe]  ;;  %v2303_v13 = vsel %vm259_vm0, %v2298_v4, %v2302_v44  ;;  %v2305_v4 = vshrl.u32 %v4557_v21, 16 }
 0x1a3   :  { %v1510_v49 = vadd.f32 %v1509_v1, %v4750_v39  ;;  %v2233_v1 = vpack.c.b16 %v2217_v10, %v2217_v10 }
 0x1a4   :  { %v1830_v45 = vadd.f32 %v1829_v35, %v1597_v30  ;;  %v2307_v30 = vshll.u32 %v4557_v21, 16 }
 0x1a6   :  { %v4560_v42 = vadd.f32 %v1918_v41, %v1830_v45  ;;  %v3984_v41 = vld [vmem:[#allocation2 + $0x54] sm:$0xe]  ;;  %v4752_v45 = vld [vmem:[#allocation16_spill] sm:$0xff]  ;;  %v2309_v44 = vrot.slane %v2307_v30, 1 }
 0x1a7   :  { %v3982_v25 = vor.u32 %v3981_v16, %v4752_v45  ;;  %v3985_v17 = vor.u32 %v3984_v41, %v3983_v27  ;;  %v3819_v45 = vld [vmem:[#allocation2 + $0x48] sm:$0xf0] }
 0x1a9   :  { %v1598_v5 = vpop.f32.mrf.mxu2  ;;  %v1831_v43 = vpop.f32.mrf.mxu3 }
 0x1aa   :  { %v1599_v33 = vadd.f32 %v1598_v5, %v1510_v49  ;;  %v1512_v0 = vpop.f32.mrf.mxu1  ;;  %v1923_v51 = vpop.f32.mrf.mxu0  ;;  %v4753_v49 = vld [vmem:[#allocation17_spill] sm:$0xff]  ;;  %v2515_v5 = vrot.slane %v3985_v17, 1 }
 0x1ab   :  { %v1513_v19 = vadd.f32 %v1512_v0, %v4751_v20  ;;  %v533_v59 = vrot.slane %v4753_v49, 1  ;;  %v2310_v0 = vor.u32 %v2309_v44, %v2305_v4  ;;  %v3882_v4 = vld [vmem:[#allocation2 + $0x60] sm:$0xf0]  ;;  %v3883_v44 = vld [vmem:[#allocation2 + $0x60] sm:$0xe] }
 0x1ac   :  { %v1832_v35 = vadd.f32 %v1831_v43, %v1599_v33  ;;  %v2516_v43 = vrot.slane %v2233_v1, 1 }
 0x1ad   :  { %1971 = vmatmul.bf16.gmra.mxu1 %v531_v31  ;;  %2963 = vmatmul.bf16.gmra.mxu0 %v2514_v32  ;;  %v4754_v32 = vld [vmem:[#allocation19_spill] sm:$0xff] }
 0x1ae   :  { %2785 = vmatmul.bf16.gmra.mxu2 %v3867_v2  ;;  %2874 = vmatmul.bf16.gmra.mxu3 %v2303_v13  ;;  %v4566_v24 = vadd.f32 %v1920_v3, %v1832_v35  ;;  %v2312_v2 = vshll.u32 %v2233_v1, 16  ;;  %v532_v3 = vrot.slane %v3982_v25, 1  ;;  %v2074_v13 = vld [vmem:[#allocation2 + $0x68] sm:$0x1]  ;;  %v3820_v25 = vld [vmem:[#allocation2 + $0x48] sm:$0xe] }
 0x1b0   :  { %v2314_v31 = vrot.slane %v2312_v2, 1  ;;  %v534_v30 = vsel %vm516_vm1, %v532_v3, %v533_v59  ;;  %v4755_v2 = vld [vmem:[#allocation21_spill] sm:$0xff]  ;;  %v3821_v59 = vor.u32 %v3820_v25, %v3819_v45  ;;  %v4758_v45 = vld [vmem:[#allocation23_spill] sm:$0xff] }
 0x1b1   :  { %v1601_v37 = vpop.f32.mrf.mxu2  ;;  %v1834_v58 = vpop.f32.mrf.mxu3 }
 0x1b2   :  { %v1602_v8 = vadd.f32 %v1601_v37, %v1513_v19  ;;  %v1514_v55 = vpop.f32.mrf.mxu1  ;;  %v1925_v7 = vpop.f32.mrf.mxu0  ;;  %v2517_v19 = vsel %vm516_vm1, %v2515_v5, %v2516_v43  ;;  %v2315_v37 = vsel %vm259_vm0, %v2310_v0, %v2314_v31  ;;  %v3884_v31 = vor.u32 %v3883_v44, %v3882_v4 }
 0x1b3   :  { %v1515_v16 = vadd.f32 %v1514_v55, %v4754_v32 }
 0x1b4   :  { %v1835_v39 = vadd.f32 %v1834_v58, %v1602_v8  ;;  %v2218_v58 = vunpack.c.l.b16 %v2074_v13 }
 0x1b6   :  { %v4573_v33 = vadd.f32 %v1923_v51, %v1835_v39  ;;  %v3868_v51 = vld [vmem:[#allocation2 + $0x60] sm:$0xff]   ;;  %v2234_v17 = vpack.c.b16 %v2218_v58, %v2218_v58 }
 0x1b7   :  { %v2319_v55 = vshll.u32 %v3868_v51, 16  ;;  %v2317_v32 = vshrl.u32 %v3868_v51, 16 }
 0x1b9   :  { %v1603_v10 = vpop.f32.mrf.mxu2  ;;  %v1836_v35 = vpop.f32.mrf.mxu3 }
 0x1ba   :  { %v1604_v27 = vadd.f32 %v1603_v10, %v1515_v16  ;;  %v1517_v41 = vpop.f32.mrf.mxu1  ;;  %v1928_v20 = vpop.f32.mrf.mxu0  ;;  %v2324_v16 = vshll.u32 %v2234_v17, 16  ;;  %v4583_v10 = vld [vmem:[#allocation2 + $0x6c] sm:$0xff]  }
 0x1bb   :  { %v1518_v39 = vadd.f32 %v1517_v41, %v4755_v2  ;;  %v2075_v2 = vld [vmem:[#allocation2 + $0x74] sm:$0x1] }
 0x1bc   :  { %v1837_v1 = vadd.f32 %v1836_v35, %v1604_v27  ;;  %v535_v35 = vrot.slane %v3821_v59, 1  ;;  %v4756_v27 = vld [vmem:[#allocation20_spill] sm:$0xff] }
 0x1bd   :  { %1976 = vmatmul.bf16.gmra.mxu1 %v534_v30  ;;  %2968 = vmatmul.bf16.gmra.mxu0 %v2517_v19  ;;  %v536_v30 = vrot.slane %v4756_v27, 1  ;;  %v2518_v19 = vrot.slane %v3884_v31, 1 }
 0x1be   :  { %2790 = vmatmul.bf16.gmra.mxu2 %v4557_v21  ;;  %2879 = vmatmul.bf16.gmra.mxu3 %v2315_v37  ;;  %v4580_v8 = vadd.f32 %v1925_v7, %v1837_v1  ;;  %v2321_v21 = vrot.slane %v2319_v55, 1  ;;  %v3989_v7 = vld [vmem:[#allocation2 + $0x6c] sm:$0xf0]  ;;  %v2519_v37 = vrot.slane %v2234_v17, 1  ;;  %v2326_v1 = vrot.slane %v2324_v16, 1 }
 0x1bf   :  { %v2219_v17 = vunpack.c.l.b16 %v2075_v2  ;;  %v4760_v16 = vld [vmem:[#allocation25_spill] sm:$0xff]  ;;  %v2329_v2 = vshrl.u32 %v4583_v10, 16 }
 0x1c0   :  { %v2322_v58 = vor.u32 %v2321_v21, %v2317_v32  ;;  %v2520_v59 = vsel %vm516_vm1, %v2518_v19, %v2519_v37  ;;  %v2331_v32 = vshll.u32 %v4583_v10, 16  ;;  %v4761_v19 = vld [vmem:[#allocation22_spill] sm:$0xff] }
 0x1c1   :  { %v1606_v3 = vpop.f32.mrf.mxu2  ;;  %v1839_v49 = vpop.f32.mrf.mxu3  ;;  %v2235_v21 = vpack.c.b16 %v2219_v17, %v2219_v17 }
 0x1c2   :  { %v1607_v5 = vadd.f32 %v1606_v3, %v1518_v39  ;;  %v1519_v43 = vpop.f32.mrf.mxu1  ;;  %v1930_v0 = vpop.f32.mrf.mxu0  ;;  %v2327_v31 = vsel %vm259_vm0, %v2322_v58, %v2326_v1 }
 0x1c3   :  { %v1520_v25 = vadd.f32 %v1519_v43, %v4758_v45 }
 0x1c4   :  { %v1840_v13 = vadd.f32 %v1839_v49, %v1607_v5  ;;  %v537_v49 = vsel %vm516_vm1, %v535_v35, %v536_v30  ;;  %v3987_v5 = vld [vmem:[#allocation2 + $0x54] sm:$0xe] }
 0x1c5   :  { %v3988_v37 = vor.u32 %v3987_v5, %v4761_v19 }
 0x1c6   :  { %v4586_v41 = vadd.f32 %v1928_v20, %v1840_v13  ;;  %v3990_v20 = vld [vmem:[#allocation2 + $0x6c] sm:$0xe] }
 0x1c8   :  { %4757 = vst [vmem:[#allocation14_spill] sm:$0xff] %v4586_v41 }
 0x1c9   :  { %v1608_v4 = vpop.f32.mrf.mxu2  ;;  %v1841_v44 = vpop.f32.mrf.mxu3 }
 0x1ca   :  { %v1609_v55 = vadd.f32 %v1608_v4, %v1520_v25  ;;  %v1522_v39 = vpop.f32.mrf.mxu1  ;;  %v1933_v3 = vpop.f32.mrf.mxu0  ;;  %v3991_v25 = vor.u32 %v3990_v20, %v3989_v7  ;;  %v2333_v4 = vrot.slane %v2331_v32, 1 }
 0x1cb   :  { %v1523_v27 = vadd.f32 %v1522_v39, %v4760_v16  ;;  %v4764_v16 = vld [vmem:[#allocation27_spill] sm:$0xff] }
 0x1cc   :  { %v1842_v13 = vadd.f32 %v1841_v44, %v1609_v55  ;;  %v4762_v55 = vld [vmem:[#allocation24_spill] sm:$0xff]  ;;  %v2334_v39 = vor.u32 %v2333_v4, %v2329_v2 }
 0x1cd   :  { %1981 = vmatmul.bf16.gmra.mxu1 %v537_v49  ;;  %2973 = vmatmul.bf16.gmra.mxu0 %v2520_v59  ;;  %v539_v49 = vrot.slane %v4762_v55, 1  ;;  %v2521_v59 = vrot.slane %v3991_v25, 1  ;;  %v3823_v25 = vld [vmem:[#allocation2 + $0x60] sm:$0xe] }
 0x1ce   :  { %2795 = vmatmul.bf16.gmra.mxu2 %v3868_v51  ;;  %2884 = vmatmul.bf16.gmra.mxu3 %v2327_v31  ;;  %v4592_v43 = vadd.f32 %v1930_v0, %v1842_v13  ;;  %v2336_v51 = vshll.u32 %v2235_v21, 16  ;;  %v538_v0 = vrot.slane %v3988_v37, 1  ;;  %v2522_v31 = vrot.slane %v2235_v21, 1  ;;  %v4766_v55 = vld [vmem:[#allocation30_spill] sm:$0xff] }
 0x1d0   :  { %4759 = vst [vmem:[#allocation26_spill] sm:$0xff] %v4592_v43  ;;  %v2338_v13 = vrot.slane %v2336_v51, 1  ;;  %v540_v32 = vsel %vm516_vm1, %v538_v0, %v539_v49  ;;  %v3886_v0 = vld [vmem:[#allocation2 + $0x78] sm:$0xe] }
 0x1d1   :  { %v1611_v35 = vpop.f32.mrf.mxu2  ;;  %v1844_v30 = vpop.f32.mrf.mxu3 }
 0x1d2   :  { %v1612_v45 = vadd.f32 %v1611_v35, %v1523_v27  ;;  %v1524_v58 = vpop.f32.mrf.mxu1  ;;  %v1935_v1 = vpop.f32.mrf.mxu0  ;;  %v2076_v27 = vld [vmem:[#allocation2 + $0x80] sm:$0x1]  ;;  %v2339_v37 = vsel %vm259_vm0, %v2334_v39, %v2338_v13 }
 0x1d3   :  { %v1525_v5 = vadd.f32 %v1524_v58, %v4764_v16  ;;  %v3822_v58 = vld [vmem:[#allocation2 + $0x60] sm:$0xf0] }
 0x1d4   :  { %v1845_v44 = vadd.f32 %v1844_v30, %v1612_v45  ;;  %v2523_v30 = vsel %vm516_vm1, %v2521_v59, %v2522_v31  ;;  %v2220_v45 = vunpack.c.l.b16 %v2076_v27  ;;  %v3824_v39 = vor.u32 %v3823_v25, %v3822_v58  ;;  %v4769_v25 = vld [vmem:[#allocation33_spill] sm:$0xff] }
 0x1d6   :  { %v4599_v17 = vadd.f32 %v1933_v3, %v1845_v44  ;;  %v3869_v3 = vld [vmem:[#allocation2 + $0x78] sm:$0xff]   ;;  %v2236_v51 = vpack.c.b16 %v2220_v45, %v2220_v45 }
 0x1d7   :  { %v2343_v4 = vshll.u32 %v3869_v3, 16  ;;  %v3885_v44 = vld [vmem:[#allocation2 + $0x78] sm:$0xf0] }
 0x1d8   :  { %4763 = vst [vmem:[#allocation29_spill] sm:$0xff] %v4599_v17  ;;  %v3887_v27 = vor.u32 %v3886_v0, %v3885_v44 }
 0x1d9   :  { %v1613_v35 = vpop.f32.mrf.mxu2  ;;  %v1846_v19 = vpop.f32.mrf.mxu3 }
 0x1da   :  { %v1614_v7 = vadd.f32 %v1613_v35, %v1525_v5  ;;  %v1527_v20 = vpop.f32.mrf.mxu1  ;;  %v1938_v43 = vpop.f32.mrf.mxu0  ;;  %v2341_v35 = vshrl.u32 %v3869_v3, 16 }
 0x1db   :  { %v1528_v49 = vadd.f32 %v1527_v20, %v4766_v55 }
 0x1dc   :  { %v1847_v21 = vadd.f32 %v1846_v19, %v1614_v7  ;;  %v2348_v19 = vshll.u32 %v2236_v51, 16 }
 0x1dd   :  { %1986 = vmatmul.bf16.gmra.mxu1 %v540_v32  ;;  %2978 = vmatmul.bf16.gmra.mxu0 %v2523_v30  ;;  %v4609_v32 = vld [vmem:[#allocation2 + $0x84] sm:$0xff]   ;;  %v541_v30 = vrot.slane %v3824_v39, 1 }
 0x1de   :  { %2800 = vmatmul.bf16.gmra.mxu2 %v4583_v10  ;;  %2889 = vmatmul.bf16.gmra.mxu3 %v2339_v37  ;;  %v4606_v2 = vadd.f32 %v1935_v1, %v1847_v21  ;;  %v2345_v10 = vrot.slane %v2343_v4, 1  ;;  %v3995_v1 = vld [vmem:[#allocation2 + $0x84] sm:$0xf0]  ;;  %v2524_v21 = vrot.slane %v3887_v27, 1  ;;  %v2350_v58 = vrot.slane %v2348_v19, 1 }
 0x1df   :  { %v4767_v37 = vld [vmem:[#allocation28_spill] sm:$0xff] }
 0x1e0   :  { %4765 = vst [vmem:[#allocation15_spill] sm:$0xff] %v4606_v2  ;;  %v542_v45 = vrot.slane %v4767_v37, 1  ;;  %v2525_v2 = vrot.slane %v2236_v51, 1  ;;  %v2346_v55 = vor.u32 %v2345_v10, %v2341_v35  ;;  %v3993_v27 = vld [vmem:[#allocation2 + $0x6c] sm:$0xe]  ;;  %v2355_v35 = vshll.u32 %v4609_v32, 16 }
 0x1e1   :  { %v1616_v59 = vpop.f32.mrf.mxu2  ;;  %v1849_v31 = vpop.f32.mrf.mxu3 }
 0x1e2   :  { %v1617_v13 = vadd.f32 %v1616_v59, %v1528_v49  ;;  %v1529_v16 = vpop.f32.mrf.mxu1  ;;  %v1940_v5 = vpop.f32.mrf.mxu0  ;;  %v2077_v59 = vld [vmem:[#allocation2 + $0x8c] sm:$0x1]  ;;  %v2526_v39 = vsel %vm516_vm1, %v2524_v21, %v2525_v2  ;;  %v2351_v37 = vsel %vm259_vm0, %v2346_v55, %v2350_v58  ;;  %v4771_v2 = vld [vmem:[#allocation31_spill] sm:$0xff]  ;;  %v2353_v58 = vshrl.u32 %v4609_v32, 16 }
 0x1e3   :  { %v1530_v49 = vadd.f32 %v1529_v16, %v4769_v25  ;;  %v2221_v51 = vunpack.c.l.b16 %v2077_v59  ;;  %v3994_v21 = vor.u32 %v3993_v27, %v4771_v2 }
 0x1e4   :  { %v1850_v7 = vadd.f32 %v1849_v31, %v1617_v13  ;;  %v543_v13 = vsel %vm516_vm1, %v541_v30, %v542_v45 }
 0x1e5   :  { %v2237_v10 = vpack.c.b16 %v2221_v51, %v2221_v51 }
 0x1e6   :  { %v4612_v20 = vadd.f32 %v1938_v43, %v1850_v7  ;;  %v3996_v43 = vld [vmem:[#allocation2 + $0x84] sm:$0xe] }
 0x1e7   :  { %v3997_v55 = vor.u32 %v3996_v43, %v3995_v1  ;;  %v2360_v59 = vshll.u32 %v2237_v10, 16 }
 0x1e8   :  { %4768 = vst [vmem:[#allocation32_spill] sm:$0xff] %v4612_v20 }
 0x1e9   :  { %v1618_v44 = vpop.f32.mrf.mxu2  ;;  %v1851_v0 = vpop.f32.mrf.mxu3 }
 0x1ea   :  { %v1619_v4 = vadd.f32 %v1618_v44, %v1530_v49  ;;  %v1952_v17 = vpop.f32.mrf.mxu1  ;;  %v2944_v31 = vpop.f32.mrf.mxu0  ;;  %v2357_v49 = vrot.slane %v2355_v35, 1 }
 0x1eb   :  { %v1953_v41 = vadd.f32 %v1952_v17, %v4392_v54  ;;  %v3825_v54 = vld [vmem:[#allocation2 + $0x78] sm:$0xf0]  ;;  %v3826_v17 = vld [vmem:[#allocation2 + $0x78] sm:$0xe] }
 0x1ec   :  { %v1852_v7 = vadd.f32 %v1851_v0, %v1619_v4  ;;  %v544_v0 = vrot.slane %v3994_v21, 1 }
 0x1ed   :  { %1991 = vmatmul.bf16.gmra.mxu1 %v543_v13  ;;  %2983 = vmatmul.bf16.gmra.mxu0 %v2526_v39  ;;  %v2528_v13 = vrot.slane %v2237_v10, 1  ;;  %v2358_v39 = vor.u32 %v2357_v49, %v2353_v58  ;;  %v3888_v49 = vld [vmem:[#allocation2 + $0x90] sm:$0xf0] }
 0x1ee   :  { %2805 = vmatmul.bf16.gmra.mxu2 %v3869_v3  ;;  %2894 = vmatmul.bf16.gmra.mxu3 %v2351_v37  ;;  %v4618_v16 = vadd.f32 %v1940_v5, %v1852_v7  ;;  %v4772_v3 = vld [vmem:[#allocation34_spill] sm:$0xff]  ;;  %v2527_v5 = vrot.slane %v3997_v55, 1  ;;  %v2362_v37 = vrot.slane %v2360_v59, 1  ;;  %v2078_v7 = vld [vmem:[#allocation2 + $0x98] sm:$0x1] }
 0x1ef   :  { %v545_v4 = vrot.slane %v4772_v3, 1  ;;  %v2222_v2 = vunpack.c.l.b16 %v2078_v7  ;;  %v3889_v59 = vld [vmem:[#allocation2 + $0x90] sm:$0xe] }
 0x1f0   :  { %4770 = vst [vmem:[#allocation18_spill] sm:$0xff] %v4618_v16 }
 0x1f1   :  { %v2766_v19 = vpop.f32.mrf.mxu2  ;;  %v2855_v25 = vpop.f32.mrf.mxu3  ;;  %v546_v35 = vsel %vm516_vm1, %v544_v0, %v545_v4 }
 0x1f2   :  { %v1954_v30 = vpop.f32.mrf.mxu1  ;;  %v2946_v45 = vpop.f32.mrf.mxu0  ;;  %v2856_v44 = vadd.f32 %v2855_v25, %v2766_v19  ;;  %v2529_v19 = vsel %vm516_vm1, %v2527_v5, %v2528_v13  ;;  %v2363_v25 = vsel %vm259_vm0, %v2358_v39, %v2362_v37 }
 0x1f3   :  { %v1955_v10 = vadd.f32 %v1954_v30, %v4402_v15  ;;  %v3827_v30 = vor.u32 %v3826_v17, %v3825_v54 }
 0x1f4   :  { %v2945_v51 = vadd.f32 %v2944_v31, %v2856_v44  ;;  %v3870_v31 = vld [vmem:[#allocation2 + $0x90] sm:$0xff]  }
 0x1f5   :  { %v2365_v37 = vshrl.u32 %v3870_v31, 16 }
 0x1f6   :  { %v3024_v21 = vadd.f32 %v2945_v51, %v1953_v41 }
 0x1f8   :  { %v3157_v44 = vmul.f32 %v3024_v21, %v3024_v21 }
 0x1f9   :  { %v2768_v16 = vpop.f32.mrf.mxu2  ;;  %v2857_v20 = vpop.f32.mrf.mxu3 }
 0x1fa   :  { %v2858_v27 = vadd.f32 %v2857_v20, %v2768_v16  ;;  %v1957_v1 = vpop.f32.mrf.mxu1  ;;  %v2949_v43 = vpop.f32.mrf.mxu0  ;;  %v2367_v20 = vshll.u32 %v3870_v31, 16  ;;  %v2238_v16 = vpack.c.b16 %v2222_v2, %v2222_v2  ;;  %v547_v2 = vrot.slane %v3827_v30, 1  ;;  %v3999_v30 = vld [vmem:[#allocation2 + $0x84] sm:$0xe] }
 0x1fc   :  { %v2947_v55 = vadd.f32 %v2946_v45, %v2858_v27  ;;  %v2369_v51 = vrot.slane %v2367_v20, 1  ;;  %v2372_v7 = vshll.u32 %v2238_v16, 16  ;;  %v1958_v27 = vadd.f32 %v1957_v1, %v4412_v9 }
 0x1fd   :  { %1996 = vmatmul.bf16.gmra.mxu1 %v546_v35  ;;  %2988 = vmatmul.bf16.gmra.mxu0 %v2529_v19  ;;  %v4631_v19 = vld [vmem:[#allocation2 + $0x9c] sm:$0xff]  }
 0x1fe   :  { %v3025_v58 = vadd.f32 %v2947_v55, %v1955_v10  ;;  %2810 = vmatmul.bf16.gmra.mxu2 %v4609_v32  ;;  %2899 = vmatmul.bf16.gmra.mxu3 %v2363_v25  ;;  %v3890_v32 = vor.u32 %v3889_v59, %v3888_v49  ;;  %v4001_v25 = vld [vmem:[#allocation2 + $0x9c] sm:$0xf0]  ;;  %v548_v10 = vrot.slane %v4400_v38, 1  ;;  %v2370_v54 = vor.u32 %v2369_v51, %v2365_v37  ;;  %v2079_v49 = vld [vmem:[#allocation2 + $0xa4] sm:$0x1] }
 0x1ff   :  { %v2374_v17 = vrot.slane %v2372_v7, 1 }
 0x200   :  { %v3726_v0 = vpack.c.bf16 %v3025_v58, %v3024_v21  ;;  %v3120_v3 = vadd.f32 %v3025_v58, %v3024_v21  ;;  %v3158_v41 = vmul.f32 %v3025_v58, %v3025_v58  ;;  %v2530_v55 = vrot.slane %v3890_v32, 1 }
 0x201   :  { %v2771_v4 = vpop.f32.mrf.mxu2  ;;  %v2860_v15 = vpop.f32.mrf.mxu3  ;;  %v2531_v58 = vrot.slane %v2238_v16, 1  ;;  %v2375_v38 = vsel %vm259_vm0, %v2370_v54, %v2374_v17  ;;  %v4002_v16 = vld [vmem:[#allocation2 + $0x9c] sm:$0xe]  ;;  %v2377_v17 = vshrl.u32 %v4631_v19, 16 }
 0x202   :  { %3727 = vst [vmem:[#allocation7] sm:$0xff] %v3726_v0   ;;  %v3189_v45 = vadd.f32 %v3158_v41, %v3157_v44  ;;  %v2861_v5 = vadd.f32 %v2860_v15, %v2771_v4  ;;  %v1959_v13 = vpop.f32.mrf.mxu1  ;;  %v2951_v39 = vpop.f32.mrf.mxu0 }
 0x203   :  { %v2532_v15 = vsel %vm516_vm1, %v2530_v55, %v2531_v58  ;;  %v1960_v32 = vadd.f32 %v1959_v13, %v4422_v36  ;;  %v4000_v55 = vor.u32 %v3999_v30, %v4410_v12 }
 0x204   :  { %v2950_v35 = vadd.f32 %v2949_v43, %v2861_v5  ;;  %v549_v43 = vsel %vm516_vm1, %v547_v2, %v548_v10  ;;  %v2223_v5 = vunpack.c.l.b16 %v2079_v49 }
 0x206   :  { %v3026_v21 = vadd.f32 %v2950_v35, %v1958_v27  ;;  %v2239_v51 = vpack.c.b16 %v2223_v5, %v2223_v5 }
 0x208   :  { %v3121_v44 = vadd.f32 %v3120_v3, %v3026_v21  ;;  %v3159_v0 = vmul.f32 %v3026_v21, %v3026_v21 }
 0x209   :  { %v2773_v59 = vpop.f32.mrf.mxu2  ;;  %v2862_v20 = vpop.f32.mrf.mxu3 }
 0x20a   :  { %v3190_v41 = vadd.f32 %v3189_v45, %v3159_v0  ;;  %v2863_v4 = vadd.f32 %v2862_v20, %v2773_v59  ;;  %v1962_v9 = vpop.f32.mrf.mxu1  ;;  %v2954_v1 = vpop.f32.mrf.mxu0  ;;  %v2379_v45 = vshll.u32 %v4631_v19, 16  ;;  %v2384_v0 = vshll.u32 %v2239_v51, 16 }
 0x20b   :  { %v1963_v49 = vadd.f32 %v1962_v9, %v4428_v47  ;;  %v551_v20 = vrot.slane %v4420_v61, 1 }
 0x20c   :  { %v2952_v3 = vadd.f32 %v2951_v39, %v2863_v4  ;;  %v4003_v39 = vor.u32 %v4002_v16, %v4001_v25 }
 0x20d   :  { %2001 = vmatmul.bf16.gmra.mxu1 %v549_v43  ;;  %2993 = vmatmul.bf16.gmra.mxu0 %v2532_v15  ;;  %v2534_v43 = vrot.slane %v2239_v51, 1  ;;  %v2386_v15 = vrot.slane %v2384_v0, 1 }
 0x20e   :  { %v3027_v37 = vadd.f32 %v2952_v3, %v1960_v32  ;;  %2815 = vmatmul.bf16.gmra.mxu2 %v3870_v31  ;;  %2904 = vmatmul.bf16.gmra.mxu3 %v2375_v38  ;;  %v2381_v31 = vrot.slane %v2379_v45, 1  ;;  %v2533_v4 = vrot.slane %v4003_v39, 1  ;;  %v2080_v38 = vld [vmem:[#allocation2 + $0xb0] sm:$0x1] }
 0x20f   :  { %v2224_v61 = vunpack.c.l.b16 %v2080_v38 }
 0x210   :  { %v3731_v7 = vpack.c.bf16 %v3027_v37, %v3026_v21  ;;  %v3122_v27 = vadd.f32 %v3121_v44, %v3027_v37  ;;  %v3160_v35 = vmul.f32 %v3027_v37, %v3027_v37  ;;  %v550_v21 = vrot.slane %v4000_v55, 1 }
 0x211   :  { %v2776_v2 = vpop.f32.mrf.mxu2  ;;  %v2865_v10 = vpop.f32.mrf.mxu3  ;;  %v2382_v12 = vor.u32 %v2381_v31, %v2377_v17  ;;  %v2535_v9 = vsel %vm516_vm1, %v2533_v4, %v2534_v43  ;;  %v2240_v55 = vpack.c.b16 %v2224_v61, %v2224_v61  ;;  %v2081_v61 = vld [vmem:[#allocation2 + $0xbc] sm:$0x1] }
 0x212   :  { %3897 = vst [vmem:[#allocation7 + $0x8] sm:$0xff] %v3731_v7   ;;  %v3191_v58 = vadd.f32 %v3190_v41, %v3160_v35  ;;  %v2866_v54 = vadd.f32 %v2865_v10, %v2776_v2  ;;  %v1964_v36 = vpop.f32.mrf.mxu1  ;;  %v2956_v13 = vpop.f32.mrf.mxu0  ;;  %v552_v47 = vsel %vm516_vm1, %v550_v21, %v551_v20  ;;  %v3871_v7 = vld [vmem:[#allocation2 + $0xa8] sm:$0xff]   ;;  %v3828_v35 = vld [vmem:[#allocation2 + $0x90] sm:$0xf0]  ;;  %v3829_v2 = vld [vmem:[#allocation2 + $0x90] sm:$0xe] }
 0x213   :  { %v1965_v45 = vadd.f32 %v1964_v36, %v4438_v48  ;;  %v2391_v10 = vshll.u32 %v3871_v7, 16  ;;  %v3830_v48 = vor.u32 %v3829_v2, %v3828_v35  ;;  %v2396_v43 = vshll.u32 %v2240_v55, 16 }
 0x214   :  { %v2955_v59 = vadd.f32 %v2954_v1, %v2866_v54  ;;  %v2387_v1 = vsel %vm259_vm0, %v2382_v12, %v2386_v15  ;;  %v3892_v54 = vld [vmem:[#allocation2 + $0xa8] sm:$0xe] }
 0x215   :  { %v2393_v4 = vrot.slane %v2391_v10, 1  ;;  %v4005_v10 = vld [vmem:[#allocation2 + $0x9c] sm:$0xe] }
 0x216   :  { %v3028_v44 = vadd.f32 %v2955_v59, %v1963_v49 }
 0x218   :  { %v3123_v41 = vadd.f32 %v3122_v27, %v3028_v44  ;;  %v3161_v30 = vmul.f32 %v3028_v44, %v3028_v44 }
 0x219   :  { %v2778_v5 = vpop.f32.mrf.mxu2  ;;  %v2867_v25 = vpop.f32.mrf.mxu3 }
 0x21a   :  { %v3192_v16 = vadd.f32 %v3191_v58, %v3161_v30  ;;  %v2868_v32 = vadd.f32 %v2867_v25, %v2778_v5  ;;  %v1967_v3 = vpop.f32.mrf.mxu1  ;;  %v2959_v37 = vpop.f32.mrf.mxu0  ;;  %v3891_v58 = vld [vmem:[#allocation2 + $0xa8] sm:$0xf0]  ;;  %v4649_v30 = vld [vmem:[#allocation2 + $0xb4] sm:$0xff]   ;;  %v554_v5 = vrot.slane %v4436_v57, 1 }
 0x21b   :  { %v3893_v20 = vor.u32 %v3892_v54, %v3891_v58  ;;  %v1968_v12 = vadd.f32 %v1967_v3, %v4448_v50  ;;  %v2225_v58 = vunpack.c.l.b16 %v2081_v61 }
 0x21c   :  { %v2957_v51 = vadd.f32 %v2956_v13, %v2868_v32  ;;  %v2537_v32 = vrot.slane %v2240_v55, 1  ;;  %v4008_v55 = vld [vmem:[#allocation2 + $0xb4] sm:$0xe] }
 0x21d   :  { %2006 = vmatmul.bf16.gmra.mxu1 %v552_v47  ;;  %2998 = vmatmul.bf16.gmra.mxu0 %v2535_v9  ;;  %v2536_v25 = vrot.slane %v3893_v20, 1  ;;  %v2398_v47 = vrot.slane %v2396_v43, 1 }
 0x21e   :  { %v3029_v27 = vadd.f32 %v2957_v51, %v1965_v45  ;;  %2820 = vmatmul.bf16.gmra.mxu2 %v4631_v19  ;;  %2909 = vmatmul.bf16.gmra.mxu3 %v2387_v1  ;;  %v2389_v19 = vshrl.u32 %v3871_v7, 16 }
 0x21f   :  { %v2538_v2 = vsel %vm516_vm1, %v2536_v25, %v2537_v32  ;;  %v557_v32 = vrot.slane %v4454_v22, 1 }
 0x220   :  { %v3736_v39 = vpack.c.bf16 %v3029_v27, %v3028_v44  ;;  %v3124_v17 = vadd.f32 %v3123_v41, %v3029_v27  ;;  %v3162_v31 = vmul.f32 %v3029_v27, %v3029_v27  ;;  %v4007_v44 = vld [vmem:[#allocation2 + $0xb4] sm:$0xf0]  ;;  %v553_v41 = vrot.slane %v3830_v48, 1 }
 0x221   :  { %v2781_v0 = vpop.f32.mrf.mxu2  ;;  %v2870_v49 = vpop.f32.mrf.mxu3 }
 0x222   :  { %3898 = vst [vmem:[#allocation7 + $0x10] sm:$0xff] %v3736_v39   ;;  %v3193_v36 = vadd.f32 %v3192_v16, %v3162_v31  ;;  %v2871_v13 = vadd.f32 %v2870_v49, %v2781_v0  ;;  %v1969_v59 = vpop.f32.mrf.mxu1  ;;  %v2961_v21 = vpop.f32.mrf.mxu0  ;;  %v2394_v16 = vor.u32 %v2393_v4, %v2389_v19  ;;  %v2403_v31 = vshll.u32 %v4649_v30, 16 }
 0x223   :  { %v1970_v54 = vadd.f32 %v1969_v59, %v4456_v63  ;;  %v2241_v0 = vpack.c.b16 %v2225_v58, %v2225_v58  ;;  %v4006_v19 = vor.u32 %v4005_v10, %v4446_v11  ;;  %v3872_v58 = vld [vmem:[#allocation2 + $0xc0] sm:$0xff]  }
 0x224   :  { %v2960_v15 = vadd.f32 %v2959_v37, %v2871_v13  ;;  %v555_v37 = vsel %vm516_vm1, %v553_v41, %v554_v5  ;;  %v2399_v57 = vsel %vm259_vm0, %v2394_v16, %v2398_v47 }
 0x225   :  { %v2540_v47 = vrot.slane %v2241_v0, 1 }
 0x226   :  { %v3030_v38 = vadd.f32 %v2960_v15, %v1968_v12  ;;  %v2401_v12 = vshrl.u32 %v4649_v30, 16  ;;  %v2408_v15 = vshll.u32 %v2241_v0, 16  ;;  %v3894_v0 = vld [vmem:[#allocation2 + $0xc0] sm:$0xf0] }
 0x228   :  { %v3125_v9 = vadd.f32 %v3124_v17, %v3030_v38  ;;  %v3163_v1 = vmul.f32 %v3030_v38, %v3030_v38 }
 0x229   :  { %v2783_v45 = vpop.f32.mrf.mxu2  ;;  %v2872_v51 = vpop.f32.mrf.mxu3 }
 0x22a   :  { %v3194_v27 = vadd.f32 %v3193_v36, %v3163_v1  ;;  %v2873_v35 = vadd.f32 %v2872_v51, %v2783_v45  ;;  %v1972_v50 = vpop.f32.mrf.mxu1  ;;  %v2964_v3 = vpop.f32.mrf.mxu0  ;;  %v2082_v45 = vld [vmem:[#allocation2 + $0xc8] sm:$0x1] }
 0x22b   :  { %v1973_v41 = vadd.f32 %v1972_v50, %v4461_v6  ;;  %v2226_v22 = vunpack.c.l.b16 %v2082_v45 }
 0x22c   :  { %v2962_v39 = vadd.f32 %v2961_v21, %v2873_v35  ;;  %v4009_v21 = vor.u32 %v4008_v55, %v4007_v44 }
 0x22d   :  { %2011 = vmatmul.bf16.gmra.mxu1 %v555_v37  ;;  %3003 = vmatmul.bf16.gmra.mxu0 %v2538_v2 }
 0x22e   :  { %v3031_v17 = vadd.f32 %v2962_v39, %v1970_v54  ;;  %2825 = vmatmul.bf16.gmra.mxu2 %v3871_v7  ;;  %2914 = vmatmul.bf16.gmra.mxu3 %v2399_v57  ;;  %v2405_v7 = vrot.slane %v2403_v31, 1  ;;  %v2539_v16 = vrot.slane %v4009_v21, 1  ;;  %v3831_v54 = vld [vmem:[#allocation2 + $0xa8] sm:$0xf0]  ;;  %v3832_v39 = vld [vmem:[#allocation2 + $0xa8] sm:$0xe]  ;;  %v2242_v31 = vpack.c.b16 %v2226_v22, %v2226_v22 }
 0x230   :  { %v3741_v49 = vpack.c.bf16 %v3031_v17, %v3030_v38  ;;  %v3126_v48 = vadd.f32 %v3125_v9, %v3031_v17  ;;  %v3164_v36 = vmul.f32 %v3031_v17, %v3031_v17  ;;  %v556_v38 = vrot.slane %v4006_v19, 1 }
 0x231   :  { %v2786_v13 = vpop.f32.mrf.mxu2  ;;  %v2875_v20 = vpop.f32.mrf.mxu3  ;;  %v2406_v11 = vor.u32 %v2405_v7, %v2401_v12  ;;  %v2410_v9 = vrot.slane %v2408_v15, 1  ;;  %v2541_v50 = vsel %vm516_vm1, %v2539_v16, %v2540_v47  ;;  %v2415_v17 = vshll.u32 %v3872_v58, 16 }
 0x232   :  { %3899 = vst [vmem:[#allocation7 + $0x18] sm:$0xff] %v3741_v49   ;;  %v3195_v4 = vadd.f32 %v3194_v27, %v3164_v36  ;;  %v2876_v43 = vadd.f32 %v2875_v20, %v2786_v13  ;;  %v1974_v63 = vpop.f32.mrf.mxu1  ;;  %v2966_v59 = vpop.f32.mrf.mxu0  ;;  %v558_v6 = vsel %vm516_vm1, %v556_v38, %v557_v32  ;;  %v3895_v49 = vld [vmem:[#allocation2 + $0xc0] sm:$0xe]  ;;  %v2420_v7 = vshll.u32 %v2242_v31, 16  ;;  %v4013_v38 = vld [vmem:[#allocation2 + $0xcc] sm:$0xf0] }
 0x233   :  { %v1975_v10 = vadd.f32 %v1974_v63, %v4471_v14  ;;  %v3833_v14 = vor.u32 %v3832_v39, %v3831_v54  ;;  %v3896_v21 = vor.u32 %v3895_v49, %v3894_v0  ;;  %v2417_v12 = vrot.slane %v2415_v17, 1 }
 0x234   :  { %v2965_v5 = vadd.f32 %v2964_v3, %v2876_v43  ;;  %v2411_v3 = vsel %vm259_vm0, %v2406_v11, %v2410_v9  ;;  %v560_v16 = vrot.slane %v4469_v18, 1  ;;  %v2543_v11 = vrot.slane %v2242_v31, 1 }
 0x235   :  { %v2542_v47 = vrot.slane %v3896_v21, 1 }
 0x236   :  { %v3032_v25 = vadd.f32 %v2965_v5, %v1973_v41  ;;  %v4667_v5 = vld [vmem:[#allocation2 + $0xcc] sm:$0xff]  }
 0x237   :  { %v2427_v39 = vshll.u32 %v4667_v5, 16 }
 0x238   :  { %v3127_v1 = vadd.f32 %v3126_v48, %v3032_v25  ;;  %v3165_v61 = vmul.f32 %v3032_v25, %v3032_v25 }
 0x239   :  { %v2788_v51 = vpop.f32.mrf.mxu2  ;;  %v2877_v44 = vpop.f32.mrf.mxu3 }
 0x23a   :  { %v3196_v27 = vadd.f32 %v3195_v4, %v3165_v61  ;;  %v2878_v35 = vadd.f32 %v2877_v44, %v2788_v51  ;;  %v1977_v37 = vpop.f32.mrf.mxu1  ;;  %v2969_v2 = vpop.f32.mrf.mxu0  ;;  %v2083_v51 = vld [vmem:[#allocation2 + $0xd4] sm:$0x1] }
 0x23b   :  { %v1978_v15 = vadd.f32 %v1977_v37, %v4481_v56  ;;  %v2227_v22 = vunpack.c.l.b16 %v2083_v51 }
 0x23c   :  { %v2967_v57 = vadd.f32 %v2966_v59, %v2878_v35 }
 0x23d   :  { %2016 = vmatmul.bf16.gmra.mxu1 %v558_v6  ;;  %3008 = vmatmul.bf16.gmra.mxu0 %v2541_v50  ;;  %v2544_v50 = vsel %vm516_vm1, %v2542_v47, %v2543_v11  ;;  %v2243_v17 = vpack.c.b16 %v2227_v22, %v2227_v22 }
 0x23e   :  { %v3033_v55 = vadd.f32 %v2967_v57, %v1975_v10  ;;  %2830 = vmatmul.bf16.gmra.mxu2 %v4649_v30  ;;  %2919 = vmatmul.bf16.gmra.mxu3 %v2411_v3  ;;  %v2413_v30 = vshrl.u32 %v3872_v58, 16  ;;  %v4011_v3 = vld [vmem:[#allocation2 + $0xb4] sm:$0xe]  ;;  %v4014_v10 = vld [vmem:[#allocation2 + $0xcc] sm:$0xe] }
 0x240   :  { %v3746_v48 = vpack.c.bf16 %v3033_v55, %v3032_v25  ;;  %v3128_v36 = vadd.f32 %v3127_v1, %v3033_v55  ;;  %v3166_v13 = vmul.f32 %v3033_v55, %v3033_v55  ;;  %v559_v25 = vrot.slane %v3833_v14, 1 }
 0x241   :  { %v2791_v20 = vpop.f32.mrf.mxu2  ;;  %v2880_v19 = vpop.f32.mrf.mxu3  ;;  %v2418_v9 = vor.u32 %v2417_v12, %v2413_v30  ;;  %v2422_v1 = vrot.slane %v2420_v7, 1 }
 0x242   :  { %3900 = vst [vmem:[#allocation7 + $0x20] sm:$0xff] %v3746_v48   ;;  %v3197_v4 = vadd.f32 %v3196_v27, %v3166_v13  ;;  %v2881_v43 = vadd.f32 %v2880_v19, %v2791_v20  ;;  %v1979_v63 = vpop.f32.mrf.mxu1  ;;  %v2971_v59 = vpop.f32.mrf.mxu0  ;;  %v4773_v13 = vld [vmem:[#allocation35_spill] sm:$0xff] }
 0x243   :  { %v2423_v18 = vsel %vm259_vm0, %v2418_v9, %v2422_v1  ;;  %v1980_v57 = vadd.f32 %v1979_v63, %v4490_v29  ;;  %v4012_v20 = vor.u32 %v4011_v3, %v4773_v13  ;;  %v2425_v63 = vshrl.u32 %v4667_v5, 16 }
 0x244   :  { %v2970_v41 = vadd.f32 %v2969_v2, %v2881_v43  ;;  %v561_v2 = vsel %vm516_vm1, %v559_v25, %v560_v16  ;;  %v4015_v43 = vor.u32 %v4014_v10, %v4013_v38 }
 0x245   :  { %v562_v12 = vrot.slane %v4012_v20, 1 }
 0x246   :  { %v3034_v32 = vadd.f32 %v2970_v41, %v1978_v15  ;;  %v4774_v15 = vld [vmem:[#allocation36_spill] sm:$0xff]  ;;  %v2545_v25 = vrot.slane %v4015_v43, 1 }
 0x247   :  { %v563_v41 = vrot.slane %v4774_v15, 1 }
 0x248   :  { %v3129_v61 = vadd.f32 %v3128_v36, %v3034_v32  ;;  %v3167_v45 = vmul.f32 %v3034_v32, %v3034_v32 }
 0x249   :  { %v2793_v44 = vpop.f32.mrf.mxu2  ;;  %v2882_v27 = vpop.f32.mrf.mxu3 }
 0x24a   :  { %v3198_v35 = vadd.f32 %v3197_v4, %v3167_v45  ;;  %v2883_v6 = vadd.f32 %v2882_v27, %v2793_v44  ;;  %v1982_v56 = vpop.f32.mrf.mxu1  ;;  %v2974_v37 = vpop.f32.mrf.mxu0  ;;  %v564_v27 = vsel %vm516_vm1, %v562_v12, %v563_v41 }
 0x24b   :  { %v1983_v21 = vadd.f32 %v1982_v56, %v4495_v60 }
 0x24c   :  { %v2972_v55 = vadd.f32 %v2971_v59, %v2883_v6  ;;  %v2432_v59 = vshll.u32 %v2243_v17, 16 }
 0x24d   :  { %2021 = vmatmul.bf16.gmra.mxu1 %v561_v2  ;;  %3013 = vmatmul.bf16.gmra.mxu0 %v2544_v50 }
 0x24e   :  { %v3035_v54 = vadd.f32 %v2972_v55, %v1980_v57  ;;  %2835 = vmatmul.bf16.gmra.mxu2 %v3872_v58  ;;  %2924 = vmatmul.bf16.gmra.mxu3 %v2423_v18  ;;  %v2429_v58 = vrot.slane %v2427_v39, 1  ;;  %v2434_v47 = vrot.slane %v2432_v59, 1 }
 0x250   :  { %v3751_v31 = vpack.c.bf16 %v3035_v54, %v3034_v32  ;;  %v3130_v0 = vadd.f32 %v3129_v61, %v3035_v54  ;;  %v3168_v49 = vmul.f32 %v3035_v54, %v3035_v54  ;;  %v2546_v32 = vrot.slane %v2243_v17, 1 }
 0x251   :  { %v2796_v48 = vpop.f32.mrf.mxu2  ;;  %v2885_v36 = vpop.f32.mrf.mxu3  ;;  %v2430_v16 = vor.u32 %v2429_v58, %v2425_v63 }
 0x252   :  { %3901 = vst [vmem:[#allocation7 + $0x28] sm:$0xff] %v3751_v31   ;;  %v3199_v19 = vadd.f32 %v3198_v35, %v3168_v49  ;;  %v2886_v14 = vadd.f32 %v2885_v36, %v2796_v48  ;;  %v1984_v29 = vpop.f32.mrf.mxu1  ;;  %v2976_v4 = vpop.f32.mrf.mxu0  ;;  %v2547_v60 = vsel %vm516_vm1, %v2545_v25, %v2546_v32 }
 0x253   :  { %v2435_v35 = vsel %vm259_vm0, %v2430_v16, %v2434_v47  ;;  %v1985_v6 = vadd.f32 %v1984_v29, %v4502_v40 }
 0x254   :  { %v2975_v30 = vadd.f32 %v2974_v37, %v2886_v14 }
 0x256   :  { %v3036_v7 = vadd.f32 %v2975_v30, %v1983_v21 }
 0x258   :  { %v3131_v11 = vadd.f32 %v3130_v0, %v3036_v7  ;;  %v3169_v9 = vmul.f32 %v3036_v7, %v3036_v7 }
 0x259   :  { %v2798_v1 = vpop.f32.mrf.mxu2  ;;  %v2887_v61 = vpop.f32.mrf.mxu3 }
 0x25a   :  { %v3200_v38 = vadd.f32 %v3199_v19, %v3169_v9  ;;  %v2888_v45 = vadd.f32 %v2887_v61, %v2798_v1  ;;  %v1987_v51 = vpop.f32.mrf.mxu1  ;;  %v2979_v44 = vpop.f32.mrf.mxu0 }
 0x25b   :  { %v1988_v39 = vadd.f32 %v1987_v51, %v4508_v23 }
 0x25c   :  { %v2977_v56 = vadd.f32 %v2976_v4, %v2888_v45 }
 0x25d   :  { %2026 = vmatmul.bf16.gmra.mxu1 %v564_v27  ;;  %3018 = vmatmul.bf16.gmra.mxu0 %v2547_v60 }
 0x25e   :  { %v3037_v37 = vadd.f32 %v2977_v56, %v1985_v6  ;;  %2840 = vmatmul.bf16.gmra.mxu2 %v4667_v5  ;;  %2929 = vmatmul.bf16.gmra.mxu3 %v2435_v35 }
 0x260   :  { %v3756_v2 = vpack.c.bf16 %v3037_v37, %v3036_v7  ;;  %v3132_v50 = vadd.f32 %v3131_v11, %v3037_v37  ;;  %v3170_v3 = vmul.f32 %v3037_v37, %v3037_v37 }
 0x261   :  { %v2801_v18 = vpop.f32.mrf.mxu2  ;;  %v2890_v22 = vpop.f32.mrf.mxu3 }
 0x262   :  { %3902 = vst [vmem:[#allocation7 + $0x30] sm:$0xff] %v3756_v2   ;;  %v3201_v10 = vadd.f32 %v3200_v38, %v3170_v3  ;;  %v2891_v57 = vadd.f32 %v2890_v22, %v2801_v18  ;;  %v1989_v55 = vpop.f32.mrf.mxu1  ;;  %v2981_v54 = vpop.f32.mrf.mxu0 }
 0x263   :  { %v1990_v19 = vadd.f32 %v1989_v55, %v4514_v62 }
 0x264   :  { %v2980_v40 = vadd.f32 %v2979_v44, %v2891_v57 }
 0x266   :  { %v3038_v17 = vadd.f32 %v2980_v40, %v1988_v39 }
 0x268   :  { %v3133_v31 = vadd.f32 %v3132_v50, %v3038_v17  ;;  %v3171_v0 = vmul.f32 %v3038_v17, %v3038_v17 }
 0x269   :  { %v2803_v49 = vpop.f32.mrf.mxu2  ;;  %v2892_v48 = vpop.f32.mrf.mxu3 }
 0x26a   :  { %v3202_v5 = vadd.f32 %v3201_v10, %v3171_v0  ;;  %v2893_v36 = vadd.f32 %v2892_v48, %v2803_v49  ;;  %v1992_v13 = vpop.f32.mrf.mxu1  ;;  %v2984_v20 = vpop.f32.mrf.mxu0 }
 0x26b   :  { %v1993_v7 = vadd.f32 %v1992_v13, %v4521_v52 }
 0x26c   :  { %v2982_v14 = vadd.f32 %v2981_v54, %v2893_v36 }
 0x26e   :  { %v3039_v29 = vadd.f32 %v2982_v14, %v1990_v19 }
 0x270   :  { %v3761_v4 = vpack.c.bf16 %v3039_v29, %v3038_v17  ;;  %v3134_v43 = vadd.f32 %v3133_v31, %v3039_v29  ;;  %v3172_v63 = vmul.f32 %v3039_v29, %v3039_v29 }
 0x271   :  { %v2806_v58 = vpop.f32.mrf.mxu2  ;;  %v2895_v59 = vpop.f32.mrf.mxu3 }
 0x272   :  { %3903 = vst [vmem:[#allocation7 + $0x38] sm:$0xff] %v3761_v4   ;;  %v3203_v23 = vadd.f32 %v3202_v5, %v3172_v63  ;;  %v2896_v21 = vadd.f32 %v2895_v59, %v2806_v58  ;;  %v1994_v30 = vpop.f32.mrf.mxu1  ;;  %v2986_v12 = vpop.f32.mrf.mxu0 }
 0x273   :  { %v1995_v61 = vadd.f32 %v1994_v30, %v4528_v53 }
 0x274   :  { %v2985_v15 = vadd.f32 %v2984_v20, %v2896_v21 }
 0x276   :  { %v3040_v41 = vadd.f32 %v2985_v15, %v1993_v7 }
 0x278   :  { %v3135_v25 = vadd.f32 %v3134_v43, %v3040_v41  ;;  %v3173_v32 = vmul.f32 %v3040_v41, %v3040_v41 }
 0x279   :  { %v2808_v16 = vpop.f32.mrf.mxu2  ;;  %v2897_v62 = vpop.f32.mrf.mxu3 }
 0x27a   :  { %v3204_v47 = vadd.f32 %v3203_v23, %v3173_v32  ;;  %v2898_v11 = vadd.f32 %v2897_v62, %v2808_v16  ;;  %v1997_v9 = vpop.f32.mrf.mxu1  ;;  %v2989_v1 = vpop.f32.mrf.mxu0 }
 0x27b   :  { %v1998_v2 = vadd.f32 %v1997_v9, %v4534_v26 }
 0x27c   :  { %v2987_v38 = vadd.f32 %v2986_v12, %v2898_v11 }
 0x27e   :  { %v3041_v45 = vadd.f32 %v2987_v38, %v1995_v61 }
 0x280   :  { %v3766_v51 = vpack.c.bf16 %v3041_v45, %v3040_v41  ;;  %v3136_v44 = vadd.f32 %v3135_v25, %v3041_v45  ;;  %v3174_v27 = vmul.f32 %v3041_v45, %v3041_v45 }
 0x281   :  { %v2811_v60 = vpop.f32.mrf.mxu2  ;;  %v2900_v35 = vpop.f32.mrf.mxu3 }
 0x282   :  { %3904 = vst [vmem:[#allocation7 + $0x40] sm:$0xff] %v3766_v51   ;;  %v3205_v52 = vadd.f32 %v3204_v47, %v3174_v27  ;;  %v2901_v6 = vadd.f32 %v2900_v35, %v2811_v60  ;;  %v1999_v56 = vpop.f32.mrf.mxu1  ;;  %v2991_v37 = vpop.f32.mrf.mxu0 }
 0x283   :  { %v2000_v40 = vadd.f32 %v1999_v56, %v4540_v46 }
 0x284   :  { %v2990_v50 = vadd.f32 %v2989_v1, %v2901_v6 }
 0x286   :  { %v3042_v3 = vadd.f32 %v2990_v50, %v1998_v2 }
 0x288   :  { %v3137_v18 = vadd.f32 %v3136_v44, %v3042_v3  ;;  %v3175_v22 = vmul.f32 %v3042_v3, %v3042_v3 }
 0x289   :  { %v2813_v10 = vpop.f32.mrf.mxu2  ;;  %v2902_v53 = vpop.f32.mrf.mxu3 }
 0x28a   :  { %v3206_v57 = vadd.f32 %v3205_v52, %v3175_v22  ;;  %v2903_v55 = vadd.f32 %v2902_v53, %v2813_v10  ;;  %v2002_v54 = vpop.f32.mrf.mxu1  ;;  %v2994_v39 = vpop.f32.mrf.mxu0 }
 0x28b   :  { %v2003_v14 = vadd.f32 %v2002_v54, %v4547_v28 }
 0x28c   :  { %v2992_v17 = vadd.f32 %v2991_v37, %v2903_v55 }
 0x28e   :  { %v3043_v31 = vadd.f32 %v2992_v17, %v2000_v40 }
 0x290   :  { %v3771_v0 = vpack.c.bf16 %v3043_v31, %v3042_v3  ;;  %v3138_v49 = vadd.f32 %v3137_v18, %v3043_v31  ;;  %v3176_v48 = vmul.f32 %v3043_v31, %v3043_v31 }
 0x291   :  { %v2816_v5 = vpop.f32.mrf.mxu2  ;;  %v2905_v36 = vpop.f32.mrf.mxu3 }
 0x292   :  { %3905 = vst [vmem:[#allocation7 + $0x48] sm:$0xff] %v3771_v0   ;;  %v3207_v26 = vadd.f32 %v3206_v57, %v3176_v48  ;;  %v2906_v13 = vadd.f32 %v2905_v36, %v2816_v5  ;;  %v2004_v20 = vpop.f32.mrf.mxu1  ;;  %v2996_v19 = vpop.f32.mrf.mxu0 }
 0x293   :  { %v2005_v12 = vadd.f32 %v2004_v20, %v4554_v34 }
 0x294   :  { %v2995_v29 = vadd.f32 %v2994_v39, %v2906_v13 }
 0x296   :  { %v3044_v4 = vadd.f32 %v2995_v29, %v2003_v14 }
 0x298   :  { %v3139_v43 = vadd.f32 %v3138_v49, %v3044_v4  ;;  %v3177_v63 = vmul.f32 %v3044_v4, %v3044_v4 }
 0x299   :  { %v2818_v58 = vpop.f32.mrf.mxu2  ;;  %v2907_v46 = vpop.f32.mrf.mxu3 }
 0x29a   :  { %v3208_v59 = vadd.f32 %v3207_v26, %v3177_v63  ;;  %v2908_v23 = vadd.f32 %v2907_v46, %v2818_v58  ;;  %v2007_v21 = vpop.f32.mrf.mxu1  ;;  %v2999_v30 = vpop.f32.mrf.mxu0  ;;  %v4775_v46 = vld [vmem:[#allocation14_spill] sm:$0xff] }
 0x29b   :  { %v2008_v1 = vadd.f32 %v2007_v21, %v4560_v42 }
 0x29c   :  { %v2997_v7 = vadd.f32 %v2996_v19, %v2908_v23 }
 0x29e   :  { %v3045_v15 = vadd.f32 %v2997_v7, %v2005_v12 }
 0x2a0   :  { %v3776_v41 = vpack.c.bf16 %v3045_v15, %v3044_v4  ;;  %v3140_v25 = vadd.f32 %v3139_v43, %v3045_v15  ;;  %v3178_v32 = vmul.f32 %v3045_v15, %v3045_v15 }
 0x2a1   :  { %v2821_v16 = vpop.f32.mrf.mxu2  ;;  %v2910_v62 = vpop.f32.mrf.mxu3 }
 0x2a2   :  { %3906 = vst [vmem:[#allocation7 + $0x50] sm:$0xff] %v3776_v41   ;;  %v3209_v28 = vadd.f32 %v3208_v59, %v3178_v32  ;;  %v2911_v47 = vadd.f32 %v2910_v62, %v2821_v16  ;;  %v2009_v11 = vpop.f32.mrf.mxu1  ;;  %v3001_v9 = vpop.f32.mrf.mxu0  ;;  %v4776_v32 = vld [vmem:[#allocation26_spill] sm:$0xff] }
 0x2a3   :  { %v2010_v6 = vadd.f32 %v2009_v11, %v4566_v24 }
 0x2a4   :  { %v3000_v61 = vadd.f32 %v2999_v30, %v2911_v47 }
 0x2a6   :  { %v3046_v38 = vadd.f32 %v3000_v61, %v2008_v1 }
 0x2a8   :  { %v3141_v45 = vadd.f32 %v3140_v25, %v3046_v38  ;;  %v3179_v51 = vmul.f32 %v3046_v38, %v3046_v38 }
 0x2a9   :  { %v2823_v44 = vpop.f32.mrf.mxu2  ;;  %v2912_v34 = vpop.f32.mrf.mxu3 }
 0x2aa   :  { %v3210_v27 = vadd.f32 %v3209_v28, %v3179_v51  ;;  %v2913_v60 = vadd.f32 %v2912_v34, %v2823_v44  ;;  %v2012_v35 = vpop.f32.mrf.mxu1  ;;  %v3004_v52 = vpop.f32.mrf.mxu0  ;;  %v4777_v44 = vld [vmem:[#allocation29_spill] sm:$0xff] }
 0x2ab   :  { %v2013_v55 = vadd.f32 %v2012_v35, %v4573_v33 }
 0x2ac   :  { %v3002_v56 = vadd.f32 %v3001_v9, %v2913_v60 }
 0x2ae   :  { %v3047_v37 = vadd.f32 %v3002_v56, %v2010_v6 }
 0x2b0   :  { %v3781_v2 = vpack.c.bf16 %v3047_v37, %v3046_v38  ;;  %v3142_v50 = vadd.f32 %v3141_v45, %v3047_v37  ;;  %v3180_v3 = vmul.f32 %v3047_v37, %v3047_v37 }
 0x2b1   :  { %v2826_v18 = vpop.f32.mrf.mxu2  ;;  %v2915_v22 = vpop.f32.mrf.mxu3 }
 0x2b2   :  { %3907 = vst [vmem:[#allocation7 + $0x58] sm:$0xff] %v3781_v2   ;;  %v3211_v42 = vadd.f32 %v3210_v27, %v3180_v3  ;;  %v2916_v10 = vadd.f32 %v2915_v22, %v2826_v18  ;;  %v2014_v53 = vpop.f32.mrf.mxu1  ;;  %v3006_v57 = vpop.f32.mrf.mxu0  ;;  %v4778_v18 = vld [vmem:[#allocation15_spill] sm:$0xff] }
 0x2b3   :  { %v2015_v36 = vadd.f32 %v2014_v53, %v4580_v8 }
 0x2b4   :  { %v3005_v54 = vadd.f32 %v3004_v52, %v2916_v10 }
 0x2b6   :  { %v3048_v39 = vadd.f32 %v3005_v54, %v2013_v55 }
 0x2b8   :  { %v3143_v40 = vadd.f32 %v3142_v50, %v3048_v39  ;;  %v3181_v17 = vmul.f32 %v3048_v39, %v3048_v39 }
 0x2b9   :  { %v2828_v31 = vpop.f32.mrf.mxu2  ;;  %v2917_v24 = vpop.f32.mrf.mxu3 }
 0x2ba   :  { %v3212_v0 = vadd.f32 %v3211_v42, %v3181_v17  ;;  %v2918_v49 = vadd.f32 %v2917_v24, %v2828_v31  ;;  %v2017_v48 = vpop.f32.mrf.mxu1  ;;  %v3009_v5 = vpop.f32.mrf.mxu0 }
 0x2bb   :  { %v2018_v59 = vadd.f32 %v2017_v48, %v4775_v46 }
 0x2bc   :  { %v3007_v26 = vadd.f32 %v3006_v57, %v2918_v49 }
 0x2be   :  { %v3049_v13 = vadd.f32 %v3007_v26, %v2015_v36 }
 0x2c0   :  { %v3786_v20 = vpack.c.bf16 %v3049_v13, %v3048_v39  ;;  %v3144_v19 = vadd.f32 %v3143_v40, %v3049_v13  ;;  %v3182_v14 = vmul.f32 %v3049_v13, %v3049_v13 }
 0x2c1   :  { %v2831_v29 = vpop.f32.mrf.mxu2  ;;  %v2920_v4 = vpop.f32.mrf.mxu3 }
 0x2c2   :  { %3908 = vst [vmem:[#allocation7 + $0x60] sm:$0xff] %v3786_v20   ;;  %v3213_v33 = vadd.f32 %v3212_v0, %v3182_v14  ;;  %v2921_v43 = vadd.f32 %v2920_v4, %v2831_v29  ;;  %v2019_v63 = vpop.f32.mrf.mxu1  ;;  %v3011_v58 = vpop.f32.mrf.mxu0  ;;  %v4779_v0 = vld [vmem:[#allocation32_spill] sm:$0xff] }
 0x2c3   :  { %v2020_v16 = vadd.f32 %v2019_v63, %v4776_v32 }
 0x2c4   :  { %v3010_v23 = vadd.f32 %v3009_v5, %v2921_v43 }
 0x2c6   :  { %v3050_v21 = vadd.f32 %v3010_v23, %v2018_v59 }
 0x2c8   :  { %v3145_v30 = vadd.f32 %v3144_v19, %v3050_v21  ;;  %v3183_v12 = vmul.f32 %v3050_v21, %v3050_v21 }
 0x2c9   :  { %v2833_v7 = vpop.f32.mrf.mxu2  ;;  %v2922_v8 = vpop.f32.mrf.mxu3 }
 0x2ca   :  { %v3214_v15 = vadd.f32 %v3213_v33, %v3183_v12  ;;  %v2923_v41 = vadd.f32 %v2922_v8, %v2833_v7  ;;  %v2022_v25 = vpop.f32.mrf.mxu1  ;;  %v3014_v28 = vpop.f32.mrf.mxu0  ;;  %v4780_v33 = vld [vmem:[#allocation18_spill] sm:$0xff] }
 0x2cb   :  { %v2023_v34 = vadd.f32 %v2022_v25, %v4777_v44 }
 0x2cc   :  { %v3012_v62 = vadd.f32 %v3011_v58, %v2923_v41 }
 0x2ce   :  { %v3051_v47 = vadd.f32 %v3012_v62, %v2020_v16 }
 0x2d0   :  { %v3791_v11 = vpack.c.bf16 %v3051_v47, %v3050_v21  ;;  %v3146_v9 = vadd.f32 %v3145_v30, %v3051_v47  ;;  %v3184_v1 = vmul.f32 %v3051_v47, %v3051_v47 }
 0x2d1   :  { %v2836_v61 = vpop.f32.mrf.mxu2  ;;  %v2925_v38 = vpop.f32.mrf.mxu3 }
 0x2d2   :  { %3909 = vst [vmem:[#allocation7 + $0x68] sm:$0xff] %v3791_v11   ;;  %v3215_v45 = vadd.f32 %v3214_v15, %v3184_v1  ;;  %v2926_v51 = vadd.f32 %v2925_v38, %v2836_v61  ;;  %v2024_v60 = vpop.f32.mrf.mxu1  ;;  %v3016_v52 = vpop.f32.mrf.mxu0 }
 0x2d3   :  { %v2025_v22 = vadd.f32 %v2024_v60, %v4778_v18 }
 0x2d4   :  { %v3015_v27 = vadd.f32 %v3014_v28, %v2926_v51 }
 0x2d6   :  { %v3052_v35 = vadd.f32 %v3015_v27, %v2023_v34 }
 0x2d8   :  { %v3147_v6 = vadd.f32 %v3146_v9, %v3052_v35  ;;  %v3185_v56 = vmul.f32 %v3052_v35, %v3052_v35 }
 0x2d9   :  { %v2838_v37 = vpop.f32.mrf.mxu2  ;;  %v2927_v2 = vpop.f32.mrf.mxu3 }
 0x2da   :  { %v3216_v50 = vadd.f32 %v3215_v45, %v3185_v56  ;;  %v2928_v3 = vadd.f32 %v2927_v2, %v2838_v37  ;;  %v2027_v53 = vpop.f32.mrf.mxu1  ;;  %v3019_v39 = vpop.f32.mrf.mxu0 }
 0x2db   :  { %v2028_v49 = vadd.f32 %v2027_v53, %v4779_v0 }
 0x2dc   :  { %v3017_v42 = vadd.f32 %v3016_v52, %v2928_v3 }
 0x2de   :  { %v3053_v10 = vadd.f32 %v3017_v42, %v2025_v22 }
 0x2e0   :  { %v3796_v57 = vpack.c.bf16 %v3053_v10, %v3052_v35  ;;  %v3148_v55 = vadd.f32 %v3147_v6, %v3053_v10  ;;  %v3186_v54 = vmul.f32 %v3053_v10, %v3053_v10 }
 0x2e1   :  { %v2841_v40 = vpop.f32.mrf.mxu2  ;;  %v2930_v17 = vpop.f32.mrf.mxu3 }
 0x2e2   :  { %3910 = vst [vmem:[#allocation7 + $0x70] sm:$0xff] %v3796_v57   ;;  %v3217_v31 = vadd.f32 %v3216_v50, %v3186_v54  ;;  %v2931_v24 = vadd.f32 %v2930_v17, %v2841_v40  ;;  %v2029_v13 = vpop.f32.mrf.mxu1  ;;  %v3021_v4 = vpop.f32.mrf.mxu0 }
 0x2e3   :  { %v2030_v43 = vadd.f32 %v2029_v13, %v4780_v33 }
 0x2e4   :  { %v3020_v48 = vadd.f32 %v3019_v39, %v2931_v24 }
 0x2e6   :  { %v3054_v5 = vadd.f32 %v3020_v48, %v2028_v49 }
 0x2e8   :  { %v3149_v36 = vadd.f32 %v3148_v55, %v3054_v5  ;;  %v3187_v26 = vmul.f32 %v3054_v5, %v3054_v5 }
 0x2e9   :  { %v2843_v20 = vpop.f32.mrf.mxu2  ;;  %v2932_v19 = vpop.f32.mrf.mxu3 }
 0x2ea   :  { %v3218_v14 = vadd.f32 %v3217_v31, %v3187_v26  ;;  %v2933_v29 = vadd.f32 %v2932_v19, %v2843_v20 }
 0x2ec   :  { %v3022_v63 = vadd.f32 %v3021_v4, %v2933_v29 }
 0x2ee   :  { %v3055_v58 = vadd.f32 %v3022_v63, %v2030_v43 }
 0x2f0   :  { %v3801_v46 = vpack.c.bf16 %v3055_v58, %v3054_v5  ;;  %v3150_v59 = vadd.f32 %v3149_v36, %v3055_v58  ;;  %v3188_v23 = vmul.f32 %v3055_v58, %v3055_v58 }
 0x2f2   :  { %3911 = vst [vmem:[#allocation7 + $0x78] sm:$0xff] %v3801_v46   ;;  %v3151_v21 = vrot.slane %v3150_v59, 4  ;;  %v3219_v30 = vadd.f32 %v3218_v14, %v3188_v23 }
 0x2f3   :  { %3241 = dma.vmem_to_hbm [thread:$0]  %s3234_s1, 2048, %s3236_s26, [#allocation4], %s4121_s20, %s4121_s20, %s4122_s21  }
 0x2f4   :  { %v3152_v12 = vadd.f32 %v3151_v21, %v3150_v59  ;;  %v3220_v7 = vrot.slane %v3219_v30, 4 }
 0x2f6   :  { %v3153_v8 = vrot.slane %v3152_v12, 2  ;;  %v3221_v15 = vadd.f32 %v3220_v7, %v3219_v30 }
 0x2f8   :  { %v3154_v41 = vadd.f32 %v3153_v8, %v3152_v12  ;;  %v3222_v25 = vrot.slane %v3221_v15, 2 }
 0x2fa   :  { %v3155_v32 = vrot.slane %v3154_v41, 1  ;;  %v3223_v16 = vadd.f32 %v3222_v25, %v3221_v15 }
 0x2fc   :  { %v3224_v62 = vrot.slane %v3223_v16, 1  ;;  %v3156_v28 = vadd.f32 %v3155_v32, %v3154_v41 }
 0x2fe   :  { %v3225_v47 = vadd.f32 %v3224_v62, %v3223_v16 }
 0x300   :  { %v3227_v11 = vsel %vm3226_vm2, %v3156_v28, %v3225_v47 }
 0x301   :  { %3228 = vst [vmem:[#allocation8] sm:$0x3] %v3227_v11 }
 0x302   :  { %3252 = dma.vmem_to_hbm [thread:$0]  %s3248_s27, 32, %s3250_s30, [#allocation9]  }
 0x303   :  { %4116 = dma.done.wait [#allocation4], 2048  }
 0x304   :  { %4117 = vsyncadd [#allocation4], 4294965248 }
 0x305   :  { %4118 = dma.done.wait [#allocation9], 32  }
 0x306   :  { %4119 = vsyncadd [#allocation9], 4294967264 }
 0x307   :  { %3261 = vsyncpa [#allocation3], 1 }
 0x308   :  { %3262 = vsyncpa [#allocation6], 1 }
 0x309   :  { %3263 = vsyncpa [#allocation4], 1 }
 0x30a   :  { %3264 = vsyncpa [#allocation9], 1 }

</bundles_post_ra>
